<compile_context>
chip_gen: v6e
topology: v6e:2x2x1
jax: 0.10.0
libtpu: 0.0.40
codegen_flags: <defaults>
</compile_context>

<pallas_src>
import math
import jax
import jax.numpy as jnp
import numpy as np
from jax.experimental import pallas as pl
from jax.experimental.pallas import tpu as pltpu

EMBED_DIM = 32
NUM_HEADS = 4
HEAD_DIM = EMBED_DIM // NUM_HEADS
MLP_DIM = 64
LN_EPS = 1e-5            # torch.nn.LayerNorm default eps
NEG_INF = -1e30          # finite "minus infinity" for additive masks

# rows of the packed (9, D) vector slab: [self-attn out bias, cross-attn out
# bias, ln1 gamma/beta, ln2 gamma/beta, ln3 gamma/beta, mlp second bias]
BO_SA, BO_CA, G1, BE1, G2, BE2, G3, BE3, BM2 = range(9)


def _tensorcores_per_device():
    """1 for single-TC devices (v2/v3 cores, v5e, v6e); 2 for v4/v5p megacore and v7x."""
    try:
        kind = jax.devices()[0].device_kind.lower()
    except Exception:
        return 2
    single_tc = any(t in kind for t in
                    ("v2", "v3", "v5 lite", "v5e", "v6 lite", "v6e"))
    return 1 if single_tc else 2


# ---------------------------------------------------------------------------
# Pallas kernel: BB batch elements (flattened into rows) per grid step
# ---------------------------------------------------------------------------
def decoder_block_kernel(x_ref, enc_ref, msa_ref, mca_ref, sel_ref,
                         wqkv_ref, bqkv_ref, wo_ref, vecd_ref, bm1_ref,
                         w1_ref, w2_ref, out_ref):
    D = EMBED_DIM
    H = NUM_HEADS
    f32 = jnp.float32
    lo = lambda t: t.astype(jnp.bfloat16)     # MXU operands bf16, f32 accumulation

    x = x_ref[...]           # (Rq, D)  Rq = BB * Tq   (f32)
    enc = enc_ref[...]       # (Rc, D)  Rc = BB * Tc   (f32)
    sel = sel_ref[...]       # (H, 1, D)  0/1 head-lane selector (f32)
    vecd = vecd_ref[...]     # (9, D)   packed biases / LN affine params (f32)
    bqkv = bqkv_ref[...]     # (2, 3D)  packed fused-qkv biases (f32)
    scale = 1.0 / math.sqrt(HEAD_DIM)

    def layernorm(h, gi, bi):
        mu = jnp.mean(h, axis=-1, keepdims=True)
        var = jnp.mean(jnp.square(h - mu), axis=-1, keepdims=True)   # biased, like torch
        return ((h - mu) * jax.lax.rsqrt(var + LN_EPS)
                * vecd[gi:gi + 1, :] + vecd[bi:bi + 1, :])

    def attention(q_in, kv_in, w_qkv, b_qkv, w_out, b_out, mask_add, fused_qkv):
        # --- projections (fused) ---
        if fused_qkv:        # self-attn: q, k, v from the same stream -> one matmul
            qkv = jnp.dot(lo(q_in), w_qkv, preferred_element_type=f32) + b_qkv
            q, k, v = qkv[:, :D], qkv[:, D:2 * D], qkv[:, 2 * D:]
        else:                # cross-attn: q from decoder, fused kv from encoder
            q = jnp.dot(lo(q_in), w_qkv[:, :D],
                        preferred_element_type=f32) + b_qkv[:, :D]
            kv = jnp.dot(lo(kv_in), w_qkv[:, D:],
                         preferred_element_type=f32) + b_qkv[:, D:]
            k, v = kv[:, :D], kv[:, D:]

        Rq = q.shape[0]
        # Heads along the ROW axis: q_all[h*Rq + i, :] = q[i, :] * sel[h].
        # Non-head lanes of q are zeroed, so contracting the full D reproduces the
        # per-head (HEAD_DIM) contraction exactly.  Major-dim reshape only.
        q_all = (q[None, :, :] * sel).reshape(H * Rq, D)               # (H*Rq, D)

        # All-head scores in ONE MXU push.
        s = jax.lax.dot_general(lo(q_all), lo(k), (((1,), (1,)), ((), ())),
                                preferred_element_type=f32) * scale    # (H*Rq, Rk)
        s = s + mask_add            # additive mask (0 / -1e30), tiled over heads
        m = jnp.max(s, axis=-1, keepdims=True)
        e = jnp.exp(s - m)          # masked entries underflow to exactly 0
        attn = e * pl.reciprocal(jnp.sum(e, axis=-1, keepdims=True), approx=True)

        # All-head context in ONE MXU push, then head recombination: head lanes
        # are disjoint, so keep each head row-block's own lane slice and sum.
        ctx_all = jnp.dot(lo(attn), lo(v), preferred_element_type=f32)  # (H*Rq, D)
        ctx = jnp.sum(ctx_all.reshape(H, Rq, D) * sel, axis=0)          # (Rq, D)
        return jnp.dot(lo(ctx), w_out, preferred_element_type=f32) + b_out

    # x = x + self_attn(norm1(x), tgt_mask)
    h = layernorm(x, G1, BE1)
    x = x + attention(h, h, wqkv_ref[0], bqkv[0:1, :], wo_ref[0],
                      vecd[BO_SA:BO_SA + 1, :], msa_ref[...], fused_qkv=True)

    # x = x + cross_attn(norm2(x), enc_out)
    h = layernorm(x, G2, BE2)
    x = x + attention(h, enc, wqkv_ref[1], bqkv[1:2, :], wo_ref[1],
                      vecd[BO_CA:BO_CA + 1, :], mca_ref[...], fused_qkv=False)

    # x = x + mlp(norm3(x))   (Linear -> GELU (tanh, EUP) -> Linear)
    h = layernorm(x, G3, BE3)
    h1 = jnp.dot(lo(h), w1_ref[...], preferred_element_type=f32) + bm1_ref[...]
    h1 = jax.nn.gelu(h1, approximate=True)
    x = x + jnp.dot(lo(h1), w2_ref[...], preferred_element_type=f32) + vecd[BM2:BM2 + 1, :]

    out_ref[...] = x


# ---------------------------------------------------------------------------
# wrapper: parameter packing, mask construction, batch-blocked pallas_call
# ---------------------------------------------------------------------------
def transformer_decoder_block(x, enc_out, tgt_mask, params, *, batch_block=None):
    B, Tq, D = x.shape
    Tc = enc_out.shape[1]
    assert D == EMBED_DIM
    f32, bf16 = jnp.float32, jnp.bfloat16
    H = NUM_HEADS

    # --- generation-aware grid sizing ------------------------------------
    # Single-TC chips (v5e/v6e): one grid step (no ~0.35us/step overhead, max
    # rows per MXU push).  2-TC chips (v7x, v4/v5p): >=2 "parallel" steps so
    # both TensorCores get a row block (B==1 unavoidably leaves one core idle).
    if batch_block is None:
        if _tensorcores_per_device() <= 1 or B < 2:
            batch_block = B
        else:
            batch_block = B // 2
            if B % batch_block:
                batch_block = 1
    BB = batch_block
    assert B % BB == 0
    if ((BB * Tq) % 8 or (BB * Tc) % 8) and BB != B:
        BB = B                                    # full-array block sidesteps (8,128) rule
    nsteps = B // BB
    Rq, Rc = BB * Tq, BB * Tc

    p = {k: jnp.asarray(v, f32) for k, v in params.items()}

    # fused QKV weights/biases, stacked [self-attn; cross-attn].  Weights are
    # pre-cast to bf16 (MXU operands; halves their DMA); biases stay f32.
    wqkv = jnp.stack([
        jnp.concatenate([p["sa_wq"], p["sa_wk"], p["sa_wv"]], axis=1),
        jnp.concatenate([p["ca_wq"], p["ca_wk"], p["ca_wv"]], axis=1)]).astype(bf16)  # (2,D,3D)
    bqkv = jnp.stack([
        jnp.concatenate([p["sa_bq"], p["sa_bk"], p["sa_bv"]], axis=1)[0],
        jnp.concatenate([p["ca_bq"], p["ca_bk"], p["ca_bv"]], axis=1)[0]])             # (2,3D)
    wo = jnp.stack([p["sa_wo"], p["ca_wo"]]).astype(bf16)                               # (2,D,D)
    vecd = jnp.concatenate([p["sa_bo"], p["ca_bo"], p["g1"], p["be1"],
                            p["g2"], p["be2"], p["g3"], p["be3"], p["bm2"]])            # (9,D)
    bm1 = p["bm1"]
    w1 = p["w1"].astype(bf16)
    w2 = p["w2"].astype(bf16)

    # head selector: sel[h, 0, d] = 1 iff embedding lane d belongs to head h.
    sel = jnp.repeat(jnp.eye(H, dtype=f32), HEAD_DIM, axis=1)[:, None, :]

    # additive masks (0 / -1e30), block-diagonal across the BB batch elements in
    # one grid step; causal inside each self-attn diagonal block; tiled over the
    # H head row-blocks used by the kernel's heads-on-rows layout.
    if tgt_mask is None:
        causal = jnp.zeros((Tq, Tq), f32)
    else:
        tm = jnp.asarray(tgt_mask)
        assert tm.shape[-2:] == (Tq, Tq) and all(int(s) == 1 for s in tm.shape[:-2]), \
            "tgt_mask must be (Tq,Tq) or (1,..,1,Tq,Tq); per-batch masks unsupported"
        causal = jnp.where(tm.reshape(Tq, Tq) == 0, f32(NEG_INF), f32(0.0))
    bid_q = jnp.repeat(jnp.arange(BB), Tq)
    bid_c = jnp.repeat(jnp.arange(BB), Tc)
    mask_sa = jnp.where(bid_q[:, None] == bid_q[None, :],
                        jnp.tile(causal, (BB, BB)), f32(NEG_INF))       # (Rq, Rq)
    mask_ca = jnp.where(bid_q[:, None] == bid_c[None, :],
                        f32(0.0), f32(NEG_INF))                         # (Rq, Rc)
    mask_sa = jnp.tile(mask_sa, (H, 1))                                 # (H*Rq, Rq)
    mask_ca = jnp.tile(mask_ca, (H, 1))                                 # (H*Rq, Rc)

    # flatten (B, T, D) -> (B*T, D) outside the kernel (pure layout plumbing).
    x2 = x.astype(f32).reshape(B * Tq, D)
    e2 = enc_out.astype(f32).reshape(B * Tc, D)

    consts = (mask_sa, mask_ca, sel, wqkv, bqkv, wo, vecd, bm1, w1, w2)

    def build(single_buffer):
        def const_spec(a):
            zeros = (0,) * a.ndim
            imap = lambda b, _z=zeros: _z
            if single_buffer:
                # index_map never changes -> one pipeline buffer is enough.
                return pl.BlockSpec(a.shape, imap,
                                    pipeline_mode=pl.Buffered(buffer_count=1))
            return pl.BlockSpec(a.shape, imap)

        in_specs = ([pl.BlockSpec((Rq, D), lambda b: (b, 0)),
                     pl.BlockSpec((Rc, D), lambda b: (b, 0))]
                    + [const_spec(c) for c in consts])
        out_spec = pl.BlockSpec((Rq, D), lambda b: (b, 0))

        return pl.pallas_call(
            decoder_block_kernel,
            out_shape=jax.ShapeDtypeStruct((B * Tq, D), f32),
            grid_spec=pltpu.PrefetchScalarGridSpec(
                num_scalar_prefetch=0,
                grid=(nsteps,),
                in_specs=in_specs,
                out_specs=out_spec),
            compiler_params=pltpu.CompilerParams(
                dimension_semantics=("parallel",)),
        )

    try:
        out2 = build(True)(x2, e2, *consts)
        out2.block_until_ready()          # surface any lowering issue with Buffered(1)
    except Exception:
        out2 = build(False)(x2, e2, *consts)   # safe fallback: default double-buffering
    return out2.reshape(B, Tq, D)


# ---------------------------------------------------------------------------
# pure-JAX reference mirroring the PyTorch module exactly (f32, erf GELU)
# ---------------------------------------------------------------------------
def reference(x, enc_out, tgt_mask, p):
    def ln(h, g, b):
        mu = jnp.mean(h, axis=-1, keepdims=True)
        var = jnp.mean((h - mu) ** 2, axis=-1, keepdims=True)
        return (h - mu) / jnp.sqrt(var + LN_EPS) * g + b

    def mha(q_in, kv_in, wq, bq, wk, bk, wv, bv, wo, bo, mask):
        B, Nq, Dm = q_in.shape
        Nc = kv_in.shape[1]
        q = (q_in @ wq + bq).reshape(B, Nq, NUM_HEADS, HEAD_DIM).transpose(0, 2, 1, 3)
        k = (kv_in @ wk + bk).reshape(B, Nc, NUM_HEADS, HEAD_DIM).transpose(0, 2, 1, 3)
        v = (kv_in @ wv + bv).reshape(B, Nc, NUM_HEADS, HEAD_DIM).transpose(0, 2, 1, 3)
        s = jnp.einsum("bhqd,bhkd->bhqk", q, k) / math.sqrt(HEAD_DIM)
        if mask is not None:
            s = jnp.where(mask == 0, -jnp.inf, s)
        a = jax.nn.softmax(s, axis=-1)
        o = jnp.einsum("bhqk,bhkd->bhqd", a, v).transpose(0, 2, 1, 3).reshape(B, Nq, Dm)
        return o @ wo + bo

    h = ln(x, p["g1"], p["be1"])
    x = x + mha(h, h, p["sa_wq"], p["sa_bq"], p["sa_wk"], p["sa_bk"],
                p["sa_wv"], p["sa_bv"], p["sa_wo"], p["sa_bo"], tgt_mask)
    h = ln(x, p["g2"], p["be2"])
    x = x + mha(h, enc_out, p["ca_wq"], p["ca_bq"], p["ca_wk"], p["ca_bk"],
                p["ca_wv"], p["ca_bv"], p["ca_wo"], p["ca_bo"], None)
    h = ln(x, p["g3"], p["be3"])
    x = x + (jax.nn.gelu(h @ p["w1"] + p["bm1"], approximate=False) @ p["w2"] + p["bm2"])
    return x


if __name__ == "__main__":
    B, Tq, Tc, D, M = 4, 8, 16, EMBED_DIM, MLP_DIM

    key = jax.random.PRNGKey(0)
    kiter = iter(jax.random.split(key, 64))

    def nrm(shape, scale=0.05):
        return (scale * jax.random.normal(next(kiter), shape)).astype(jnp.float32)

    params = {}
    for pre in ("sa", "ca"):
        for w, b in (("wq", "bq"), ("wk", "bk"), ("wv", "bv"), ("wo", "bo")):
            params[f"{pre}_{w}"] = nrm((D, D))
            params[f"{pre}_{b}"] = nrm((1, D))
    for i in ("1", "2", "3"):
        params[f"g{i}"] = (1.0 + nrm((1, D))).astype(jnp.float32)
        params[f"be{i}"] = nrm((1, D))
    params["w1"] = nrm((D, M))
    params["bm1"] = nrm((1, M))
    params["w2"] = nrm((M, D))
    params["bm2"] = nrm((1, D))

    x = nrm((B, Tq, D), scale=1.0)
    enc_out = nrm((B, Tc, D), scale=1.0)
    # causal target mask, semantics of masked_fill(mask == 0, -inf)
    tgt_mask = jnp.tril(jnp.ones((Tq, Tq), dtype=jnp.float32))

    out = transformer_decoder_block(x, enc_out, tgt_mask, params)
    out = jax.block_until_ready(out)

    ref = jax.block_until_ready(reference(x, enc_out, tgt_mask, params))
    # tolerance covers bf16 MXU operand rounding + EUP approx reciprocal / tanh GELU
    np.testing.assert_allclose(np.asarray(out), np.asarray(ref),
                               atol=2e-3, rtol=2e-3)

    print("KERNEL_OK")
</pallas_src>

<mosaic_0001>
module attributes {stable_mosaic.version = 11 : i64} {
  func.func @decoder_block_kernel(%arg0: i32, %arg1: memref<16x32xf32, #tpu.memory_space<vmem>>, %arg2: memref<32x32xf32, #tpu.memory_space<vmem>>, %arg3: memref<64x16xf32, #tpu.memory_space<vmem>>, %arg4: memref<64x32xf32, #tpu.memory_space<vmem>>, %arg5: memref<4x1x32xf32, #tpu.memory_space<vmem>>, %arg6: memref<2x32x96xbf16, #tpu.memory_space<vmem>>, %arg7: memref<2x96xf32, #tpu.memory_space<vmem>>, %arg8: memref<2x32x32xbf16, #tpu.memory_space<vmem>>, %arg9: memref<9x32xf32, #tpu.memory_space<vmem>>, %arg10: memref<1x64xf32, #tpu.memory_space<vmem>>, %arg11: memref<32x64xbf16, #tpu.memory_space<vmem>>, %arg12: memref<64x32xbf16, #tpu.memory_space<vmem>>, %arg13: memref<16x32xf32, #tpu.memory_space<vmem>>) attributes {dimension_semantics = [#tpu.dimension_semantics<parallel>], iteration_bounds = array<i64: 2>, scalar_prefetch = 0 : i64, scratch_operands = 0 : i64, tpu.core_type = #tpu.core_type<tc>, window_params = [{transform_indices = @transform_0, window_bounds = array<i64: 16, 32>}, {transform_indices = @transform_1, window_bounds = array<i64: 32, 32>}, {pipeline_mode = #tpu.pipeline_mode<synchronous>, transform_indices = @transform_2, window_bounds = array<i64: 64, 16>}, {pipeline_mode = #tpu.pipeline_mode<synchronous>, transform_indices = @transform_3, window_bounds = array<i64: 64, 32>}, {pipeline_mode = #tpu.pipeline_mode<synchronous>, transform_indices = @transform_4, window_bounds = array<i64: 4, 1, 32>}, {pipeline_mode = #tpu.pipeline_mode<synchronous>, transform_indices = @transform_5, window_bounds = array<i64: 2, 32, 96>}, {pipeline_mode = #tpu.pipeline_mode<synchronous>, transform_indices = @transform_6, window_bounds = array<i64: 2, 96>}, {pipeline_mode = #tpu.pipeline_mode<synchronous>, transform_indices = @transform_7, window_bounds = array<i64: 2, 32, 32>}, {pipeline_mode = #tpu.pipeline_mode<synchronous>, transform_indices = @transform_8, window_bounds = array<i64: 9, 32>}, {pipeline_mode = #tpu.pipeline_mode<synchronous>, transform_indices = @transform_9, window_bounds = array<i64: 1, 64>}, {pipeline_mode = #tpu.pipeline_mode<synchronous>, transform_indices = @transform_10, window_bounds = array<i64: 32, 64>}, {pipeline_mode = #tpu.pipeline_mode<synchronous>, transform_indices = @transform_11, window_bounds = array<i64: 64, 32>}, {transform_indices = @transform_12, window_bounds = array<i64: 16, 32>}]} {
    %c0 = arith.constant 0 : index
    %c0_0 = arith.constant 0 : index
    %0 = vector.load %arg1[%c0, %c0_0] : memref<16x32xf32, #tpu.memory_space<vmem>>, vector<16x32xf32>
    %c0_1 = arith.constant 0 : index
    %c0_2 = arith.constant 0 : index
    %1 = vector.load %arg2[%c0_1, %c0_2] : memref<32x32xf32, #tpu.memory_space<vmem>>, vector<32x32xf32>
    %c0_3 = arith.constant 0 : index
    %c0_4 = arith.constant 0 : index
    %c0_5 = arith.constant 0 : index
    %2 = vector.load %arg5[%c0_3, %c0_4, %c0_5] : memref<4x1x32xf32, #tpu.memory_space<vmem>>, vector<4x1x32xf32>
    %c0_6 = arith.constant 0 : index
    %c0_7 = arith.constant 0 : index
    %3 = vector.load %arg9[%c0_6, %c0_7] : memref<9x32xf32, #tpu.memory_space<vmem>>, vector<9x32xf32>
    %c0_8 = arith.constant 0 : index
    %c0_9 = arith.constant 0 : index
    %4 = vector.load %arg7[%c0_8, %c0_9] : memref<2x96xf32, #tpu.memory_space<vmem>>, vector<2x96xf32>
    %cst = arith.constant dense<0.000000e+00> : vector<16xf32>
    %5 = vector.multi_reduction <add>, %0, %cst [1] : vector<16x32xf32> to vector<16xf32>
    %6 = vector.shape_cast %5 : vector<16xf32> to vector<16x1xf32>
    %cst_10 = arith.constant 3.200000e+01 : f32
    %7 = vector.broadcast %cst_10 : f32 to vector<16x1xf32>
    %8 = arith.divf %6, %7 : vector<16x1xf32>
    %9 = vector.broadcast %8 : vector<16x1xf32> to vector<16x32xf32>
    %10 = arith.subf %0, %9 : vector<16x32xf32>
    %11 = arith.mulf %10, %10 : vector<16x32xf32>
    %cst_11 = arith.constant dense<0.000000e+00> : vector<16xf32>
    %12 = vector.multi_reduction <add>, %11, %cst_11 [1] : vector<16x32xf32> to vector<16xf32>
    %13 = vector.shape_cast %12 : vector<16xf32> to vector<16x1xf32>
    %cst_12 = arith.constant 3.200000e+01 : f32
    %14 = vector.broadcast %cst_12 : f32 to vector<16x1xf32>
    %15 = arith.divf %13, %14 : vector<16x1xf32>
    %16 = vector.broadcast %8 : vector<16x1xf32> to vector<16x32xf32>
    %17 = arith.subf %0, %16 : vector<16x32xf32>
    %cst_13 = arith.constant 9.99999974E-6 : f32
    %18 = vector.broadcast %cst_13 : f32 to vector<16x1xf32>
    %19 = arith.addf %15, %18 : vector<16x1xf32>
    %20 = math.rsqrt %19 : vector<16x1xf32>
    %21 = vector.broadcast %20 : vector<16x1xf32> to vector<16x32xf32>
    %22 = arith.mulf %17, %21 : vector<16x32xf32>
    %23 = vector.extract_strided_slice %3 {offsets = [2, 0], sizes = [1, 32], strides = [1, 1]} : vector<9x32xf32> to vector<1x32xf32>
    %24 = vector.broadcast %23 : vector<1x32xf32> to vector<16x32xf32>
    %25 = arith.mulf %22, %24 : vector<16x32xf32>
    %26 = vector.extract_strided_slice %3 {offsets = [3, 0], sizes = [1, 32], strides = [1, 1]} : vector<9x32xf32> to vector<1x32xf32>
    %27 = vector.broadcast %26 : vector<1x32xf32> to vector<16x32xf32>
    %28 = arith.addf %25, %27 : vector<16x32xf32>
    %c0_14 = arith.constant 0 : index
    %c0_15 = arith.constant 0 : index
    %c0_16 = arith.constant 0 : index
    %29 = vector.load %arg6[%c0_14, %c0_15, %c0_16] : memref<2x32x96xbf16, #tpu.memory_space<vmem>>, vector<1x32x96xbf16>
    %30 = vector.shape_cast %29 : vector<1x32x96xbf16> to vector<32x96xbf16>
    %31 = vector.extract_strided_slice %4 {offsets = [0, 0], sizes = [1, 96], strides = [1, 1]} : vector<2x96xf32> to vector<1x96xf32>
    %c0_17 = arith.constant 0 : index
    %c0_18 = arith.constant 0 : index
    %c0_19 = arith.constant 0 : index
    %32 = vector.load %arg8[%c0_17, %c0_18, %c0_19] : memref<2x32x32xbf16, #tpu.memory_space<vmem>>, vector<1x32x32xbf16>
    %33 = vector.shape_cast %32 : vector<1x32x32xbf16> to vector<32x32xbf16>
    %34 = vector.extract_strided_slice %3 {offsets = [0, 0], sizes = [1, 32], strides = [1, 1]} : vector<9x32xf32> to vector<1x32xf32>
    %c0_20 = arith.constant 0 : index
    %c0_21 = arith.constant 0 : index
    %35 = vector.load %arg3[%c0_20, %c0_21] : memref<64x16xf32, #tpu.memory_space<vmem>>, vector<64x16xf32>
    %36 = arith.truncf %28 : vector<16x32xf32> to vector<16x32xbf16>
    %cst_22 = arith.constant dense<0.000000e+00> : vector<16x96xf32>
    %37 = tpu.matmul %36, %30, %cst_22 {dimension_numbers = #tpu.dot_dimension_numbers<[1], [0], [0], [1], [0, 0, 1, 1], [], []>} : vector<16x32xbf16>, vector<32x96xbf16>, vector<16x96xf32> -> vector<16x96xf32>
    %38 = vector.broadcast %31 : vector<1x96xf32> to vector<16x96xf32>
    %39 = arith.addf %37, %38 : vector<16x96xf32>
    %40 = vector.extract_strided_slice %39 {offsets = [0, 0], sizes = [16, 32], strides = [1, 1]} : vector<16x96xf32> to vector<16x32xf32>
    %41 = vector.extract_strided_slice %39 {offsets = [0, 32], sizes = [16, 32], strides = [1, 1]} : vector<16x96xf32> to vector<16x32xf32>
    %42 = vector.extract_strided_slice %39 {offsets = [0, 64], sizes = [16, 32], strides = [1, 1]} : vector<16x96xf32> to vector<16x32xf32>
    %43 = vector.shape_cast %40 : vector<16x32xf32> to vector<1x16x32xf32>
    %44 = vector.broadcast %43 : vector<1x16x32xf32> to vector<4x16x32xf32>
    %45 = vector.broadcast %2 : vector<4x1x32xf32> to vector<4x16x32xf32>
    %46 = arith.mulf %44, %45 : vector<4x16x32xf32>
    %47 = vector.shape_cast %46 : vector<4x16x32xf32> to vector<64x32xf32>
    %48 = arith.truncf %47 : vector<64x32xf32> to vector<64x32xbf16>
    %49 = arith.truncf %41 : vector<16x32xf32> to vector<16x32xbf16>
    %cst_23 = arith.constant dense<0.000000e+00> : vector<64x16xf32>
    %50 = tpu.matmul %48, %49, %cst_23 {dimension_numbers = #tpu.dot_dimension_numbers<[1], [1], [0], [0], [0, 0, 1, 0], [], []>} : vector<64x32xbf16>, vector<16x32xbf16>, vector<64x16xf32> -> vector<64x16xf32>
    %cst_24 = arith.constant 0.353553385 : f32
    %51 = vector.broadcast %cst_24 : f32 to vector<64x16xf32>
    %52 = arith.mulf %50, %51 : vector<64x16xf32>
    %53 = arith.addf %52, %35 : vector<64x16xf32>
    %cst_25 = arith.constant dense<0xFF800000> : vector<64xf32>
    %54 = vector.multi_reduction <maximumf>, %53, %cst_25 [1] : vector<64x16xf32> to vector<64xf32>
    %55 = vector.shape_cast %54 : vector<64xf32> to vector<64x1xf32>
    %56 = vector.broadcast %55 : vector<64x1xf32> to vector<64x16xf32>
    %57 = arith.subf %53, %56 : vector<64x16xf32>
    %58 = math.exp %57 : vector<64x16xf32>
    %cst_26 = arith.constant dense<0.000000e+00> : vector<64xf32>
    %59 = vector.multi_reduction <add>, %58, %cst_26 [1] : vector<64x16xf32> to vector<64xf32>
    %60 = vector.shape_cast %59 : vector<64xf32> to vector<64x1xf32>
    %61 = tpu.reciprocal %60 {approx = true} : vector<64x1xf32> -> vector<64x1xf32>
    %62 = vector.broadcast %61 : vector<64x1xf32> to vector<64x16xf32>
    %63 = arith.mulf %58, %62 : vector<64x16xf32>
    %64 = arith.truncf %63 : vector<64x16xf32> to vector<64x16xbf16>
    %65 = arith.truncf %42 : vector<16x32xf32> to vector<16x32xbf16>
    %cst_27 = arith.constant dense<0.000000e+00> : vector<64x32xf32>
    %66 = tpu.matmul %64, %65, %cst_27 {dimension_numbers = #tpu.dot_dimension_numbers<[1], [0], [0], [1], [0, 0, 1, 1], [], []>} : vector<64x16xbf16>, vector<16x32xbf16>, vector<64x32xf32> -> vector<64x32xf32>
    %67 = vector.shape_cast %66 : vector<64x32xf32> to vector<4x16x32xf32>
    %68 = vector.broadcast %2 : vector<4x1x32xf32> to vector<4x16x32xf32>
    %69 = arith.mulf %67, %68 : vector<4x16x32xf32>
    %cst_28 = arith.constant dense<0.000000e+00> : vector<16x32xf32>
    %70 = vector.multi_reduction <add>, %69, %cst_28 [0] : vector<4x16x32xf32> to vector<16x32xf32>
    %71 = arith.truncf %70 : vector<16x32xf32> to vector<16x32xbf16>
    %cst_29 = arith.constant dense<0.000000e+00> : vector<16x32xf32>
    %72 = tpu.matmul %71, %33, %cst_29 {dimension_numbers = #tpu.dot_dimension_numbers<[1], [0], [0], [1], [0, 0, 1, 1], [], []>} : vector<16x32xbf16>, vector<32x32xbf16>, vector<16x32xf32> -> vector<16x32xf32>
    %73 = vector.broadcast %34 : vector<1x32xf32> to vector<16x32xf32>
    %74 = arith.addf %72, %73 : vector<16x32xf32>
    %75 = arith.addf %0, %74 : vector<16x32xf32>
    %cst_30 = arith.constant dense<0.000000e+00> : vector<16xf32>
    %76 = vector.multi_reduction <add>, %75, %cst_30 [1] : vector<16x32xf32> to vector<16xf32>
    %77 = vector.shape_cast %76 : vector<16xf32> to vector<16x1xf32>
    %cst_31 = arith.constant 3.200000e+01 : f32
    %78 = vector.broadcast %cst_31 : f32 to vector<16x1xf32>
    %79 = arith.divf %77, %78 : vector<16x1xf32>
    %80 = vector.broadcast %79 : vector<16x1xf32> to vector<16x32xf32>
    %81 = arith.subf %75, %80 : vector<16x32xf32>
    %82 = arith.mulf %81, %81 : vector<16x32xf32>
    %cst_32 = arith.constant dense<0.000000e+00> : vector<16xf32>
    %83 = vector.multi_reduction <add>, %82, %cst_32 [1] : vector<16x32xf32> to vector<16xf32>
    %84 = vector.shape_cast %83 : vector<16xf32> to vector<16x1xf32>
    %cst_33 = arith.constant 3.200000e+01 : f32
    %85 = vector.broadcast %cst_33 : f32 to vector<16x1xf32>
    %86 = arith.divf %84, %85 : vector<16x1xf32>
    %87 = vector.broadcast %79 : vector<16x1xf32> to vector<16x32xf32>
    %88 = arith.subf %75, %87 : vector<16x32xf32>
    %cst_34 = arith.constant 9.99999974E-6 : f32
    %89 = vector.broadcast %cst_34 : f32 to vector<16x1xf32>
    %90 = arith.addf %86, %89 : vector<16x1xf32>
    %91 = math.rsqrt %90 : vector<16x1xf32>
    %92 = vector.broadcast %91 : vector<16x1xf32> to vector<16x32xf32>
    %93 = arith.mulf %88, %92 : vector<16x32xf32>
    %94 = vector.extract_strided_slice %3 {offsets = [4, 0], sizes = [1, 32], strides = [1, 1]} : vector<9x32xf32> to vector<1x32xf32>
    %95 = vector.broadcast %94 : vector<1x32xf32> to vector<16x32xf32>
    %96 = arith.mulf %93, %95 : vector<16x32xf32>
    %97 = vector.extract_strided_slice %3 {offsets = [5, 0], sizes = [1, 32], strides = [1, 1]} : vector<9x32xf32> to vector<1x32xf32>
    %98 = vector.broadcast %97 : vector<1x32xf32> to vector<16x32xf32>
    %99 = arith.addf %96, %98 : vector<16x32xf32>
    %c1 = arith.constant 1 : index
    %c0_35 = arith.constant 0 : index
    %c0_36 = arith.constant 0 : index
    %100 = vector.load %arg6[%c1, %c0_35, %c0_36] : memref<2x32x96xbf16, #tpu.memory_space<vmem>>, vector<1x32x96xbf16>
    %101 = vector.shape_cast %100 : vector<1x32x96xbf16> to vector<32x96xbf16>
    %102 = vector.extract_strided_slice %4 {offsets = [1, 0], sizes = [1, 96], strides = [1, 1]} : vector<2x96xf32> to vector<1x96xf32>
    %c1_37 = arith.constant 1 : index
    %c0_38 = arith.constant 0 : index
    %c0_39 = arith.constant 0 : index
    %103 = vector.load %arg8[%c1_37, %c0_38, %c0_39] : memref<2x32x32xbf16, #tpu.memory_space<vmem>>, vector<1x32x32xbf16>
    %104 = vector.shape_cast %103 : vector<1x32x32xbf16> to vector<32x32xbf16>
    %105 = vector.extract_strided_slice %3 {offsets = [1, 0], sizes = [1, 32], strides = [1, 1]} : vector<9x32xf32> to vector<1x32xf32>
    %c0_40 = arith.constant 0 : index
    %c0_41 = arith.constant 0 : index
    %106 = vector.load %arg4[%c0_40, %c0_41] : memref<64x32xf32, #tpu.memory_space<vmem>>, vector<64x32xf32>
    %107 = arith.truncf %99 : vector<16x32xf32> to vector<16x32xbf16>
    %108 = vector.extract_strided_slice %101 {offsets = [0, 0], sizes = [32, 32], strides = [1, 1]} : vector<32x96xbf16> to vector<32x32xbf16>
    %cst_42 = arith.constant dense<0.000000e+00> : vector<16x32xf32>
    %109 = tpu.matmul %107, %108, %cst_42 {dimension_numbers = #tpu.dot_dimension_numbers<[1], [0], [0], [1], [0, 0, 1, 1], [], []>} : vector<16x32xbf16>, vector<32x32xbf16>, vector<16x32xf32> -> vector<16x32xf32>
    %110 = vector.extract_strided_slice %102 {offsets = [0, 0], sizes = [1, 32], strides = [1, 1]} : vector<1x96xf32> to vector<1x32xf32>
    %111 = vector.broadcast %110 : vector<1x32xf32> to vector<16x32xf32>
    %112 = arith.addf %109, %111 : vector<16x32xf32>
    %113 = arith.truncf %1 : vector<32x32xf32> to vector<32x32xbf16>
    %114 = vector.extract_strided_slice %101 {offsets = [0, 32], sizes = [32, 64], strides = [1, 1]} : vector<32x96xbf16> to vector<32x64xbf16>
    %cst_43 = arith.constant dense<0.000000e+00> : vector<32x64xf32>
    %115 = tpu.matmul %113, %114, %cst_43 {dimension_numbers = #tpu.dot_dimension_numbers<[1], [0], [0], [1], [0, 0, 1, 1], [], []>} : vector<32x32xbf16>, vector<32x64xbf16>, vector<32x64xf32> -> vector<32x64xf32>
    %116 = vector.extract_strided_slice %102 {offsets = [0, 32], sizes = [1, 64], strides = [1, 1]} : vector<1x96xf32> to vector<1x64xf32>
    %117 = vector.broadcast %116 : vector<1x64xf32> to vector<32x64xf32>
    %118 = arith.addf %115, %117 : vector<32x64xf32>
    %119 = vector.extract_strided_slice %118 {offsets = [0, 0], sizes = [32, 32], strides = [1, 1]} : vector<32x64xf32> to vector<32x32xf32>
    %120 = vector.extract_strided_slice %118 {offsets = [0, 32], sizes = [32, 32], strides = [1, 1]} : vector<32x64xf32> to vector<32x32xf32>
    %121 = vector.shape_cast %112 : vector<16x32xf32> to vector<1x16x32xf32>
    %122 = vector.broadcast %121 : vector<1x16x32xf32> to vector<4x16x32xf32>
    %123 = vector.broadcast %2 : vector<4x1x32xf32> to vector<4x16x32xf32>
    %124 = arith.mulf %122, %123 : vector<4x16x32xf32>
    %125 = vector.shape_cast %124 : vector<4x16x32xf32> to vector<64x32xf32>
    %126 = arith.truncf %125 : vector<64x32xf32> to vector<64x32xbf16>
    %127 = arith.truncf %119 : vector<32x32xf32> to vector<32x32xbf16>
    %cst_44 = arith.constant dense<0.000000e+00> : vector<64x32xf32>
    %128 = tpu.matmul %126, %127, %cst_44 {dimension_numbers = #tpu.dot_dimension_numbers<[1], [1], [0], [0], [0, 0, 1, 0], [], []>} : vector<64x32xbf16>, vector<32x32xbf16>, vector<64x32xf32> -> vector<64x32xf32>
    %cst_45 = arith.constant 0.353553385 : f32
    %129 = vector.broadcast %cst_45 : f32 to vector<64x32xf32>
    %130 = arith.mulf %128, %129 : vector<64x32xf32>
    %131 = arith.addf %130, %106 : vector<64x32xf32>
    %cst_46 = arith.constant dense<0xFF800000> : vector<64xf32>
    %132 = vector.multi_reduction <maximumf>, %131, %cst_46 [1] : vector<64x32xf32> to vector<64xf32>
    %133 = vector.shape_cast %132 : vector<64xf32> to vector<64x1xf32>
    %134 = vector.broadcast %133 : vector<64x1xf32> to vector<64x32xf32>
    %135 = arith.subf %131, %134 : vector<64x32xf32>
    %136 = math.exp %135 : vector<64x32xf32>
    %cst_47 = arith.constant dense<0.000000e+00> : vector<64xf32>
    %137 = vector.multi_reduction <add>, %136, %cst_47 [1] : vector<64x32xf32> to vector<64xf32>
    %138 = vector.shape_cast %137 : vector<64xf32> to vector<64x1xf32>
    %139 = tpu.reciprocal %138 {approx = true} : vector<64x1xf32> -> vector<64x1xf32>
    %140 = vector.broadcast %139 : vector<64x1xf32> to vector<64x32xf32>
    %141 = arith.mulf %136, %140 : vector<64x32xf32>
    %142 = arith.truncf %141 : vector<64x32xf32> to vector<64x32xbf16>
    %143 = arith.truncf %120 : vector<32x32xf32> to vector<32x32xbf16>
    %cst_48 = arith.constant dense<0.000000e+00> : vector<64x32xf32>
    %144 = tpu.matmul %142, %143, %cst_48 {dimension_numbers = #tpu.dot_dimension_numbers<[1], [0], [0], [1], [0, 0, 1, 1], [], []>} : vector<64x32xbf16>, vector<32x32xbf16>, vector<64x32xf32> -> vector<64x32xf32>
    %145 = vector.shape_cast %144 : vector<64x32xf32> to vector<4x16x32xf32>
    %146 = vector.broadcast %2 : vector<4x1x32xf32> to vector<4x16x32xf32>
    %147 = arith.mulf %145, %146 : vector<4x16x32xf32>
    %cst_49 = arith.constant dense<0.000000e+00> : vector<16x32xf32>
    %148 = vector.multi_reduction <add>, %147, %cst_49 [0] : vector<4x16x32xf32> to vector<16x32xf32>
    %149 = arith.truncf %148 : vector<16x32xf32> to vector<16x32xbf16>
    %cst_50 = arith.constant dense<0.000000e+00> : vector<16x32xf32>
    %150 = tpu.matmul %149, %104, %cst_50 {dimension_numbers = #tpu.dot_dimension_numbers<[1], [0], [0], [1], [0, 0, 1, 1], [], []>} : vector<16x32xbf16>, vector<32x32xbf16>, vector<16x32xf32> -> vector<16x32xf32>
    %151 = vector.broadcast %105 : vector<1x32xf32> to vector<16x32xf32>
    %152 = arith.addf %150, %151 : vector<16x32xf32>
    %153 = arith.addf %75, %152 : vector<16x32xf32>
    %cst_51 = arith.constant dense<0.000000e+00> : vector<16xf32>
    %154 = vector.multi_reduction <add>, %153, %cst_51 [1] : vector<16x32xf32> to vector<16xf32>
    %155 = vector.shape_cast %154 : vector<16xf32> to vector<16x1xf32>
    %cst_52 = arith.constant 3.200000e+01 : f32
    %156 = vector.broadcast %cst_52 : f32 to vector<16x1xf32>
    %157 = arith.divf %155, %156 : vector<16x1xf32>
    %158 = vector.broadcast %157 : vector<16x1xf32> to vector<16x32xf32>
    %159 = arith.subf %153, %158 : vector<16x32xf32>
    %160 = arith.mulf %159, %159 : vector<16x32xf32>
    %cst_53 = arith.constant dense<0.000000e+00> : vector<16xf32>
    %161 = vector.multi_reduction <add>, %160, %cst_53 [1] : vector<16x32xf32> to vector<16xf32>
    %162 = vector.shape_cast %161 : vector<16xf32> to vector<16x1xf32>
    %cst_54 = arith.constant 3.200000e+01 : f32
    %163 = vector.broadcast %cst_54 : f32 to vector<16x1xf32>
    %164 = arith.divf %162, %163 : vector<16x1xf32>
    %165 = vector.broadcast %157 : vector<16x1xf32> to vector<16x32xf32>
    %166 = arith.subf %153, %165 : vector<16x32xf32>
    %cst_55 = arith.constant 9.99999974E-6 : f32
    %167 = vector.broadcast %cst_55 : f32 to vector<16x1xf32>
    %168 = arith.addf %164, %167 : vector<16x1xf32>
    %169 = math.rsqrt %168 : vector<16x1xf32>
    %170 = vector.broadcast %169 : vector<16x1xf32> to vector<16x32xf32>
    %171 = arith.mulf %166, %170 : vector<16x32xf32>
    %172 = vector.extract_strided_slice %3 {offsets = [6, 0], sizes = [1, 32], strides = [1, 1]} : vector<9x32xf32> to vector<1x32xf32>
    %173 = vector.broadcast %172 : vector<1x32xf32> to vector<16x32xf32>
    %174 = arith.mulf %171, %173 : vector<16x32xf32>
    %175 = vector.extract_strided_slice %3 {offsets = [7, 0], sizes = [1, 32], strides = [1, 1]} : vector<9x32xf32> to vector<1x32xf32>
    %176 = vector.broadcast %175 : vector<1x32xf32> to vector<16x32xf32>
    %177 = arith.addf %174, %176 : vector<16x32xf32>
    %178 = arith.truncf %177 : vector<16x32xf32> to vector<16x32xbf16>
    %c0_56 = arith.constant 0 : index
    %c0_57 = arith.constant 0 : index
    %179 = vector.load %arg11[%c0_56, %c0_57] : memref<32x64xbf16, #tpu.memory_space<vmem>>, vector<32x64xbf16>
    %cst_58 = arith.constant dense<0.000000e+00> : vector<16x64xf32>
    %180 = tpu.matmul %178, %179, %cst_58 {dimension_numbers = #tpu.dot_dimension_numbers<[1], [0], [0], [1], [0, 0, 1, 1], [], []>} : vector<16x32xbf16>, vector<32x64xbf16>, vector<16x64xf32> -> vector<16x64xf32>
    %c0_59 = arith.constant 0 : index
    %c0_60 = arith.constant 0 : index
    %181 = vector.load %arg10[%c0_59, %c0_60] : memref<1x64xf32, #tpu.memory_space<vmem>>, vector<1x64xf32>
    %182 = vector.broadcast %181 : vector<1x64xf32> to vector<16x64xf32>
    %183 = arith.addf %180, %182 : vector<16x64xf32>
    %184 = arith.mulf %183, %183 : vector<16x64xf32>
    %185 = arith.mulf %183, %184 : vector<16x64xf32>
    %cst_61 = arith.constant 4.471500e-02 : f32
    %186 = vector.broadcast %cst_61 : f32 to vector<16x64xf32>
    %187 = arith.mulf %186, %185 : vector<16x64xf32>
    %188 = arith.addf %183, %187 : vector<16x64xf32>
    %cst_62 = arith.constant 0.797884583 : f32
    %189 = vector.broadcast %cst_62 : f32 to vector<16x64xf32>
    %190 = arith.mulf %189, %188 : vector<16x64xf32>
    %191 = math.tanh %190 : vector<16x64xf32>
    %cst_63 = arith.constant 1.000000e+00 : f32
    %192 = vector.broadcast %cst_63 : f32 to vector<16x64xf32>
    %193 = arith.addf %192, %191 : vector<16x64xf32>
    %cst_64 = arith.constant 5.000000e-01 : f32
    %194 = vector.broadcast %cst_64 : f32 to vector<16x64xf32>
    %195 = arith.mulf %194, %193 : vector<16x64xf32>
    %196 = arith.mulf %183, %195 : vector<16x64xf32>
    %197 = arith.truncf %196 : vector<16x64xf32> to vector<16x64xbf16>
    %c0_65 = arith.constant 0 : index
    %c0_66 = arith.constant 0 : index
    %198 = vector.load %arg12[%c0_65, %c0_66] : memref<64x32xbf16, #tpu.memory_space<vmem>>, vector<64x32xbf16>
    %cst_67 = arith.constant dense<0.000000e+00> : vector<16x32xf32>
    %199 = tpu.matmul %197, %198, %cst_67 {dimension_numbers = #tpu.dot_dimension_numbers<[1], [0], [0], [1], [0, 0, 1, 1], [], []>} : vector<16x64xbf16>, vector<64x32xbf16>, vector<16x32xf32> -> vector<16x32xf32>
    %200 = arith.addf %153, %199 : vector<16x32xf32>
    %201 = vector.extract_strided_slice %3 {offsets = [8, 0], sizes = [1, 32], strides = [1, 1]} : vector<9x32xf32> to vector<1x32xf32>
    %202 = vector.broadcast %201 : vector<1x32xf32> to vector<16x32xf32>
    %203 = arith.addf %200, %202 : vector<16x32xf32>
    %c0_68 = arith.constant 0 : index
    %c0_69 = arith.constant 0 : index
    %204 = vector.load %arg13[%c0_68, %c0_69] : memref<16x32xf32, #tpu.memory_space<vmem>>, vector<16x32xf32>
    tpu.vector_store %arg13[%c0_68, %c0_69], %203 {strides = array<i32>} : memref<16x32xf32, #tpu.memory_space<vmem>>, vector<16x32xf32>,
    return
  }
  func.func @transform_0(%arg0: i32) -> (i32, i32) {
    %c0_i32 = arith.constant 0 : i32
    %c0_i32_0 = arith.constant 0 : i32
    return %arg0, %c0_i32 : i32, i32
  }
  func.func @transform_1(%arg0: i32) -> (i32, i32) {
    %c0_i32 = arith.constant 0 : i32
    %c0_i32_0 = arith.constant 0 : i32
    return %arg0, %c0_i32 : i32, i32
  }
  func.func @transform_2(%arg0: i32) -> (i32, i32) {
    %c0_i32 = arith.constant 0 : i32
    %c0_i32_0 = arith.constant 0 : i32
    %c0_i32_1 = arith.constant 0 : i32
    return %c0_i32, %c0_i32_0 : i32, i32
  }
  func.func @transform_3(%arg0: i32) -> (i32, i32) {
    %c0_i32 = arith.constant 0 : i32
    %c0_i32_0 = arith.constant 0 : i32
    %c0_i32_1 = arith.constant 0 : i32
    return %c0_i32, %c0_i32_0 : i32, i32
  }
  func.func @transform_4(%arg0: i32) -> (i32, i32, i32) {
    %c0_i32 = arith.constant 0 : i32
    %c0_i32_0 = arith.constant 0 : i32
    %c0_i32_1 = arith.constant 0 : i32
    %c0_i32_2 = arith.constant 0 : i32
    return %c0_i32, %c0_i32_0, %c0_i32_1 : i32, i32, i32
  }
  func.func @transform_5(%arg0: i32) -> (i32, i32, i32) {
    %c0_i32 = arith.constant 0 : i32
    %c0_i32_0 = arith.constant 0 : i32
    %c0_i32_1 = arith.constant 0 : i32
    %c0_i32_2 = arith.constant 0 : i32
    return %c0_i32, %c0_i32_0, %c0_i32_1 : i32, i32, i32
  }
  func.func @transform_6(%arg0: i32) -> (i32, i32) {
    %c0_i32 = arith.constant 0 : i32
    %c0_i32_0 = arith.constant 0 : i32
    %c0_i32_1 = arith.constant 0 : i32
    return %c0_i32, %c0_i32_0 : i32, i32
  }
  func.func @transform_7(%arg0: i32) -> (i32, i32, i32) {
    %c0_i32 = arith.constant 0 : i32
    %c0_i32_0 = arith.constant 0 : i32
    %c0_i32_1 = arith.constant 0 : i32
    %c0_i32_2 = arith.constant 0 : i32
    return %c0_i32, %c0_i32_0, %c0_i32_1 : i32, i32, i32
  }
  func.func @transform_8(%arg0: i32) -> (i32, i32) {
    %c0_i32 = arith.constant 0 : i32
    %c0_i32_0 = arith.constant 0 : i32
    %c0_i32_1 = arith.constant 0 : i32
    return %c0_i32, %c0_i32_0 : i32, i32
  }
  func.func @transform_9(%arg0: i32) -> (i32, i32) {
    %c0_i32 = arith.constant 0 : i32
    %c0_i32_0 = arith.constant 0 : i32
    %c0_i32_1 = arith.constant 0 : i32
    return %c0_i32, %c0_i32_0 : i32, i32
  }
  func.func @transform_10(%arg0: i32) -> (i32, i32) {
    %c0_i32 = arith.constant 0 : i32
    %c0_i32_0 = arith.constant 0 : i32
    %c0_i32_1 = arith.constant 0 : i32
    return %c0_i32, %c0_i32_0 : i32, i32
  }
  func.func @transform_11(%arg0: i32) -> (i32, i32) {
    %c0_i32 = arith.constant 0 : i32
    %c0_i32_0 = arith.constant 0 : i32
    %c0_i32_1 = arith.constant 0 : i32
    return %c0_i32, %c0_i32_0 : i32, i32
  }
  func.func @transform_12(%arg0: i32) -> (i32, i32) {
    %c0_i32 = arith.constant 0 : i32
    %c0_i32_0 = arith.constant 0 : i32
    return %arg0, %c0_i32 : i32, i32
  }
}

module attributes {stable_mosaic.version = 11 : i64} {
  func.func @decoder_block_kernel(%arg0: i32, %arg1: memref<16x32xf32, #tpu.memory_space<vmem>>, %arg2: memref<32x32xf32, #tpu.memory_space<vmem>>, %arg3: memref<64x16xf32, #tpu.memory_space<vmem>>, %arg4: memref<64x32xf32, #tpu.memory_space<vmem>>, %arg5: memref<4x1x32xf32, #tpu.memory_space<vmem>>, %arg6: memref<2x32x96xbf16, #tpu.memory_space<vmem>>, %arg7: memref<2x96xf32, #tpu.memory_space<vmem>>, %arg8: memref<2x32x32xbf16, #tpu.memory_space<vmem>>, %arg9: memref<9x32xf32, #tpu.memory_space<vmem>>, %arg10: memref<1x64xf32, #tpu.memory_space<vmem>>, %arg11: memref<32x64xbf16, #tpu.memory_space<vmem>>, %arg12: memref<64x32xbf16, #tpu.memory_space<vmem>>, %arg13: memref<16x32xf32, #tpu.memory_space<vmem>>) attributes {dimension_semantics = [#tpu.dimension_semantics<parallel>], iteration_bounds = array<i64: 2>, scalar_prefetch = 0 : i64, scratch_operands = 0 : i64, tpu.core_type = #tpu.core_type<tc>, window_params = [{transform_indices = @transform_0, window_bounds = array<i64: 16, 32>}, {transform_indices = @transform_1, window_bounds = array<i64: 32, 32>}, {pipeline_mode = #tpu.pipeline_mode<synchronous>, transform_indices = @transform_2, window_bounds = array<i64: 64, 16>}, {pipeline_mode = #tpu.pipeline_mode<synchronous>, transform_indices = @transform_3, window_bounds = array<i64: 64, 32>}, {pipeline_mode = #tpu.pipeline_mode<synchronous>, transform_indices = @transform_4, window_bounds = array<i64: 4, 1, 32>}, {pipeline_mode = #tpu.pipeline_mode<synchronous>, transform_indices = @transform_5, window_bounds = array<i64: 2, 32, 96>}, {pipeline_mode = #tpu.pipeline_mode<synchronous>, transform_indices = @transform_6, window_bounds = array<i64: 2, 96>}, {pipeline_mode = #tpu.pipeline_mode<synchronous>, transform_indices = @transform_7, window_bounds = array<i64: 2, 32, 32>}, {pipeline_mode = #tpu.pipeline_mode<synchronous>, transform_indices = @transform_8, window_bounds = array<i64: 9, 32>}, {pipeline_mode = #tpu.pipeline_mode<synchronous>, transform_indices = @transform_9, window_bounds = array<i64: 1, 64>}, {pipeline_mode = #tpu.pipeline_mode<synchronous>, transform_indices = @transform_10, window_bounds = array<i64: 32, 64>}, {pipeline_mode = #tpu.pipeline_mode<synchronous>, transform_indices = @transform_11, window_bounds = array<i64: 64, 32>}, {transform_indices = @transform_12, window_bounds = array<i64: 16, 32>}]} {
    %c0 = arith.constant 0 : index
    %c0_0 = arith.constant 0 : index
    %0 = vector.load %arg1[%c0, %c0_0] : memref<16x32xf32, #tpu.memory_space<vmem>>, vector<16x32xf32>
    %c0_1 = arith.constant 0 : index
    %c0_2 = arith.constant 0 : index
    %1 = vector.load %arg2[%c0_1, %c0_2] : memref<32x32xf32, #tpu.memory_space<vmem>>, vector<32x32xf32>
    %c0_3 = arith.constant 0 : index
    %c0_4 = arith.constant 0 : index
    %c0_5 = arith.constant 0 : index
    %2 = vector.load %arg5[%c0_3, %c0_4, %c0_5] : memref<4x1x32xf32, #tpu.memory_space<vmem>>, vector<4x1x32xf32>
    %c0_6 = arith.constant 0 : index
    %c0_7 = arith.constant 0 : index
    %3 = vector.load %arg9[%c0_6, %c0_7] : memref<9x32xf32, #tpu.memory_space<vmem>>, vector<9x32xf32>
    %c0_8 = arith.constant 0 : index
    %c0_9 = arith.constant 0 : index
    %4 = vector.load %arg7[%c0_8, %c0_9] : memref<2x96xf32, #tpu.memory_space<vmem>>, vector<2x96xf32>
    %cst = arith.constant dense<0.000000e+00> : vector<16xf32>
    %5 = vector.multi_reduction <add>, %0, %cst [1] : vector<16x32xf32> to vector<16xf32>
    %6 = vector.shape_cast %5 : vector<16xf32> to vector<16x1xf32>
    %cst_10 = arith.constant 3.200000e+01 : f32
    %7 = vector.broadcast %cst_10 : f32 to vector<16x1xf32>
    %8 = arith.divf %6, %7 : vector<16x1xf32>
    %9 = vector.broadcast %8 : vector<16x1xf32> to vector<16x32xf32>
    %10 = arith.subf %0, %9 : vector<16x32xf32>
    %11 = arith.mulf %10, %10 : vector<16x32xf32>
    %cst_11 = arith.constant dense<0.000000e+00> : vector<16xf32>
    %12 = vector.multi_reduction <add>, %11, %cst_11 [1] : vector<16x32xf32> to vector<16xf32>
    %13 = vector.shape_cast %12 : vector<16xf32> to vector<16x1xf32>
    %cst_12 = arith.constant 3.200000e+01 : f32
    %14 = vector.broadcast %cst_12 : f32 to vector<16x1xf32>
    %15 = arith.divf %13, %14 : vector<16x1xf32>
    %16 = vector.broadcast %8 : vector<16x1xf32> to vector<16x32xf32>
    %17 = arith.subf %0, %16 : vector<16x32xf32>
    %cst_13 = arith.constant 9.99999974E-6 : f32
    %18 = vector.broadcast %cst_13 : f32 to vector<16x1xf32>
    %19 = arith.addf %15, %18 : vector<16x1xf32>
    %20 = math.rsqrt %19 : vector<16x1xf32>
    %21 = vector.broadcast %20 : vector<16x1xf32> to vector<16x32xf32>
    %22 = arith.mulf %17, %21 : vector<16x32xf32>
    %23 = vector.extract_strided_slice %3 {offsets = [2, 0], sizes = [1, 32], strides = [1, 1]} : vector<9x32xf32> to vector<1x32xf32>
    %24 = vector.broadcast %23 : vector<1x32xf32> to vector<16x32xf32>
    %25 = arith.mulf %22, %24 : vector<16x32xf32>
    %26 = vector.extract_strided_slice %3 {offsets = [3, 0], sizes = [1, 32], strides = [1, 1]} : vector<9x32xf32> to vector<1x32xf32>
    %27 = vector.broadcast %26 : vector<1x32xf32> to vector<16x32xf32>
    %28 = arith.addf %25, %27 : vector<16x32xf32>
    %c0_14 = arith.constant 0 : index
    %c0_15 = arith.constant 0 : index
    %c0_16 = arith.constant 0 : index
    %29 = vector.load %arg6[%c0_14, %c0_15, %c0_16] : memref<2x32x96xbf16, #tpu.memory_space<vmem>>, vector<1x32x96xbf16>
    %30 = vector.shape_cast %29 : vector<1x32x96xbf16> to vector<32x96xbf16>
    %31 = vector.extract_strided_slice %4 {offsets = [0, 0], sizes = [1, 96], strides = [1, 1]} : vector<2x96xf32> to vector<1x96xf32>
    %c0_17 = arith.constant 0 : index
    %c0_18 = arith.constant 0 : index
    %c0_19 = arith.constant 0 : index
    %32 = vector.load %arg8[%c0_17, %c0_18, %c0_19] : memref<2x32x32xbf16, #tpu.memory_space<vmem>>, vector<1x32x32xbf16>
    %33 = vector.shape_cast %32 : vector<1x32x32xbf16> to vector<32x32xbf16>
    %34 = vector.extract_strided_slice %3 {offsets = [0, 0], sizes = [1, 32], strides = [1, 1]} : vector<9x32xf32> to vector<1x32xf32>
    %c0_20 = arith.constant 0 : index
    %c0_21 = arith.constant 0 : index
    %35 = vector.load %arg3[%c0_20, %c0_21] : memref<64x16xf32, #tpu.memory_space<vmem>>, vector<64x16xf32>
    %36 = arith.truncf %28 : vector<16x32xf32> to vector<16x32xbf16>
    %cst_22 = arith.constant dense<0.000000e+00> : vector<16x96xf32>
    %37 = tpu.matmul %36, %30, %cst_22 {dimension_numbers = #tpu.dot_dimension_numbers<[1], [0], [0], [1], [0, 0, 1, 1], [], []>} : vector<16x32xbf16>, vector<32x96xbf16>, vector<16x96xf32> -> vector<16x96xf32>
    %38 = vector.broadcast %31 : vector<1x96xf32> to vector<16x96xf32>
    %39 = arith.addf %37, %38 : vector<16x96xf32>
    %40 = vector.extract_strided_slice %39 {offsets = [0, 0], sizes = [16, 32], strides = [1, 1]} : vector<16x96xf32> to vector<16x32xf32>
    %41 = vector.extract_strided_slice %39 {offsets = [0, 32], sizes = [16, 32], strides = [1, 1]} : vector<16x96xf32> to vector<16x32xf32>
    %42 = vector.extract_strided_slice %39 {offsets = [0, 64], sizes = [16, 32], strides = [1, 1]} : vector<16x96xf32> to vector<16x32xf32>
    %43 = vector.shape_cast %40 : vector<16x32xf32> to vector<1x16x32xf32>
    %44 = vector.broadcast %43 : vector<1x16x32xf32> to vector<4x16x32xf32>
    %45 = vector.broadcast %2 : vector<4x1x32xf32> to vector<4x16x32xf32>
    %46 = arith.mulf %44, %45 : vector<4x16x32xf32>
    %47 = vector.shape_cast %46 : vector<4x16x32xf32> to vector<64x32xf32>
    %48 = arith.truncf %47 : vector<64x32xf32> to vector<64x32xbf16>
    %49 = arith.truncf %41 : vector<16x32xf32> to vector<16x32xbf16>
    %cst_23 = arith.constant dense<0.000000e+00> : vector<64x16xf32>
    %50 = tpu.matmul %48, %49, %cst_23 {dimension_numbers = #tpu.dot_dimension_numbers<[1], [1], [0], [0], [0, 0, 1, 0], [], []>} : vector<64x32xbf16>, vector<16x32xbf16>, vector<64x16xf32> -> vector<64x16xf32>
    %cst_24 = arith.constant 0.353553385 : f32
    %51 = vector.broadcast %cst_24 : f32 to vector<64x16xf32>
    %52 = arith.mulf %50, %51 : vector<64x16xf32>
    %53 = arith.addf %52, %35 : vector<64x16xf32>
    %cst_25 = arith.constant dense<0xFF800000> : vector<64xf32>
    %54 = vector.multi_reduction <maximumf>, %53, %cst_25 [1] : vector<64x16xf32> to vector<64xf32>
    %55 = vector.shape_cast %54 : vector<64xf32> to vector<64x1xf32>
    %56 = vector.broadcast %55 : vector<64x1xf32> to vector<64x16xf32>
    %57 = arith.subf %53, %56 : vector<64x16xf32>
    %58 = math.exp %57 : vector<64x16xf32>
    %cst_26 = arith.constant dense<0.000000e+00> : vector<64xf32>
    %59 = vector.multi_reduction <add>, %58, %cst_26 [1] : vector<64x16xf32> to vector<64xf32>
    %60 = vector.shape_cast %59 : vector<64xf32> to vector<64x1xf32>
    %61 = tpu.reciprocal %60 {approx = true} : vector<64x1xf32> -> vector<64x1xf32>
    %62 = vector.broadcast %61 : vector<64x1xf32> to vector<64x16xf32>
    %63 = arith.mulf %58, %62 : vector<64x16xf32>
    %64 = arith.truncf %63 : vector<64x16xf32> to vector<64x16xbf16>
    %65 = arith.truncf %42 : vector<16x32xf32> to vector<16x32xbf16>
    %cst_27 = arith.constant dense<0.000000e+00> : vector<64x32xf32>
    %66 = tpu.matmul %64, %65, %cst_27 {dimension_numbers = #tpu.dot_dimension_numbers<[1], [0], [0], [1], [0, 0, 1, 1], [], []>} : vector<64x16xbf16>, vector<16x32xbf16>, vector<64x32xf32> -> vector<64x32xf32>
    %67 = vector.shape_cast %66 : vector<64x32xf32> to vector<4x16x32xf32>
    %68 = vector.broadcast %2 : vector<4x1x32xf32> to vector<4x16x32xf32>
    %69 = arith.mulf %67, %68 : vector<4x16x32xf32>
    %cst_28 = arith.constant dense<0.000000e+00> : vector<16x32xf32>
    %70 = vector.multi_reduction <add>, %69, %cst_28 [0] : vector<4x16x32xf32> to vector<16x32xf32>
    %71 = arith.truncf %70 : vector<16x32xf32> to vector<16x32xbf16>
    %cst_29 = arith.constant dense<0.000000e+00> : vector<16x32xf32>
    %72 = tpu.matmul %71, %33, %cst_29 {dimension_numbers = #tpu.dot_dimension_numbers<[1], [0], [0], [1], [0, 0, 1, 1], [], []>} : vector<16x32xbf16>, vector<32x32xbf16>, vector<16x32xf32> -> vector<16x32xf32>
    %73 = vector.broadcast %34 : vector<1x32xf32> to vector<16x32xf32>
    %74 = arith.addf %72, %73 : vector<16x32xf32>
    %75 = arith.addf %0, %74 : vector<16x32xf32>
    %cst_30 = arith.constant dense<0.000000e+00> : vector<16xf32>
    %76 = vector.multi_reduction <add>, %75, %cst_30 [1] : vector<16x32xf32> to vector<16xf32>
    %77 = vector.shape_cast %76 : vector<16xf32> to vector<16x1xf32>
    %cst_31 = arith.constant 3.200000e+01 : f32
    %78 = vector.broadcast %cst_31 : f32 to vector<16x1xf32>
    %79 = arith.divf %77, %78 : vector<16x1xf32>
    %80 = vector.broadcast %79 : vector<16x1xf32> to vector<16x32xf32>
    %81 = arith.subf %75, %80 : vector<16x32xf32>
    %82 = arith.mulf %81, %81 : vector<16x32xf32>
    %cst_32 = arith.constant dense<0.000000e+00> : vector<16xf32>
    %83 = vector.multi_reduction <add>, %82, %cst_32 [1] : vector<16x32xf32> to vector<16xf32>
    %84 = vector.shape_cast %83 : vector<16xf32> to vector<16x1xf32>
    %cst_33 = arith.constant 3.200000e+01 : f32
    %85 = vector.broadcast %cst_33 : f32 to vector<16x1xf32>
    %86 = arith.divf %84, %85 : vector<16x1xf32>
    %87 = vector.broadcast %79 : vector<16x1xf32> to vector<16x32xf32>
    %88 = arith.subf %75, %87 : vector<16x32xf32>
    %cst_34 = arith.constant 9.99999974E-6 : f32
    %89 = vector.broadcast %cst_34 : f32 to vector<16x1xf32>
    %90 = arith.addf %86, %89 : vector<16x1xf32>
    %91 = math.rsqrt %90 : vector<16x1xf32>
    %92 = vector.broadcast %91 : vector<16x1xf32> to vector<16x32xf32>
    %93 = arith.mulf %88, %92 : vector<16x32xf32>
    %94 = vector.extract_strided_slice %3 {offsets = [4, 0], sizes = [1, 32], strides = [1, 1]} : vector<9x32xf32> to vector<1x32xf32>
    %95 = vector.broadcast %94 : vector<1x32xf32> to vector<16x32xf32>
    %96 = arith.mulf %93, %95 : vector<16x32xf32>
    %97 = vector.extract_strided_slice %3 {offsets = [5, 0], sizes = [1, 32], strides = [1, 1]} : vector<9x32xf32> to vector<1x32xf32>
    %98 = vector.broadcast %97 : vector<1x32xf32> to vector<16x32xf32>
    %99 = arith.addf %96, %98 : vector<16x32xf32>
    %c1 = arith.constant 1 : index
    %c0_35 = arith.constant 0 : index
    %c0_36 = arith.constant 0 : index
    %100 = vector.load %arg6[%c1, %c0_35, %c0_36] : memref<2x32x96xbf16, #tpu.memory_space<vmem>>, vector<1x32x96xbf16>
    %101 = vector.shape_cast %100 : vector<1x32x96xbf16> to vector<32x96xbf16>
    %102 = vector.extract_strided_slice %4 {offsets = [1, 0], sizes = [1, 96], strides = [1, 1]} : vector<2x96xf32> to vector<1x96xf32>
    %c1_37 = arith.constant 1 : index
    %c0_38 = arith.constant 0 : index
    %c0_39 = arith.constant 0 : index
    %103 = vector.load %arg8[%c1_37, %c0_38, %c0_39] : memref<2x32x32xbf16, #tpu.memory_space<vmem>>, vector<1x32x32xbf16>
    %104 = vector.shape_cast %103 : vector<1x32x32xbf16> to vector<32x32xbf16>
    %105 = vector.extract_strided_slice %3 {offsets = [1, 0], sizes = [1, 32], strides = [1, 1]} : vector<9x32xf32> to vector<1x32xf32>
    %c0_40 = arith.constant 0 : index
    %c0_41 = arith.constant 0 : index
    %106 = vector.load %arg4[%c0_40, %c0_41] : memref<64x32xf32, #tpu.memory_space<vmem>>, vector<64x32xf32>
    %107 = arith.truncf %99 : vector<16x32xf32> to vector<16x32xbf16>
    %108 = vector.extract_strided_slice %101 {offsets = [0, 0], sizes = [32, 32], strides = [1, 1]} : vector<32x96xbf16> to vector<32x32xbf16>
    %cst_42 = arith.constant dense<0.000000e+00> : vector<16x32xf32>
    %109 = tpu.matmul %107, %108, %cst_42 {dimension_numbers = #tpu.dot_dimension_numbers<[1], [0], [0], [1], [0, 0, 1, 1], [], []>} : vector<16x32xbf16>, vector<32x32xbf16>, vector<16x32xf32> -> vector<16x32xf32>
    %110 = vector.extract_strided_slice %102 {offsets = [0, 0], sizes = [1, 32], strides = [1, 1]} : vector<1x96xf32> to vector<1x32xf32>
    %111 = vector.broadcast %110 : vector<1x32xf32> to vector<16x32xf32>
    %112 = arith.addf %109, %111 : vector<16x32xf32>
    %113 = arith.truncf %1 : vector<32x32xf32> to vector<32x32xbf16>
    %114 = vector.extract_strided_slice %101 {offsets = [0, 32], sizes = [32, 64], strides = [1, 1]} : vector<32x96xbf16> to vector<32x64xbf16>
    %cst_43 = arith.constant dense<0.000000e+00> : vector<32x64xf32>
    %115 = tpu.matmul %113, %114, %cst_43 {dimension_numbers = #tpu.dot_dimension_numbers<[1], [0], [0], [1], [0, 0, 1, 1], [], []>} : vector<32x32xbf16>, vector<32x64xbf16>, vector<32x64xf32> -> vector<32x64xf32>
    %116 = vector.extract_strided_slice %102 {offsets = [0, 32], sizes = [1, 64], strides = [1, 1]} : vector<1x96xf32> to vector<1x64xf32>
    %117 = vector.broadcast %116 : vector<1x64xf32> to vector<32x64xf32>
    %118 = arith.addf %115, %117 : vector<32x64xf32>
    %119 = vector.extract_strided_slice %118 {offsets = [0, 0], sizes = [32, 32], strides = [1, 1]} : vector<32x64xf32> to vector<32x32xf32>
    %120 = vector.extract_strided_slice %118 {offsets = [0, 32], sizes = [32, 32], strides = [1, 1]} : vector<32x64xf32> to vector<32x32xf32>
    %121 = vector.shape_cast %112 : vector<16x32xf32> to vector<1x16x32xf32>
    %122 = vector.broadcast %121 : vector<1x16x32xf32> to vector<4x16x32xf32>
    %123 = vector.broadcast %2 : vector<4x1x32xf32> to vector<4x16x32xf32>
    %124 = arith.mulf %122, %123 : vector<4x16x32xf32>
    %125 = vector.shape_cast %124 : vector<4x16x32xf32> to vector<64x32xf32>
    %126 = arith.truncf %125 : vector<64x32xf32> to vector<64x32xbf16>
    %127 = arith.truncf %119 : vector<32x32xf32> to vector<32x32xbf16>
    %cst_44 = arith.constant dense<0.000000e+00> : vector<64x32xf32>
    %128 = tpu.matmul %126, %127, %cst_44 {dimension_numbers = #tpu.dot_dimension_numbers<[1], [1], [0], [0], [0, 0, 1, 0], [], []>} : vector<64x32xbf16>, vector<32x32xbf16>, vector<64x32xf32> -> vector<64x32xf32>
    %cst_45 = arith.constant 0.353553385 : f32
    %129 = vector.broadcast %cst_45 : f32 to vector<64x32xf32>
    %130 = arith.mulf %128, %129 : vector<64x32xf32>
    %131 = arith.addf %130, %106 : vector<64x32xf32>
    %cst_46 = arith.constant dense<0xFF800000> : vector<64xf32>
    %132 = vector.multi_reduction <maximumf>, %131, %cst_46 [1] : vector<64x32xf32> to vector<64xf32>
    %133 = vector.shape_cast %132 : vector<64xf32> to vector<64x1xf32>
    %134 = vector.broadcast %133 : vector<64x1xf32> to vector<64x32xf32>
    %135 = arith.subf %131, %134 : vector<64x32xf32>
    %136 = math.exp %135 : vector<64x32xf32>
    %cst_47 = arith.constant dense<0.000000e+00> : vector<64xf32>
    %137 = vector.multi_reduction <add>, %136, %cst_47 [1] : vector<64x32xf32> to vector<64xf32>
    %138 = vector.shape_cast %137 : vector<64xf32> to vector<64x1xf32>
    %139 = tpu.reciprocal %138 {approx = true} : vector<64x1xf32> -> vector<64x1xf32>
    %140 = vector.broadcast %139 : vector<64x1xf32> to vector<64x32xf32>
    %141 = arith.mulf %136, %140 : vector<64x32xf32>
    %142 = arith.truncf %141 : vector<64x32xf32> to vector<64x32xbf16>
    %143 = arith.truncf %120 : vector<32x32xf32> to vector<32x32xbf16>
    %cst_48 = arith.constant dense<0.000000e+00> : vector<64x32xf32>
    %144 = tpu.matmul %142, %143, %cst_48 {dimension_numbers = #tpu.dot_dimension_numbers<[1], [0], [0], [1], [0, 0, 1, 1], [], []>} : vector<64x32xbf16>, vector<32x32xbf16>, vector<64x32xf32> -> vector<64x32xf32>
    %145 = vector.shape_cast %144 : vector<64x32xf32> to vector<4x16x32xf32>
    %146 = vector.broadcast %2 : vector<4x1x32xf32> to vector<4x16x32xf32>
    %147 = arith.mulf %145, %146 : vector<4x16x32xf32>
    %cst_49 = arith.constant dense<0.000000e+00> : vector<16x32xf32>
    %148 = vector.multi_reduction <add>, %147, %cst_49 [0] : vector<4x16x32xf32> to vector<16x32xf32>
    %149 = arith.truncf %148 : vector<16x32xf32> to vector<16x32xbf16>
    %cst_50 = arith.constant dense<0.000000e+00> : vector<16x32xf32>
    %150 = tpu.matmul %149, %104, %cst_50 {dimension_numbers = #tpu.dot_dimension_numbers<[1], [0], [0], [1], [0, 0, 1, 1], [], []>} : vector<16x32xbf16>, vector<32x32xbf16>, vector<16x32xf32> -> vector<16x32xf32>
    %151 = vector.broadcast %105 : vector<1x32xf32> to vector<16x32xf32>
    %152 = arith.addf %150, %151 : vector<16x32xf32>
    %153 = arith.addf %75, %152 : vector<16x32xf32>
    %cst_51 = arith.constant dense<0.000000e+00> : vector<16xf32>
    %154 = vector.multi_reduction <add>, %153, %cst_51 [1] : vector<16x32xf32> to vector<16xf32>
    %155 = vector.shape_cast %154 : vector<16xf32> to vector<16x1xf32>
    %cst_52 = arith.constant 3.200000e+01 : f32
    %156 = vector.broadcast %cst_52 : f32 to vector<16x1xf32>
    %157 = arith.divf %155, %156 : vector<16x1xf32>
    %158 = vector.broadcast %157 : vector<16x1xf32> to vector<16x32xf32>
    %159 = arith.subf %153, %158 : vector<16x32xf32>
    %160 = arith.mulf %159, %159 : vector<16x32xf32>
    %cst_53 = arith.constant dense<0.000000e+00> : vector<16xf32>
    %161 = vector.multi_reduction <add>, %160, %cst_53 [1] : vector<16x32xf32> to vector<16xf32>
    %162 = vector.shape_cast %161 : vector<16xf32> to vector<16x1xf32>
    %cst_54 = arith.constant 3.200000e+01 : f32
    %163 = vector.broadcast %cst_54 : f32 to vector<16x1xf32>
    %164 = arith.divf %162, %163 : vector<16x1xf32>
    %165 = vector.broadcast %157 : vector<16x1xf32> to vector<16x32xf32>
    %166 = arith.subf %153, %165 : vector<16x32xf32>
    %cst_55 = arith.constant 9.99999974E-6 : f32
    %167 = vector.broadcast %cst_55 : f32 to vector<16x1xf32>
    %168 = arith.addf %164, %167 : vector<16x1xf32>
    %169 = math.rsqrt %168 : vector<16x1xf32>
    %170 = vector.broadcast %169 : vector<16x1xf32> to vector<16x32xf32>
    %171 = arith.mulf %166, %170 : vector<16x32xf32>
    %172 = vector.extract_strided_slice %3 {offsets = [6, 0], sizes = [1, 32], strides = [1, 1]} : vector<9x32xf32> to vector<1x32xf32>
    %173 = vector.broadcast %172 : vector<1x32xf32> to vector<16x32xf32>
    %174 = arith.mulf %171, %173 : vector<16x32xf32>
    %175 = vector.extract_strided_slice %3 {offsets = [7, 0], sizes = [1, 32], strides = [1, 1]} : vector<9x32xf32> to vector<1x32xf32>
    %176 = vector.broadcast %175 : vector<1x32xf32> to vector<16x32xf32>
    %177 = arith.addf %174, %176 : vector<16x32xf32>
    %178 = arith.truncf %177 : vector<16x32xf32> to vector<16x32xbf16>
    %c0_56 = arith.constant 0 : index
    %c0_57 = arith.constant 0 : index
    %179 = vector.load %arg11[%c0_56, %c0_57] : memref<32x64xbf16, #tpu.memory_space<vmem>>, vector<32x64xbf16>
    %cst_58 = arith.constant dense<0.000000e+00> : vector<16x64xf32>
    %180 = tpu.matmul %178, %179, %cst_58 {dimension_numbers = #tpu.dot_dimension_numbers<[1], [0], [0], [1], [0, 0, 1, 1], [], []>} : vector<16x32xbf16>, vector<32x64xbf16>, vector<16x64xf32> -> vector<16x64xf32>
    %c0_59 = arith.constant 0 : index
    %c0_60 = arith.constant 0 : index
    %181 = vector.load %arg10[%c0_59, %c0_60] : memref<1x64xf32, #tpu.memory_space<vmem>>, vector<1x64xf32>
    %182 = vector.broadcast %181 : vector<1x64xf32> to vector<16x64xf32>
    %183 = arith.addf %180, %182 : vector<16x64xf32>
    %184 = arith.mulf %183, %183 : vector<16x64xf32>
    %185 = arith.mulf %183, %184 : vector<16x64xf32>
    %cst_61 = arith.constant 4.471500e-02 : f32
    %186 = vector.broadcast %cst_61 : f32 to vector<16x64xf32>
    %187 = arith.mulf %186, %185 : vector<16x64xf32>
    %188 = arith.addf %183, %187 : vector<16x64xf32>
    %cst_62 = arith.constant 0.797884583 : f32
    %189 = vector.broadcast %cst_62 : f32 to vector<16x64xf32>
    %190 = arith.mulf %189, %188 : vector<16x64xf32>
    %191 = math.tanh %190 : vector<16x64xf32>
    %cst_63 = arith.constant 1.000000e+00 : f32
    %192 = vector.broadcast %cst_63 : f32 to vector<16x64xf32>
    %193 = arith.addf %192, %191 : vector<16x64xf32>
    %cst_64 = arith.constant 5.000000e-01 : f32
    %194 = vector.broadcast %cst_64 : f32 to vector<16x64xf32>
    %195 = arith.mulf %194, %193 : vector<16x64xf32>
    %196 = arith.mulf %183, %195 : vector<16x64xf32>
    %197 = arith.truncf %196 : vector<16x64xf32> to vector<16x64xbf16>
    %c0_65 = arith.constant 0 : index
    %c0_66 = arith.constant 0 : index
    %198 = vector.load %arg12[%c0_65, %c0_66] : memref<64x32xbf16, #tpu.memory_space<vmem>>, vector<64x32xbf16>
    %cst_67 = arith.constant dense<0.000000e+00> : vector<16x32xf32>
    %199 = tpu.matmul %197, %198, %cst_67 {dimension_numbers = #tpu.dot_dimension_numbers<[1], [0], [0], [1], [0, 0, 1, 1], [], []>} : vector<16x64xbf16>, vector<64x32xbf16>, vector<16x32xf32> -> vector<16x32xf32>
    %200 = arith.addf %153, %199 : vector<16x32xf32>
    %201 = vector.extract_strided_slice %3 {offsets = [8, 0], sizes = [1, 32], strides = [1, 1]} : vector<9x32xf32> to vector<1x32xf32>
    %202 = vector.broadcast %201 : vector<1x32xf32> to vector<16x32xf32>
    %203 = arith.addf %200, %202 : vector<16x32xf32>
    %c0_68 = arith.constant 0 : index
    %c0_69 = arith.constant 0 : index
    %204 = vector.load %arg13[%c0_68, %c0_69] : memref<16x32xf32, #tpu.memory_space<vmem>>, vector<16x32xf32>
    tpu.vector_store %arg13[%c0_68, %c0_69], %203 {strides = array<i32>} : memref<16x32xf32, #tpu.memory_space<vmem>>, vector<16x32xf32>,
    return
  }
  func.func @transform_0(%arg0: i32) -> (i32, i32) {
    %c0_i32 = arith.constant 0 : i32
    %c0_i32_0 = arith.constant 0 : i32
    return %arg0, %c0_i32 : i32, i32
  }
  func.func @transform_1(%arg0: i32) -> (i32, i32) {
    %c0_i32 = arith.constant 0 : i32
    %c0_i32_0 = arith.constant 0 : i32
    return %arg0, %c0_i32 : i32, i32
  }
  func.func @transform_2(%arg0: i32) -> (i32, i32) {
    %c0_i32 = arith.constant 0 : i32
    %c0_i32_0 = arith.constant 0 : i32
    %c0_i32_1 = arith.constant 0 : i32
    return %c0_i32, %c0_i32_0 : i32, i32
  }
  func.func @transform_3(%arg0: i32) -> (i32, i32) {
    %c0_i32 = arith.constant 0 : i32
    %c0_i32_0 = arith.constant 0 : i32
    %c0_i32_1 = arith.constant 0 : i32
    return %c0_i32, %c0_i32_0 : i32, i32
  }
  func.func @transform_4(%arg0: i32) -> (i32, i32, i32) {
    %c0_i32 = arith.constant 0 : i32
    %c0_i32_0 = arith.constant 0 : i32
    %c0_i32_1 = arith.constant 0 : i32
    %c0_i32_2 = arith.constant 0 : i32
    return %c0_i32, %c0_i32_0, %c0_i32_1 : i32, i32, i32
  }
  func.func @transform_5(%arg0: i32) -> (i32, i32, i32) {
    %c0_i32 = arith.constant 0 : i32
    %c0_i32_0 = arith.constant 0 : i32
    %c0_i32_1 = arith.constant 0 : i32
    %c0_i32_2 = arith.constant 0 : i32
    return %c0_i32, %c0_i32_0, %c0_i32_1 : i32, i32, i32
  }
  func.func @transform_6(%arg0: i32) -> (i32, i32) {
    %c0_i32 = arith.constant 0 : i32
    %c0_i32_0 = arith.constant 0 : i32
    %c0_i32_1 = arith.constant 0 : i32
    return %c0_i32, %c0_i32_0 : i32, i32
  }
  func.func @transform_7(%arg0: i32) -> (i32, i32, i32) {
    %c0_i32 = arith.constant 0 : i32
    %c0_i32_0 = arith.constant 0 : i32
    %c0_i32_1 = arith.constant 0 : i32
    %c0_i32_2 = arith.constant 0 : i32
    return %c0_i32, %c0_i32_0, %c0_i32_1 : i32, i32, i32
  }
  func.func @transform_8(%arg0: i32) -> (i32, i32) {
    %c0_i32 = arith.constant 0 : i32
    %c0_i32_0 = arith.constant 0 : i32
    %c0_i32_1 = arith.constant 0 : i32
    return %c0_i32, %c0_i32_0 : i32, i32
  }
  func.func @transform_9(%arg0: i32) -> (i32, i32) {
    %c0_i32 = arith.constant 0 : i32
    %c0_i32_0 = arith.constant 0 : i32
    %c0_i32_1 = arith.constant 0 : i32
    return %c0_i32, %c0_i32_0 : i32, i32
  }
  func.func @transform_10(%arg0: i32) -> (i32, i32) {
    %c0_i32 = arith.constant 0 : i32
    %c0_i32_0 = arith.constant 0 : i32
    %c0_i32_1 = arith.constant 0 : i32
    return %c0_i32, %c0_i32_0 : i32, i32
  }
  func.func @transform_11(%arg0: i32) -> (i32, i32) {
    %c0_i32 = arith.constant 0 : i32
    %c0_i32_0 = arith.constant 0 : i32
    %c0_i32_1 = arith.constant 0 : i32
    return %c0_i32, %c0_i32_0 : i32, i32
  }
  func.func @transform_12(%arg0: i32) -> (i32, i32) {
    %c0_i32 = arith.constant 0 : i32
    %c0_i32_0 = arith.constant 0 : i32
    return %arg0, %c0_i32 : i32, i32
  }
}

</mosaic_0001>

<bundles_post_ra>
// kernel: tpu_custom_call.1
= control target key start
LH: loop header
LB: loop body
LE: loop exit
PB: predicated region body
PF: predicated region fallthrough
CT: control target
= control target key end

     0   :  { %s2782_s0 = inlined_call_operand.vmem [shape: f32[32,32], index: 0, kind: input, shape index: {}]   ;;  %s2783_s1 = inlined_call_operand.vmem [shape: f32[64,32], index: 1, kind: input, shape index: {}]   ;;  %s2784_s2 = inlined_call_operand.vmem [shape: f32[64,16], index: 2, kind: input, shape index: {}]   ;;  %s2785_s3 = inlined_call_operand.vmem [shape: f32[64,32], index: 3, kind: input, shape index: {}]   ;;  %s2786_s4 = inlined_call_operand.vmem [shape: f32[4,1,32], index: 4, kind: input, shape index: {}]   ;;  %s2787_s5 = inlined_call_operand.vmem [shape: bf16[2,32,96], index: 5, kind: input, shape index: {}]   ;;  %s2788_s6 = inlined_call_operand.vmem [shape: f32[2,96], index: 6, kind: input, shape index: {}]   ;;  %s2789_s7 = inlined_call_operand.vmem [shape: bf16[2,32,32], index: 7, kind: input, shape index: {}]   ;;  %s2790_s8 = inlined_call_operand.vmem [shape: f32[9,32], index: 8, kind: input, shape index: {}]   ;;  %s2791_s9 = inlined_call_operand.vmem [shape: f32[1,64], index: 9, kind: input, shape index: {}]   ;;  %s2792_s10 = inlined_call_operand.vmem [shape: bf16[32,64], index: 10, kind: input, shape index: {}]   ;;  %s2793_s11 = inlined_call_operand.vmem [shape: bf16[64,32], index: 11, kind: input, shape index: {}]   ;;  %s2794_s12 = inlined_call_operand.hbm [shape: f32[32,32], index: 12, kind: output, shape index: {}]  }
   0x1   :  { %2795 = sst [smem:[#allocation5_spill]] %s2782_s0 }
   0x2   :  { %2796 = sst [smem:[#allocation6_spill]] %s2783_s1 }
   0x3   :  { %17 = vsyncpa [#allocation3], 0 }
   0x4   :  { %19 = vsyncpa [#allocation3 + $0x1], 0  ;;  %s2317_s21 = smov 0   ;;  %s2319_s22 = smov 0  }
   0x5   :  { %s2321_s23 = smov 0   ;;  %s2323_s24 = smov 0  }
   0x6 LB: > { %s2338_s25 = sadd.s32 4294967295, %s2243_s24   ;;  %s1821_s26 = sadd.s32 4294967294, %s2243_s24   ;;  %s2243_s24 = sphi %s2323_s24, %s2804_s24   ;;  %s2239_s23 = sphi %s2321_s23, %s2803_s23   ;;  %s2235_s22 = sphi %s2319_s22, %s2802_s22   ;;  %s2231_s21 = sphi %s2317_s21, %s2801_s21  }
   0x7   : > { %s2342_s27 = sadd.s32 1, %s2243_s24   ;;  %s294_s28 = sadd.s32 1, %s2239_s23 }
   0x8   : > { %s291_s29 = ssub.s32 %s2243_s24, %s2342_s27  ;;  %p304_p0 = scmp.ne.s32.totalorder %s2239_s23, %s2235_s22 }
   0x9   : > { %p292_p1 = scmp.eq.s32.totalorder %s291_s29, 0  ;;  %p305_p2 = scmp.eq.s32.totalorder %s2338_s25, 1 }
   0xa   : > { %p310_p3 = scmp.ne.s32.totalorder %s2235_s22, %s2231_s21  ;;  %p311_p4 = scmp.eq.s32.totalorder %s1821_s26, 1 }
   0xb   : > { %s2353_s30 = scalar_select %p292_p1, %s2239_s23, %s294_s28  }
   0xc   : > { %p2355_p5 = por %p305_p2, %p304_p0  ;;  %p2359_p6 = por %p311_p4, %p310_p3 }
   0xd   : > { %p1824_p7 = scmp.ge.s32.totalorder %s2243_s24, 1  ;;  %p377_p8 = scmp.lt.s32.totalorder %s2243_s24, 3 }
   0xf   : > { %p378_p9 = pnand %p1824_p7, %p377_p8 }
  0x10   : > { %s1826_s15 = sshll.u32 (!%p378_p9), %s2338_s25, 1  ;;  %s2799_s0 = sld [smem:[#allocation5_spill]] (!%p378_p9) }
  0x11   : > { %381 = sbr.rel (%p378_p9) target bundleno = 3824 (0xef0), region = 68  ;;  %p425_p10 = scmp.lt.s32.totalorder (!%p378_p9), %s1826_s15, 3 }
  0x12   : > { %s2247_s18 = smov (!%p378_p9), 96   ;;  %s1828_s20 = sshll.u32 (!%p378_p9), %s2338_s25, 2 }
  0x13   : > { %p431_p11 = scmp.lt.s32.totalorder (!%p378_p9), %s1828_s20, 7  ;;  %s2800_s1 = sld [smem:[#allocation6_spill]] (!%p378_p9) }
  0x14   : > { %s421_s28 = sand.u32 (!%p378_p9), 1, %s2235_s22  }
  0x15   : > { %s1825_s29 = sshll.u32 (!%p378_p9), %s421_s28, 4 }
  0x16   : > { %s2806_s15 = smov (!%p425_p10, %s1826_s15), 3  ;;  %vm451_vm0 = vcmask 261120   ;;  %v2086_v14 = vld [vmem:[%s2787_s5 + $0x8] sm:$0xff]   ;;  %v2245_v15 = vmov 0.0   ;;  %vm2246_vm1 = vmmov 0   ;;  %v2087_v16 = vld [vmem:[%s2787_s5] sm:$0xff]   ;;  %v479_v23 = vlaneseq }
  0x17   : > { %s1827_s16 = sshll.u32 %s2806_s15, 3  ;;  %1934 = vmatprep.subr.bf16.mxu0 %v2245_v15  ;;  %1938 = vmatprep.mubr.msk.bf16.mxu0 %vm2246_vm1, %v2245_v15  ;;  %v2397_v26 = vld [vmem:[%s2790_s8] sm:$0xff]  ;;  %vm704_vm2 = vcmask 130048   ;;  %s2808_s20 = smov (!%p431_p11, %s1828_s20), 7  ;;  %vm1678_vm3 = vcmask 523264  }
  0x18   : > { %s428_s19 = scalar_lea.vmem %s2799_s0, %s1827_s16  ;;  %1935 = vmatpush3.bf16.msra.mxu0 %v2086_v14  ;;  %v2391_v24 = vshrl.u32 %v479_v23, 7  ;;  %v2407_v40 = vld [vmem:[%s2788_s6] sm:$0x3]  ;;  %v2425_v47 = vld [vmem:[%s2786_s4 + $0x2] ss:$0 sm:$0xff]  ;;  %s1829_s26 = sshll.u32 %s2808_s20, 3 }
  0x19   : > { %v2369_v0 = vld [vmem:[%s428_s19] sm:$0xff]  ;;  %v2371_v1 = vld [vmem:[%s428_s19 + $0x8] sm:$0xff]  ;;  %1936 = vmatprep.subr.bf16.mxu0 %v2245_v15  ;;  %s2248_s19 = smov 64   ;;  %s434_s15 = scalar_lea.vmem %s2800_s1, %s1829_s26 }
  0x1a   : > { %v452_v2 = vsel %vm451_vm0, %v2369_v0, 0.0  ;;  %v455_v3 = vsel %vm451_vm0, %v2371_v1, 0.0  ;;  %v481_v25 = vsub.s32 2, %v2391_v24  ;;  %v487_v30 = vsub.s32 3, %v2391_v24  ;;  %v2415_v45 = vld [vmem:[%s2786_s4] ss:$0 sm:$0xff] }
  0x1b   : > { %453 = vadd.xlane.f32.xlu0 %v452_v2  ;;  %v510_v39 = vsub.s32 0, %v2391_v24  ;;  %v2420_v46 = vld [vmem:[%s2786_s4 + $0x1] ss:$0 sm:$0xff]  ;;  %v2430_v50 = vld [vmem:[%s2786_s4 + $0x3] ss:$0 sm:$0xff]  ;;  %s423_s16 = scalar_lea.vmem [#allocation2], %s1825_s29 }
  0x1c   : > { %1937 = vmatpush3.bf16.msra.mxu0 %v2087_v16  ;;  %v482_v29 = vrot.slane %v2397_v26, %v481_v25  ;;  %v488_v34 = vrot.slane %v2397_v26, %v487_v30  ;;  %s1747_s17 = sshll.u32 %s423_s16, 4  ;;  %s2739_s17 = int_to_ptr.vmem [resolvable:$true] %s1747_s17 }
  0x1d   : > { %v511_v41 = vrot.slane %v2407_v40, %v510_v39  ;;  %s2183_s29 = scalar_lea.vmem %s2739_s17, 256 }
  0x1e   : > { %p2184_p12 = scmp.ne.s32.totalorder %s2739_s17, %s2183_s29 }
  0x1f   : > { %456 = vadd.xlane.f32.xlu0 %v455_v3 }
  0x20   : > { %p2185_p13 = pnand %p2184_p12, %p2355_p5 }
  0x22   : > { %p2186_p0 = pneg %p2185_p13 }
  0xa4   : > { %v454_v4 = vpop.xlane.xlu0 %453 }
  0xa5   : > { %v459_v5 = vmul.f32 0.03125, %v454_v4 }
  0xa7   : > { %v461_v6 = vsub.f32 %v2369_v0, %v459_v5 }
  0xa8   : > { %v457_v7 = vpop.xlane.xlu0 %456 }
  0xa9   : > { %v460_v8 = vmul.f32 0.03125, %v457_v7  ;;  %v463_v9 = vmul.f32 %v461_v6, %v461_v6 }
  0xab   : > { %v462_v10 = vsub.f32 %v2371_v1, %v460_v8  ;;  %v465_v11 = vsel %vm451_vm0, %v463_v9, 0.0  ;;  %v499_v9 = vld [vmem:[%s2784_s2] sm:$0xff] }
  0xac   : > { %466 = vadd.xlane.f32.xlu1 %v465_v11 }
  0xad   : > { %v464_v12 = vmul.f32 %v462_v10, %v462_v10 }
  0xaf   : > { %v468_v13 = vsel %vm451_vm0, %v464_v12, 0.0 }
  0xb0   : > { %469 = vadd.xlane.f32.xlu1 %v468_v13 }
 0x135   : > { %v467_v17 = vpop.xlane.xlu1 %466 }
 0x136   : > { %v471_v18 = vmul.f32 0.03125, %v467_v17 }
 0x138   : > { %v473_v19 = vadd.f32 1e-05, %v471_v18  ;;  %v502_v18 = vld [vmem:[%s2784_s2 + $0x18] sm:$0xff] }
 0x139   : > { %v470_v20 = vpop.xlane.xlu1 %469 }
 0x13a   : > { %2100 = vrsqrt.f32 %v473_v19  ;;  %v472_v21 = vmul.f32 0.03125, %v470_v20  ;;  %v505_v20 = vld [vmem:[%s2784_s2 + $0x30] sm:$0xff] }
 0x13c   : > { %v474_v22 = vadd.f32 1e-05, %v472_v21 }
 0x13e   : > { %2102 = vrsqrt.f32 %v474_v22 }
 0x147   : > { %v2101_v27 = vpop.eup %2100 }
 0x148   : > { %v477_v28 = vmul.f32 %v2101_v27, %v461_v6  ;;  %v501_v6 = vld [vmem:[%s2784_s2 + $0x10] sm:$0xff] }
 0x14a   : > { %v483_v33 = vmul.f32 %v482_v29, %v477_v28  ;;  %v500_v28 = vld [vmem:[%s2784_s2 + $0x8] sm:$0xff] }
 0x14b   : > { %v2103_v31 = vpop.eup %2102 }
 0x14c   : > { %v478_v32 = vmul.f32 %v2103_v31, %v462_v10  ;;  %v489_v36 = vadd.f32 %v488_v34, %v483_v33 }
 0x14e   : > { %v484_v35 = vmul.f32 %v482_v29, %v478_v32 }
 0x150   : > { %v490_v37 = vadd.f32 %v488_v34, %v484_v35 }
 0x152   : > { %v507_v38 = vpack.c.bf16 %v490_v37, %v489_v36  ;;  %v503_v36 = vld [vmem:[%s2784_s2 + $0x20] sm:$0xff] }
 0x154   : > { %1939 = vmatmul.mubr.msk.bf16.vlgmr.msra.gmra.mxu0 %vm451_vm0, %v507_v38 }
 0x214   : > { %v561_v42 = vpop.f32.mrf.mxu0 }
 0x215   : > { %v562_v43 = vadd.f32 %v561_v42, %v511_v41  ;;  %v504_v42 = vld [vmem:[%s2784_s2 + $0x28] sm:$0xff] }
 0x216   : > { %v1940_v44 = vpop.f32.mrf.mxu0 }
 0x217   : > { %v592_v52 = vmul.f32 %v2415_v45, %v562_v43  ;;  %v594_v53 = vmul.f32 %v2420_v46, %v562_v43  ;;  %v596_v54 = vmul.f32 %v2425_v47, %v562_v43  ;;  %v598_v59 = vmul.f32 %v2430_v50, %v562_v43 }
 0x218   : > { %v564_v48 = vpop.f32.mrf.mxu0 }
 0x219   : > { %v565_v49 = vadd.f32 %v564_v48, %v511_v41 }
 0x21a   : > { %v1941_v51 = vpop.f32.mrf.mxu0 }
 0x21b   : > { %v2435_v55 = vpack.c.bf16 %v565_v49, %v562_v43  ;;  %v593_v56 = vmul.f32 %v2415_v45, %v565_v49  ;;  %v595_v57 = vmul.f32 %v2420_v46, %v565_v49  ;;  %v597_v58 = vmul.f32 %v2425_v47, %v565_v49 }
 0x21c   : > { %v599_v60 = vmul.f32 %v2430_v50, %v565_v49  ;;  %v506_v49 = vld [vmem:[%s2784_s2 + $0x38] sm:$0xff] }
 0x21d   : > { %606 = vrot.lane.b32.xlu0 %v2435_v55, %s2247_s18  ;;  %v600_v61 = vpack.c.bf16 %v593_v56, %v592_v52  ;;  %v601_v62 = vpack.c.bf16 %v595_v57, %v594_v53  ;;  %v602_v63 = vpack.c.bf16 %v597_v58, %v596_v54 }
 0x21e   : > { %v603_v2 = vpack.c.bf16 %v599_v60, %v598_v59 }
 0x21f   : > { %1944 = vmatprep.mubr.msk.bf16.mxu1 %vm451_vm0, %v600_v61 }
 0x28f   : > { %v607_v3 = vpop.permute.xlu0 %606 }
 0x290   : > { %2038 = vmatprep.subr.msk.bf16.mxu1 %vm451_vm0, %v607_v3  ;;  %v621_v4 = vsel %vm451_vm0, %v607_v3, 0 }
 0x291   : > { %1943 = vmatpush3.bf16.xpose.msra.mxu1 %v621_v4 }
 0x292   : > { %1962 = vmatprep.subr.bf16.mxu1 %v2245_v15 }
 0x298   : > { %1945 = vmatmul.mubr.msk.bf16.vlgmr.msra.gmra.mxu1 %vm451_vm0, %v601_v62 }
 0x299   : > { %1948 = vmatprep.mubr.msk.bf16.mxu1 %vm451_vm0, %v602_v63 }
 0x2a0   : > { %1949 = vmatmul.mubr.msk.bf16.gmra.mxu1 %vm451_vm0, %v603_v2 }
 0x2a1   : > { %1966 = vmatprep.mubr.msk.bf16.mxu1 %vm2246_vm1, %v2245_v15 }
 0x358   : > { %v1946_v5 = vpop.f32.mrf.mxu1 }
 0x359   : > { %v690_v7 = vmul.f32 0.35355338, %v1946_v5 }
 0x35a   : > { %v657_v8 = vpop.f32.mrf.mxu1 }
 0x35b   : > { %v688_v10 = vmul.f32 0.35355338, %v657_v8  ;;  %v698_v11 = vadd.f32 %v690_v7, %v501_v6 }
 0x35c   : > { %v1947_v12 = vpop.f32.mrf.mxu1 }
 0x35d   : > { %v691_v13 = vmul.f32 0.35355338, %v1947_v12  ;;  %v711_v14 = vsel %vm704_vm2, %v698_v11, -inf  ;;  %v696_v16 = vadd.f32 %v688_v10, %v499_v9 }
 0x35e   : > { %712 = vmax.xlane.f32.xlu1 %v711_v14  ;;  %v660_v17 = vpop.f32.mrf.mxu1 }
 0x35f   : > { %v689_v21 = vmul.f32 0.35355338, %v660_v17  ;;  %v705_v23 = vsel %vm704_vm2, %v696_v16, -inf  ;;  %v699_v25 = vadd.f32 %v691_v13, %v502_v18 }
 0x360   : > { %v1950_v19 = vpop.f32.mrf.mxu1 }
 0x361   : > { %v694_v22 = vmul.f32 0.35355338, %v1950_v19  ;;  %v714_v32 = vsel %vm704_vm2, %v699_v25, -inf  ;;  %v697_v34 = vadd.f32 %v689_v21, %v500_v28 }
 0x362   : > { %706 = vmax.xlane.f32.xlu1 %v705_v23  ;;  %v673_v27 = vpop.f32.mrf.mxu1 }
 0x363   : > { %v702_v29 = vadd.f32 %v694_v22, %v505_v20  ;;  %v692_v31 = vmul.f32 0.35355338, %v673_v27  ;;  %v708_v38 = vsel %vm704_vm2, %v697_v34, -inf }
 0x364   : > { %v1951_v30 = vpop.f32.mrf.mxu1 }
 0x365   : > { %v723_v33 = vsel %vm704_vm2, %v702_v29, -inf  ;;  %v700_v41 = vadd.f32 %v692_v31, %v503_v36  ;;  %v695_v43 = vmul.f32 0.35355338, %v1951_v30 }
 0x366   : > { %715 = vmax.xlane.f32.xlu1 %v714_v32  ;;  %724 = vmax.xlane.f32.xlu0 %v723_v33  ;;  %v676_v35 = vpop.f32.mrf.mxu1 }
 0x367   : > { %v693_v37 = vmul.f32 0.35355338, %v676_v35  ;;  %v717_v44 = vsel %vm704_vm2, %v700_v41, -inf  ;;  %v703_v52 = vadd.f32 %v695_v43, %v506_v49 }
 0x369   : > { %v701_v48 = vadd.f32 %v693_v37, %v504_v42  ;;  %v726_v53 = vsel %vm704_vm2, %v703_v52, -inf }
 0x36a   : > { %709 = vmax.xlane.f32.xlu1 %v708_v38 }
 0x36b   : > { %v720_v51 = vsel %vm704_vm2, %v701_v48, -inf }
 0x36e   : > { %718 = vmax.xlane.f32.xlu1 %v717_v44 }
 0x372   : > { %721 = vmax.xlane.f32.xlu1 %v720_v51 }
 0x376   : > { %727 = vmax.xlane.f32.xlu1 %v726_v53 }
 0x3e7   : > { %v713_v54 = vpop.xlane.xlu1 %712 }
 0x3e8   : > { %v731_v56 = vsub.f32 %v698_v11, %v713_v54 }
 0x3ea   : > { %v741_v57 = vmul.f32 1.442695, %v731_v56 }
 0x3eb   : > { %v707_v58 = vpop.xlane.xlu1 %706 }
 0x3ec   : > { %2104 = vpow2.f32 %v741_v57  ;;  %v729_v59 = vsub.f32 %v696_v16, %v707_v58 }
 0x3ee   : > { %v737_v60 = vmul.f32 1.442695, %v729_v59 }
 0x3ef   : > { %v716_v61 = vpop.xlane.xlu1 %715  ;;  %v725_v62 = vpop.xlane.xlu0 %724 }
 0x3f0   : > { %2106 = vpow2.f32 %v737_v60  ;;  %v732_v63 = vsub.f32 %v699_v25, %v716_v61  ;;  %v735_v3 = vsub.f32 %v702_v29, %v725_v62 }
 0x3f2   : > { %v743_v2 = vmul.f32 1.442695, %v732_v63  ;;  %v749_v6 = vmul.f32 1.442695, %v735_v3 }
 0x3f3   : > { %v710_v4 = vpop.xlane.xlu1 %709 }
 0x3f4   : > { %2108 = vpow2.f32 %v743_v2  ;;  %v730_v5 = vsub.f32 %v697_v34, %v710_v4 }
 0x3f6   : > { %v739_v7 = vmul.f32 1.442695, %v730_v5 }
 0x3f7   : > { %v719_v8 = vpop.xlane.xlu1 %718 }
 0x3f8   : > { %2110 = vpow2.f32 %v739_v7  ;;  %v733_v9 = vsub.f32 %v700_v41, %v719_v8 }
 0x3f9   : > { %v2485_v10 = vpop.eup %2104  ;;  %2112 = vpow2.f32 %v749_v6 }
 0x3fa   : > { %v745_v11 = vmul.f32 1.442695, %v733_v9  ;;  %v759_v12 = vsel %vm704_vm2, %v2485_v10, 0.0  ;;  %v2088_v9 = vld [vmem:[%s2789_s7 + $0x8] sm:$0xff]  }
 0x3fb   : > { %760 = vadd.xlane.f32.xlu1 %v759_v12  ;;  %v722_v13 = vpop.xlane.xlu1 %721  ;;  %1963 = vmatpush3.bf16.msra.mxu1 %v2088_v9  ;;  %v440_v9 = vld [vmem:[%s434_s15] sm:$0xff] }
 0x3fc   : > { %v734_v14 = vsub.f32 %v701_v48, %v722_v13  ;;  %2114 = vpow2.f32 %v745_v11  ;;  %1964 = vmatprep.subr.bf16.mxu1 %v2245_v15 }
 0x3fd   : > { %v2107_v16 = vpop.eup %2106 }
 0x3fe   : > { %v747_v17 = vmul.f32 1.442695, %v734_v14  ;;  %v753_v18 = vsel %vm704_vm2, %v2107_v16, 0.0 }
 0x3ff   : > { %754 = vadd.xlane.f32.xlu1 %v753_v18  ;;  %v728_v19 = vpop.xlane.xlu1 %727 }
 0x400   : > { %v736_v20 = vsub.f32 %v703_v52, %v728_v19  ;;  %2116 = vpow2.f32 %v747_v17 }
 0x401   : > { %v2109_v21 = vpop.eup %2108 }
 0x402   : > { %v751_v22 = vmul.f32 1.442695, %v736_v20  ;;  %v762_v23 = vsel %vm704_vm2, %v2109_v21, 0.0 }
 0x403   : > { %763 = vadd.xlane.f32.xlu1 %v762_v23 }
 0x404   : > { %2118 = vpow2.f32 %v751_v22 }
 0x405   : > { %v2111_v25 = vpop.eup %2110 }
 0x406   : > { %v756_v27 = vsel %vm704_vm2, %v2111_v25, 0.0  ;;  %v2113_v28 = vpop.eup %2112 }
 0x407   : > { %757 = vadd.xlane.f32.xlu1 %v756_v27  ;;  %v771_v29 = vsel %vm704_vm2, %v2113_v28, 0.0 }
 0x409   : > { %v2115_v30 = vpop.eup %2114 }
 0x40a   : > { %v765_v31 = vsel %vm704_vm2, %v2115_v30, 0.0 }
 0x40b   : > { %772 = vadd.xlane.f32.xlu1 %v771_v29 }
 0x40d   : > { %v2117_v32 = vpop.eup %2116 }
 0x40e   : > { %v768_v34 = vsel %vm704_vm2, %v2117_v32, 0.0 }
 0x40f   : > { %766 = vadd.xlane.f32.xlu1 %v765_v31 }
 0x411   : > { %v2119_v33 = vpop.eup %2118 }
 0x412   : > { %v774_v35 = vsel %vm704_vm2, %v2119_v33, 0.0 }
 0x413   : > { %769 = vadd.xlane.f32.xlu1 %v768_v34  ;;  %775 = vadd.xlane.f32.xlu0 %v774_v35 }
 0x424   : > { %797 = vrot.lane.b32.xlu1 %v2435_v55, %s2248_s19  ;;  %s1887_s19 = sshll.u32 %s2338_s25, 8  ;;  %s2742_s25 = scalar_lea.sflag [#allocation3], %s421_s28 }
 0x484   : > { %v761_v36 = vpop.xlane.xlu1 %760 }
 0x488   : > { %v755_v37 = vpop.xlane.xlu1 %754 }
 0x489   : > { %2120 = vrcp.f32 %v755_v37 }
 0x48c   : > { %v764_v38 = vpop.xlane.xlu1 %763 }
 0x48d   : > { %2122 = vrcp.f32 %v764_v38 }
 0x48e   : > { %2124 = vrcp.f32 %v761_v36 }
 0x490   : > { %v758_v41 = vpop.xlane.xlu1 %757 }
 0x491   : > { %2126 = vrcp.f32 %v758_v41 }
 0x494   : > { %v773_v42 = vpop.xlane.xlu1 %772 }
 0x495   : > { %2128 = vrcp.f32 %v773_v42 }
 0x496   : > { %v2121_v44 = vpop.eup %2120 }
 0x497   : > { %v785_v55 = vmul.f32 %v2121_v44, %v2107_v16 }
 0x498   : > { %v767_v43 = vpop.xlane.xlu1 %766 }
 0x499   : > { %2130 = vrcp.f32 %v767_v43 }
 0x49a   : > { %v2123_v48 = vpop.eup %2122 }
 0x49b   : > { %v2125_v52 = vpop.eup %2124  ;;  %v788_v56 = vmul.f32 %v2123_v48, %v2109_v21 }
 0x49c   : > { %v776_v49 = vpop.xlane.xlu0 %775  ;;  %v770_v51 = vpop.xlane.xlu1 %769  ;;  %v787_v59 = vmul.f32 %v2125_v52, %v2485_v10  ;;  %v2089_v10 = vld [vmem:[%s2789_s7] sm:$0xff]  }
 0x49d   : > { %2132 = vrcp.f32 %v776_v49  ;;  %1965 = vmatpush3.bf16.msra.mxu1 %v2089_v10  ;;  %v441_v10 = vld [vmem:[%s434_s15 + $0x8] sm:$0xff] }
 0x49e   : > { %v2127_v53 = vpop.eup %2126  ;;  %2134 = vrcp.f32 %v770_v51  ;;  %v794_v60 = vpack.c.bf16 %v788_v56, %v787_v59  ;;  %v903_v51 = vrot.slane %v2397_v26, %v510_v39  ;;  %v2090_v39 = vld [vmem:[%s2787_s5 + $0x18] sm:$0xff]  }
 0x49f   : > { %v786_v54 = vmul.f32 %v2127_v53, %v2111_v25 }
 0x4a0   : > { %v798_v57 = vpop.permute.xlu1 %797 }
 0x4a1   : > { %1952 = vmatprep.subr.bf16.mxu0 %v798_v57  ;;  %v793_v58 = vpack.c.bf16 %v786_v54, %v785_v55 }
 0x4a2   : > { %1953 = vmatpush3.bf16.msra.mxu0 %v798_v57  ;;  %v2129_v61 = vpop.eup %2128 }
 0x4a3   : > { %1954 = vmatprep.mubr.msk.bf16.mxu0 %vm704_vm2, %v793_v58  ;;  %1970 = vmatprep.subr.bf16.mxu0 %v2245_v15  ;;  %v791_v3 = vmul.f32 %v2129_v61, %v2113_v28 }
 0x4a5   : > { %1955 = vmatmul.mubr.msk.bf16.vlgmr.msra.gmra.mxu0 %vm704_vm2, %v794_v60 }
 0x4a6   : > { %v2131_v62 = vpop.eup %2130  ;;  %1971 = vmatpush3.bf16.msra.mxu0 %v2090_v39 }
 0x4a7   : > { %v789_v5 = vmul.f32 %v2131_v62, %v2115_v30  ;;  %1972 = vmatprep.subr.bf16.mxu0 %v2245_v15 }
 0x4aa   : > { %v2133_v63 = vpop.eup %2132 }
 0x4ab   : > { %v2135_v2 = vpop.eup %2134  ;;  %v792_v4 = vmul.f32 %v2133_v63, %v2119_v33 }
 0x4ac   : > { %v790_v6 = vmul.f32 %v2135_v2, %v2117_v32 }
 0x4ad   : > { %v796_v7 = vpack.c.bf16 %v792_v4, %v791_v3 }
 0x4ae   : > { %v795_v8 = vpack.c.bf16 %v790_v6, %v789_v5 }
 0x4b0   : > { %1958 = vmatprep.mubr.msk.bf16.mxu0 %vm704_vm2, %v795_v8 }
 0x4b1   : > { %1959 = vmatmul.mubr.msk.bf16.gmra.mxu0 %vm704_vm2, %v796_v7 }
 0x4b2   : > { %1974 = vmatprep.mubr.msk.bf16.mxu0 %vm2246_vm1, %v2245_v15 }
 0x565   : > { %v1956_v11 = vpop.f32.mrf.mxu0 }
 0x566   : > { %v879_v18 = vmul.f32 %v1956_v11, %v2420_v46  ;;  %v1079_v11 = vpack.c.bf16 %v441_v10, %v440_v9 }
 0x567   : > { %v846_v12 = vpop.f32.mrf.mxu0 }
 0x568   : > { %v877_v16 = vmul.f32 %v2415_v45, %v846_v12  ;;  %v886_v27 = vsel %vm451_vm0, %v879_v18, 0.0  ;;  %v1021_v12 = vsub.s32 1, %v2391_v24 }
 0x569   : > { %v1957_v13 = vpop.f32.mrf.mxu0 }
 0x56a   : > { %v885_v21 = vsel %vm451_vm0, %v877_v16, 0.0  ;;  %v880_v22 = vmul.f32 %v1957_v13, %v2420_v46  ;;  %v1022_v13 = vrot.slane %v2407_v40, %v1021_v12  ;;  %v990_v40 = vsub.s32 4, %v2391_v24 }
 0x56b   : > { %v849_v14 = vpop.f32.mrf.mxu0  ;;  %v887_v30 = vadd.f32 %v886_v27, %v885_v21 }
 0x56c   : > { %v878_v19 = vmul.f32 %v2415_v45, %v849_v14  ;;  %v893_v32 = vsel %vm451_vm0, %v880_v22, 0.0 }
 0x56e   : > { %v892_v28 = vsel %vm451_vm0, %v878_v19, 0.0 }
 0x56f   : > { %v894_v36 = vadd.f32 %v893_v32, %v892_v28 }
 0x571   : > { %v1960_v17 = vpop.f32.mrf.mxu0 }
 0x572   : > { %v883_v33 = vmul.f32 %v1960_v17, %v2430_v50 }
 0x573   : > { %v862_v20 = vpop.f32.mrf.mxu0 }
 0x574   : > { %v881_v23 = vmul.f32 %v2425_v47, %v862_v20  ;;  %v890_v42 = vsel %vm451_vm0, %v883_v33, 0.0 }
 0x575   : > { %v1961_v25 = vpop.f32.mrf.mxu0 }
 0x576   : > { %v888_v29 = vsel %vm451_vm0, %v881_v23, 0.0  ;;  %v884_v34 = vmul.f32 %v1961_v25, %v2430_v50  ;;  %v442_v23 = vld [vmem:[%s434_s15 + $0x10] sm:$0xff]  ;;  %v443_v25 = vld [vmem:[%s434_s15 + $0x18] sm:$0xff]  ;;  %s2737_s15 = scalar_lea.hbm %s2794_s12, %s1887_s19 }
 0x577   : > { %v865_v31 = vpop.f32.mrf.mxu0  ;;  %v889_v37 = vadd.f32 %v888_v29, %v887_v30  ;;  %v1080_v27 = vpack.c.bf16 %v443_v25, %v442_v23  ;;  %v991_v29 = vrot.slane %v2397_v26, %v990_v40  ;;  %v1011_v23 = vld [vmem:[%s2785_s3 + $0x8] sm:$0xff] }
 0x578   : > { %v882_v35 = vmul.f32 %v2425_v47, %v865_v31  ;;  %v897_v43 = vsel %vm451_vm0, %v884_v34, 0.0  ;;  %v996_v31 = vsub.s32 5, %v2391_v24 }
 0x579   : > { %v891_v44 = vadd.f32 %v890_v42, %v889_v37 }
 0x57a   : > { %v895_v38 = vsel %vm451_vm0, %v882_v35, 0.0  ;;  %v997_v35 = vrot.slane %v2397_v26, %v996_v31 }
 0x57b   : > { %v896_v41 = vadd.f32 %v895_v38, %v894_v36 }
 0x57d   : > { %v898_v48 = vadd.f32 %v897_v43, %v896_v41 }
 0x57f   : > { %v899_v49 = vpack.c.bf16 %v898_v48, %v891_v44 }
 0x581   : > { %1967 = vmatmul.mubr.msk.bf16.vlgmr.msra.gmra.mxu1 %vm451_vm0, %v899_v49 }
 0x582   : > { %1982 = vmatprep.mubr.msk.bf16.mxu1 %vm451_vm0, %v1079_v11 }
 0x641   : > { %v953_v52 = vpop.f32.mrf.mxu1 }
 0x642   : > { %v954_v53 = vadd.f32 %v953_v52, %v903_v51 }
 0x643   : > { %v1968_v55 = vpop.f32.mrf.mxu1 }
 0x644   : > { %v2533_v54 = vadd.f32 %v954_v53, %v2369_v0  ;;  %v2091_v0 = vld [vmem:[%s2787_s5 + $0x10] sm:$0xff]  }
 0x645   : > { %v956_v56 = vpop.f32.mrf.mxu1  ;;  %1081 = vrot.lane.b32.xlu1 %v2091_v0, %s2247_s18  ;;  %1973 = vmatpush3.bf16.msra.mxu0 %v2091_v0 }
 0x646   : > { %v957_v57 = vadd.f32 %v956_v56, %v903_v51  ;;  %v962_v58 = vsel %vm451_vm0, %v2533_v54, 0.0 }
 0x647   : > { %963 = vadd.xlane.f32.xlu0 %v962_v58  ;;  %v1969_v59 = vpop.f32.mrf.mxu1 }
 0x648   : > { %v2538_v60 = vadd.f32 %v957_v57, %v2371_v1 }
 0x649   : > { %1088 = vrot.lane.b32.xlu1 %v1022_v13, %s2247_s18 }
 0x64a   : > { %v965_v61 = vsel %vm451_vm0, %v2538_v60, 0.0 }
 0x64b   : > { %966 = vadd.xlane.f32.xlu0 %v965_v61 }
 0x6b7   : > { %v1082_v22 = vpop.permute.xlu1 %1081 }
 0x6bb   : > { %v1089_v43 = vpop.permute.xlu1 %1088 }
 0x6d0   : > { %v964_v1 = vpop.xlane.xlu0 %963 }
 0x6d1   : > { %v968_v62 = vmul.f32 0.03125, %v964_v1 }
 0x6d3   : > { %v970_v63 = vsub.f32 %v2533_v54, %v968_v62 }
 0x6d4   : > { %v967_v2 = vpop.xlane.xlu0 %966 }
 0x6d5   : > { %v969_v3 = vmul.f32 0.03125, %v967_v2  ;;  %v972_v4 = vmul.f32 %v970_v63, %v970_v63 }
 0x6d7   : > { %v971_v5 = vsub.f32 %v2538_v60, %v969_v3  ;;  %v974_v6 = vsel %vm451_vm0, %v972_v4, 0.0 }
 0x6d8   : > { %975 = vadd.xlane.f32.xlu0 %v974_v6 }
 0x6d9   : > { %v973_v7 = vmul.f32 %v971_v5, %v971_v5 }
 0x6db   : > { %v977_v8 = vsel %vm451_vm0, %v973_v7, 0.0 }
 0x6dc   : > { %978 = vadd.xlane.f32.xlu0 %v977_v8 }
 0x6f2   : > { %1083 = vrot.lane.b32.xlu0 %v2090_v39, %s2247_s18 }
 0x761   : > { %v976_v14 = vpop.xlane.xlu0 %975 }
 0x762   : > { %v980_v16 = vmul.f32 0.03125, %v976_v14 }
 0x764   : > { %v982_v17 = vadd.f32 1e-05, %v980_v16 }
 0x765   : > { %v979_v18 = vpop.xlane.xlu0 %978 }
 0x766   : > { %2136 = vrsqrt.f32 %v982_v17  ;;  %v981_v19 = vmul.f32 0.03125, %v979_v18  ;;  %v1010_v17 = vld [vmem:[%s2785_s3] sm:$0xff] }
 0x768   : > { %v983_v20 = vadd.f32 1e-05, %v981_v19 }
 0x769   : > { %v1084_v21 = vpop.permute.xlu0 %1083 }
 0x76a   : > { %2138 = vrsqrt.f32 %v983_v20  ;;  %1978 = vmatprep.subr.bf16.mxu1 %v1084_v21 }
 0x76b   : > { %1979 = vmatpush3.bf16.msra.mxu1 %v1084_v21  ;;  %v1012_v21 = vld [vmem:[%s2785_s3 + $0x10] sm:$0xff] }
 0x76c   : > { %1980 = vmatprep.subr.bf16.mxu1 %v1082_v22 }
 0x76f   : > { %1981 = vmatpush3.bf16.msra.mxu1 %v1082_v22 }
 0x772   : > { %1983 = vmatmul.mubr.msk.bf16.vlgmr.msra.gmra.mxu1 %vm451_vm0, %v1080_v27 }
 0x773   : > { %v2137_v28 = vpop.eup %2136 }
 0x774   : > { %v986_v30 = vmul.f32 %v2137_v28, %v970_v63 }
 0x776   : > { %v992_v33 = vmul.f32 %v991_v29, %v986_v30  ;;  %v1013_v30 = vld [vmem:[%s2785_s3 + $0x18] sm:$0xff] }
 0x777   : > { %v2139_v32 = vpop.eup %2138 }
 0x778   : > { %v987_v34 = vmul.f32 %v2139_v32, %v971_v5  ;;  %v998_v37 = vadd.f32 %v997_v35, %v992_v33 }
 0x77a   : > { %v993_v36 = vmul.f32 %v991_v29, %v987_v34 }
 0x77c   : > { %v999_v38 = vadd.f32 %v997_v35, %v993_v36 }
 0x77e   : > { %v1018_v41 = vpack.c.bf16 %v999_v38, %v998_v37  ;;  %v1014_v38 = vld [vmem:[%s2785_s3 + $0x20] sm:$0xff] }
 0x780   : > { %1975 = vmatmul.mubr.msk.bf16.vlgmr.msra.gmra.mxu0 %vm451_vm0, %v1018_v41 }
 0x832   : > { %v1984_v42 = vpop.f32.mrf.mxu1 }
 0x833   : > { %v1140_v49 = vadd.f32 %v1984_v42, %v1089_v43 }
 0x834   : > { %v1131_v44 = vpop.f32.mrf.mxu1 }
 0x835   : > { %v1132_v53 = vadd.f32 %v1131_v44, %v1089_v43 }
 0x836   : > { %v1985_v48 = vpop.f32.mrf.mxu1 }
 0x837   : > { %v1143_v51 = vadd.f32 %v1985_v48, %v1089_v43 }
 0x838   : > { %v1134_v52 = vpop.f32.mrf.mxu1 }
 0x839   : > { %v2571_v55 = vpack.c.bf16 %v1143_v51, %v1140_v49  ;;  %v1135_v56 = vadd.f32 %v1134_v52, %v1089_v43  ;;  %v1015_v43 = vld [vmem:[%s2785_s3 + $0x28] sm:$0xff]  ;;  %v1016_v52 = vld [vmem:[%s2785_s3 + $0x30] sm:$0xff] }
 0x83b   : > { %v2573_v57 = vpack.c.bf16 %v1135_v56, %v1132_v53  ;;  %2039 = vmatprep.subr.msk.bf16.mxu0 %vm451_vm0, %v2571_v55  ;;  %v1176_v26 = vsel %vm451_vm0, %v2571_v55, 0  ;;  %v1017_v53 = vld [vmem:[%s2785_s3 + $0x38] sm:$0xff] }
 0x83c   : > { %1987 = vmatpush3.bf16.xpose.msra.mxu0 %v1176_v26 }
 0x83d   : > { %2040 = vmatprep.subr.msk.bf16.mxu0 %vm451_vm0, %v2573_v57  ;;  %v1173_v39 = vsel %vm451_vm0, %v2573_v57, 0 }
 0x840   : > { %v1072_v58 = vpop.f32.mrf.mxu0 }
 0x841   : > { %v1073_v59 = vadd.f32 %v1072_v58, %v1022_v13 }
 0x842   : > { %v1976_v61 = vpop.f32.mrf.mxu0 }
 0x843   : > { %v1146_v62 = vmul.f32 %v2415_v45, %v1073_v59  ;;  %v1148_v2 = vmul.f32 %v2420_v46, %v1073_v59  ;;  %v1150_v6 = vmul.f32 %v2425_v47, %v1073_v59  ;;  %v1152_v11 = vmul.f32 %v2430_v50, %v1073_v59 }
 0x844   : > { %v1075_v0 = vpop.f32.mrf.mxu0  ;;  %1989 = vmatpush3.bf16.xpose.msra.mxu0 %v1173_v39 }
 0x845   : > { %v1076_v1 = vadd.f32 %v1075_v0, %v1022_v13  ;;  %2018 = vmatprep.subr.bf16.mxu0 %v2245_v15 }
 0x846   : > { %v1977_v63 = vpop.f32.mrf.mxu0 }
 0x847   : > { %v1147_v3 = vmul.f32 %v2415_v45, %v1076_v1  ;;  %v1149_v4 = vmul.f32 %v2420_v46, %v1076_v1  ;;  %v1151_v5 = vmul.f32 %v2425_v47, %v1076_v1  ;;  %v1153_v10 = vmul.f32 %v2430_v50, %v1076_v1 }
 0x849   : > { %v1155_v7 = vpack.c.bf16 %v1149_v4, %v1148_v2  ;;  %v1154_v8 = vpack.c.bf16 %v1147_v3, %v1146_v62  ;;  %v1156_v9 = vpack.c.bf16 %v1151_v5, %v1150_v6  ;;  %v1157_v13 = vpack.c.bf16 %v1153_v10, %v1152_v11 }
 0x84b   : > { %1990 = vmatprep.mubr.msk.bf16.mxu0 %vm451_vm0, %v1154_v8 }
 0x84c   : > { %1991 = vmatmul.mubr.msk.bf16.vlgmr.msra.gmra.mxu0 %vm451_vm0, %v1155_v7 }
 0x84d   : > { %1994 = vmatprep.mubr.msk.bf16.mxu0 %vm451_vm0, %v1156_v9 }
 0x854   : > { %1995 = vmatmul.mubr.msk.bf16.gmra.mxu0 %vm451_vm0, %v1157_v13 }
 0x855   : > { %2022 = vmatprep.mubr.msk.bf16.mxu0 %vm2246_vm1, %v2245_v15 }
 0x90c   : > { %v1992_v14 = vpop.f32.mrf.mxu0 }
 0x90d   : > { %v1245_v18 = vmul.f32 0.35355338, %v1992_v14 }
 0x90e   : > { %v1212_v16 = vpop.f32.mrf.mxu0 }
 0x90f   : > { %v1243_v19 = vmul.f32 0.35355338, %v1212_v16  ;;  %v1253_v28 = vadd.f32 %v1245_v18, %v1012_v21 }
 0x910   : > { %v1993_v20 = vpop.f32.mrf.mxu0 }
 0x911   : > { %v1251_v50 = vadd.f32 %v1243_v19, %v1010_v17  ;;  %v1246_v25 = vmul.f32 0.35355338, %v1993_v20  ;;  %v1265_v34 = vsel %vm451_vm0, %v1253_v28, -inf }
 0x912   : > { %v1215_v22 = vpop.f32.mrf.mxu0 }
 0x913   : > { %v1244_v27 = vmul.f32 0.35355338, %v1215_v22  ;;  %v1259_v40 = vsel %vm451_vm0, %v1251_v50, -inf  ;;  %v1254_v36 = vadd.f32 %v1246_v25, %v1013_v30 }
 0x914   : > { %1260 = vmax.xlane.f32.xlu1 %v1259_v40  ;;  %v1996_v29 = vpop.f32.mrf.mxu0 }
 0x915   : > { %v1252_v31 = vadd.f32 %v1244_v27, %v1011_v23  ;;  %v1249_v41 = vmul.f32 0.35355338, %v1996_v29  ;;  %v1268_v49 = vsel %vm451_vm0, %v1254_v36, -inf }
 0x916   : > { %v1228_v32 = vpop.f32.mrf.mxu0 }
 0x917   : > { %v1247_v33 = vmul.f32 0.35355338, %v1228_v32  ;;  %v1262_v35 = vsel %vm451_vm0, %v1252_v31, -inf  ;;  %v1257_v59 = vadd.f32 %v1249_v41, %v1016_v52 }
 0x918   : > { %1266 = vmax.xlane.f32.xlu1 %v1265_v34  ;;  %1263 = vmax.xlane.f32.xlu0 %v1262_v35  ;;  %v1997_v37 = vpop.f32.mrf.mxu0 }
 0x919   : > { %v1250_v44 = vmul.f32 0.35355338, %v1997_v37  ;;  %v1255_v51 = vadd.f32 %v1247_v33, %v1014_v38  ;;  %v1277_v39 = vsel %vm451_vm0, %v1257_v59, -inf }
 0x91a   : > { %v1231_v42 = vpop.f32.mrf.mxu0 }
 0x91b   : > { %v1248_v48 = vmul.f32 0.35355338, %v1231_v42  ;;  %v1271_v26 = vsel %vm451_vm0, %v1255_v51, -inf  ;;  %v1258_v61 = vadd.f32 %v1250_v44, %v1017_v53 }
 0x91c   : > { %1269 = vmax.xlane.f32.xlu1 %v1268_v49 }
 0x91d   : > { %v1256_v56 = vadd.f32 %v1248_v48, %v1015_v43  ;;  %v1280_v0 = vsel %vm451_vm0, %v1258_v61, -inf }
 0x91f   : > { %v1274_v58 = vsel %vm451_vm0, %v1256_v56, -inf }
 0x920   : > { %1272 = vmax.xlane.f32.xlu1 %v1271_v26  ;;  %1275 = vmax.xlane.f32.xlu0 %v1274_v58 }
 0x924   : > { %1278 = vmax.xlane.f32.xlu1 %v1277_v39  ;;  %1281 = vmax.xlane.f32.xlu0 %v1280_v0 }
 0x99d   : > { %v1261_v1 = vpop.xlane.xlu1 %1260 }
 0x99e   : > { %v1283_v62 = vsub.f32 %v1251_v50, %v1261_v1 }
 0x9a0   : > { %v1291_v4 = vmul.f32 1.442695, %v1283_v62 }
 0x9a1   : > { %v1267_v63 = vpop.xlane.xlu1 %1266  ;;  %v1264_v2 = vpop.xlane.xlu0 %1263 }
 0x9a2   : > { %v1285_v3 = vsub.f32 %v1253_v28, %v1267_v63  ;;  %v1284_v6 = vsub.f32 %v1252_v31, %v1264_v2 }
 0x9a4   : > { %v1295_v5 = vmul.f32 1.442695, %v1285_v3  ;;  %v1293_v9 = vmul.f32 1.442695, %v1284_v6 }
 0x9a5   : > { %v1270_v7 = vpop.xlane.xlu1 %1269 }
 0x9a6   : > { %2140 = vpow2.f32 %v1295_v5  ;;  %v1286_v8 = vsub.f32 %v1254_v36, %v1270_v7 }
 0x9a7   : > { %2142 = vpow2.f32 %v1291_v4 }
 0x9a8   : > { %v1297_v10 = vmul.f32 1.442695, %v1286_v8 }
 0x9a9   : > { %v1273_v11 = vpop.xlane.xlu1 %1272  ;;  %v1276_v13 = vpop.xlane.xlu0 %1275 }
 0x9aa   : > { %2144 = vpow2.f32 %v1297_v10  ;;  %v1287_v14 = vsub.f32 %v1255_v51, %v1273_v11  ;;  %v1288_v16 = vsub.f32 %v1256_v56, %v1276_v13 }
 0x9ab   : > { %2146 = vpow2.f32 %v1293_v9 }
 0x9ac   : > { %v1299_v21 = vmul.f32 1.442695, %v1287_v14  ;;  %v1301_v23 = vmul.f32 1.442695, %v1288_v16  ;;  %v2092_v14 = vld [vmem:[%s2789_s7 + $0x18] sm:$0xff]   ;;  %v2093_v16 = vld [vmem:[%s2789_s7 + $0x10] sm:$0xff]  }
 0x9ad   : > { %v1279_v17 = vpop.xlane.xlu1 %1278  ;;  %v1282_v18 = vpop.xlane.xlu0 %1281 }
 0x9ae   : > { %v1289_v19 = vsub.f32 %v1257_v59, %v1279_v17  ;;  %v1290_v20 = vsub.f32 %v1258_v61, %v1282_v18 }
 0x9b0   : > { %v1303_v50 = vmul.f32 1.442695, %v1289_v19  ;;  %v1305_v22 = vmul.f32 1.442695, %v1290_v20 }
 0x9b2   : > { %2148 = vpow2.f32 %v1303_v50 }
 0x9b3   : > { %v2141_v25 = vpop.eup %2140  ;;  %2150 = vpow2.f32 %v1305_v22 }
 0x9b4   : > { %2152 = vpow2.f32 %v1299_v21  ;;  %v1313_v27 = vsel %vm451_vm0, %v2141_v25, 0.0  ;;  %v2143_v40 = vpop.eup %2142 }
 0x9b5   : > { %2154 = vpow2.f32 %v1301_v23  ;;  %1314 = vadd.xlane.f32.xlu1 %v1313_v27  ;;  %v1307_v29 = vsel %vm451_vm0, %v2143_v40, 0.0 }
 0x9b7   : > { %v2145_v28 = vpop.eup %2144 }
 0x9b8   : > { %v1316_v30 = vsel %vm451_vm0, %v2145_v28, 0.0  ;;  %v2147_v31 = vpop.eup %2146 }
 0x9b9   : > { %1308 = vadd.xlane.f32.xlu1 %v1307_v29  ;;  %1317 = vadd.xlane.f32.xlu0 %v1316_v30  ;;  %v1310_v32 = vsel %vm451_vm0, %v2147_v31, 0.0 }
 0x9bd   : > { %1311 = vadd.xlane.f32.xlu0 %v1310_v32 }
 0x9bf   : > { %v2149_v33 = vpop.eup %2148 }
 0x9c0   : > { %v2151_v34 = vpop.eup %2150  ;;  %v1325_v35 = vsel %vm451_vm0, %v2149_v33, 0.0 }
 0x9c1   : > { %v2153_v36 = vpop.eup %2152  ;;  %1326 = vadd.xlane.f32.xlu1 %v1325_v35  ;;  %v1328_v37 = vsel %vm451_vm0, %v2151_v34, 0.0 }
 0x9c2   : > { %v2155_v38 = vpop.eup %2154  ;;  %1329 = vadd.xlane.f32.xlu0 %v1328_v37  ;;  %v1319_v41 = vsel %vm451_vm0, %v2153_v36, 0.0 }
 0x9c3   : > { %v1322_v42 = vsel %vm451_vm0, %v2155_v38, 0.0 }
 0x9c5   : > { %1320 = vadd.xlane.f32.xlu1 %v1319_v41 }
 0x9c6   : > { %1323 = vadd.xlane.f32.xlu0 %v1322_v42 }
 0x9d6   : > { %1355 = vrot.lane.b32.xlu1 %v2571_v55, %s2247_s18 }
 0x9dc   : > { %1353 = vrot.lane.b32.xlu0 %v2573_v57, %s2247_s18  ;;  %s2249_s18 = smov [#allocation2]  }
 0x9dd   : > { %s2187_s0 = sshll.u32 %s2249_s18, 4  ;;  %s2188_s0 = int_to_ptr.vmem [resolvable:$false] %s2187_s0 }
 0x9de   : > { %s2189_s19 = scalar_lea.vmem %s2188_s0, 512  ;;  %p2190_p1 = scmp.lt.s32.totalorder %s2739_s17, %s2188_s0 }
 0x9df   : > { %p2191_p2 = scmp.lt.s32.totalorder %s2189_s19, %s2183_s29 }
 0x9e1   : > { %p2192_p3 = por %p2191_p2, %p2190_p1 }
 0x9e3   : > { %p2193_p4 = pnand %p2192_p3, %p2186_p0 }
 0xa3e   : > { %v1315_v43 = vpop.xlane.xlu1 %1314 }
 0xa42   : > { %v1309_v44 = vpop.xlane.xlu1 %1308  ;;  %v1318_v48 = vpop.xlane.xlu0 %1317 }
 0xa43   : > { %2156 = vrcp.f32 %v1309_v44 }
 0xa44   : > { %2158 = vrcp.f32 %v1318_v48 }
 0xa45   : > { %2160 = vrcp.f32 %v1315_v43 }
 0xa46   : > { %v1312_v49 = vpop.xlane.xlu0 %1311 }
 0xa47   : > { %2162 = vrcp.f32 %v1312_v49 }
 0xa4a   : > { %v1327_v51 = vpop.xlane.xlu1 %1326 }
 0xa4b   : > { %v1330_v52 = vpop.xlane.xlu0 %1329  ;;  %2164 = vrcp.f32 %v1327_v51 }
 0xa4c   : > { %2166 = vrcp.f32 %v1330_v52 }
 0xa4e   : > { %v1321_v53 = vpop.xlane.xlu1 %1320 }
 0xa4f   : > { %2168 = vrcp.f32 %v1321_v53  ;;  %v1324_v56 = vpop.xlane.xlu0 %1323  ;;  %v2182_v53 = vld [vmem:[%s2790_s8] sm:$0xff] }
 0xa50   : > { %2170 = vrcp.f32 %v1324_v56  ;;  %v2157_v55 = vpop.eup %2156  ;;  %v1462_v56 = vrot.slane %v2182_v53, %v1021_v12 }
 0xa51   : > { %v2159_v26 = vpop.eup %2158  ;;  %v1339_v39 = vmul.f32 %v2157_v55, %v2143_v40 }
 0xa52   : > { %v1356_v58 = vpop.permute.xlu1 %1355  ;;  %v2161_v57 = vpop.eup %2160  ;;  %v1342_v1 = vmul.f32 %v2159_v26, %v2145_v28 }
 0xa53   : > { %1998 = vmatprep.subr.bf16.mxu1 %v1356_v58  ;;  %v1354_v61 = vpop.permute.xlu0 %1353  ;;  %v1341_v63 = vmul.f32 %v2161_v57, %v2141_v25 }
 0xa54   : > { %v2163_v59 = vpop.eup %2162  ;;  %1999 = vmatpush3.bf16.msra.mxu1 %v1356_v58 }
 0xa55   : > { %2000 = vmatprep.subr.bf16.mxu1 %v1354_v61  ;;  %v1340_v0 = vmul.f32 %v2163_v59, %v2147_v31  ;;  %v1348_v3 = vpack.c.bf16 %v1342_v1, %v1341_v63 }
 0xa57   : > { %v1347_v62 = vpack.c.bf16 %v1340_v0, %v1339_v39 }
 0xa58   : > { %2001 = vmatpush3.bf16.msra.mxu1 %v1354_v61  ;;  %v2165_v2 = vpop.eup %2164 }
 0xa59   : > { %2002 = vmatprep.mubr.msk.bf16.mxu1 %vm451_vm0, %v1347_v62  ;;  %2010 = vmatprep.subr.bf16.mxu1 %v2245_v15  ;;  %v2167_v4 = vpop.eup %2166  ;;  %v1345_v8 = vmul.f32 %v2165_v2, %v2149_v33 }
 0xa5a   : > { %v1346_v9 = vmul.f32 %v2167_v4, %v2151_v34 }
 0xa5b   : > { %2003 = vmatmul.mubr.msk.bf16.vlgmr.msra.gmra.mxu1 %vm451_vm0, %v1348_v3 }
 0xa5c   : > { %v2169_v5 = vpop.eup %2168  ;;  %v1350_v13 = vpack.c.bf16 %v1346_v9, %v1345_v8  ;;  %2011 = vmatpush3.bf16.msra.mxu1 %v2092_v14  ;;  %v2094_v8 = vld [vmem:[%s2792_s10 + $0x8] sm:$0xff]   ;;  %v2095_v9 = vld [vmem:[%s2792_s10] sm:$0xff]  }
 0xa5d   : > { %v2171_v6 = vpop.eup %2170  ;;  %v1343_v7 = vmul.f32 %v2169_v5, %v2153_v36  ;;  %2012 = vmatprep.subr.bf16.mxu1 %v2245_v15  ;;  %2019 = vmatpush3.bf16.msra.mxu0 %v2094_v8 }
 0xa5e   : > { %v1344_v10 = vmul.f32 %v2171_v6, %v2155_v38  ;;  %2020 = vmatprep.subr.bf16.mxu0 %v2245_v15 }
 0xa60   : > { %v1349_v11 = vpack.c.bf16 %v1344_v10, %v1343_v7  ;;  %2013 = vmatpush3.bf16.msra.mxu1 %v2093_v16 }
 0xa61   : > { %2026 = vmatprep.subr.bf16.mxu1 %v2245_v15  ;;  %2021 = vmatpush3.bf16.msra.mxu0 %v2095_v9 }
 0xa62   : > { %2006 = vmatprep.mubr.msk.bf16.mxu1 %vm451_vm0, %v1349_v11 }
 0xa63   : > { %2007 = vmatmul.mubr.msk.bf16.gmra.mxu1 %vm451_vm0, %v1350_v13 }
 0xa64   : > { %2014 = vmatprep.mubr.msk.bf16.mxu1 %vm2246_vm1, %v2245_v15 }
 0xb1b   : > { %v2004_v17 = vpop.f32.mrf.mxu1 }
 0xb1c   : > { %v1438_v22 = vmul.f32 %v2004_v17, %v2420_v46 }
 0xb1d   : > { %v1405_v18 = vpop.f32.mrf.mxu1 }
 0xb1e   : > { %v1436_v21 = vmul.f32 %v2415_v45, %v1405_v18  ;;  %v1445_v30 = vsel %vm451_vm0, %v1438_v22, 0.0  ;;  %v1549_v18 = vsub.s32 6, %v2391_v24 }
 0xb1f   : > { %v2005_v19 = vpop.f32.mrf.mxu1 }
 0xb20   : > { %v1444_v27 = vsel %vm451_vm0, %v1436_v21, 0.0  ;;  %v1439_v40 = vmul.f32 %v2005_v19, %v2420_v46  ;;  %v2181_v46 = vld [vmem:[%s2786_s4 + $0x2] ss:$0 sm:$0xff]  ;;  %v1555_v21 = vsub.s32 7, %v2391_v24  ;;  %v2097_v24 = vld [vmem:[%s2793_s11 + $0x10] sm:$0xff]  }
 0xb21   : > { %v1408_v20 = vpop.f32.mrf.mxu1  ;;  %v1446_v33 = vadd.f32 %v1445_v30, %v1444_v27 }
 0xb22   : > { %v1437_v23 = vmul.f32 %v2415_v45, %v1408_v20  ;;  %v1452_v35 = vsel %vm451_vm0, %v1439_v40, 0.0  ;;  %v2180_v45 = vld [vmem:[%s2786_s4 + $0x3] ss:$0 sm:$0xff]  ;;  %v1550_v20 = vrot.slane %v2182_v53, %v1549_v18 }
 0xb23   : > { %v2008_v50 = vpop.f32.mrf.mxu1 }
 0xb24   : > { %v1451_v31 = vsel %vm451_vm0, %v1437_v23, 0.0  ;;  %v1442_v36 = vmul.f32 %v2180_v45, %v2008_v50  ;;  %v1556_v23 = vrot.slane %v2182_v53, %v1555_v21 }
 0xb25   : > { %v1421_v25 = vpop.f32.mrf.mxu1  ;;  %v1453_v38 = vadd.f32 %v1452_v35, %v1451_v31  ;;  %v2096_v31 = vld [vmem:[%s2793_s11 + $0x18] sm:$0xff]  }
 0xb26   : > { %v1440_v28 = vmul.f32 %v2425_v47, %v1421_v25  ;;  %v1449_v44 = vsel %vm451_vm0, %v1442_v36, 0.0 }
 0xb27   : > { %v2009_v29 = vpop.f32.mrf.mxu1 }
 0xb28   : > { %v1447_v32 = vsel %vm451_vm0, %v1440_v28, 0.0  ;;  %v1443_v37 = vmul.f32 %v2180_v45, %v2009_v29 }
 0xb29   : > { %v1424_v34 = vpop.f32.mrf.mxu1  ;;  %v1448_v41 = vadd.f32 %v1447_v32, %v1446_v33  ;;  %v2098_v32 = vld [vmem:[%s2793_s11 + $0x8] sm:$0xff]   ;;  %v2099_v33 = vld [vmem:[%s2793_s11] sm:$0xff]  }
 0xb2a   : > { %v1441_v47 = vmul.f32 %v2181_v46, %v1424_v34  ;;  %v1456_v48 = vsel %vm451_vm0, %v1443_v37, 0.0  ;;  %v1872_v34 = vld [vmem:[%s2791_s9] ss:$0 sm:$0xff] }
 0xb2b   : > { %v1450_v49 = vadd.f32 %v1449_v44, %v1448_v41 }
 0xb2c   : > { %v1454_v42 = vsel %vm451_vm0, %v1441_v47, 0.0 }
 0xb2d   : > { %v1455_v43 = vadd.f32 %v1454_v42, %v1453_v38 }
 0xb2f   : > { %v1457_v51 = vadd.f32 %v1456_v48, %v1455_v43 }
 0xb31   : > { %v1458_v52 = vpack.c.bf16 %v1457_v51, %v1450_v49 }
 0xb33   : > { %2015 = vmatmul.mubr.msk.bf16.vlgmr.msra.gmra.mxu1 %vm451_vm0, %v1458_v52 }
 0xb34   : > { %2034 = vmatprep.mubr.msk.bf16.mxu1 %vm2246_vm1, %v2245_v15  ;;  %2027 = vmatpush3.bf16.msra.mxu1 %v2096_v31 }
 0xb35   : > { %2028 = vmatprep.subr.bf16.mxu1 %v2245_v15 }
 0xb38   : > { %2029 = vmatpush3.bf16.msra.mxu1 %v2097_v24 }
 0xb39   : > { %2030 = vmatprep.subr.bf16.mxu1 %v2245_v15 }
 0xb3c   : > { %2031 = vmatpush3.bf16.msra.mxu1 %v2098_v32 }
 0xb3d   : > { %2032 = vmatprep.subr.bf16.mxu1 %v2245_v15 }
 0xb40   : > { %2033 = vmatpush3.bf16.msra.mxu1 %v2099_v33 }
 0xbf3   : > { %v1512_v55 = vpop.f32.mrf.mxu1 }
 0xbf4   : > { %v1513_v26 = vadd.f32 %v1512_v55, %v1462_v56 }
 0xbf5   : > { %v2016_v58 = vpop.f32.mrf.mxu1 }
 0xbf6   : > { %v2685_v57 = vadd.f32 %v1513_v26, %v2533_v54 }
 0xbf7   : > { %v1515_v59 = vpop.f32.mrf.mxu1 }
 0xbf8   : > { %v1516_v61 = vadd.f32 %v1515_v59, %v1462_v56  ;;  %v1521_v39 = vsel %vm451_vm0, %v2685_v57, 0.0 }
 0xbf9   : > { %1522 = vadd.xlane.f32.xlu1 %v1521_v39  ;;  %v2017_v0 = vpop.f32.mrf.mxu1 }
 0xbfa   : > { %v2690_v1 = vadd.f32 %v1516_v61, %v2538_v60 }
 0xbfc   : > { %v1524_v62 = vsel %vm451_vm0, %v2690_v1, 0.0 }
 0xbfd   : > { %1525 = vadd.xlane.f32.xlu0 %v1524_v62  ;;  %v1881_v62 = vld [vmem:[%s2790_s8 + $0x8] ss:$0 sm:$0xff] }
 0xc82   : > { %v1523_v12 = vpop.xlane.xlu1 %1522 }
 0xc83   : > { %v1527_v63 = vmul.f32 0.03125, %v1523_v12 }
 0xc85   : > { %v1529_v2 = vsub.f32 %v2685_v57, %v1527_v63 }
 0xc86   : > { %v1526_v54 = vpop.xlane.xlu0 %1525 }
 0xc87   : > { %v1528_v3 = vmul.f32 0.03125, %v1526_v54  ;;  %v1531_v4 = vmul.f32 %v1529_v2, %v1529_v2 }
 0xc89   : > { %v1530_v5 = vsub.f32 %v2690_v1, %v1528_v3  ;;  %v1533_v6 = vsel %vm451_vm0, %v1531_v4, 0.0 }
 0xc8a   : > { %1534 = vadd.xlane.f32.xlu1 %v1533_v6 }
 0xc8b   : > { %v1532_v7 = vmul.f32 %v1530_v5, %v1530_v5 }
 0xc8d   : > { %v1536_v60 = vsel %vm451_vm0, %v1532_v7, 0.0 }
 0xc8e   : > { %1537 = vadd.xlane.f32.xlu0 %v1536_v60 }
 0xd13   : > { %v1535_v10 = vpop.xlane.xlu1 %1534 }
 0xd14   : > { %v1539_v11 = vmul.f32 0.03125, %v1535_v10 }
 0xd16   : > { %v1541_v13 = vadd.f32 1e-05, %v1539_v11 }
 0xd17   : > { %v1538_v14 = vpop.xlane.xlu0 %1537 }
 0xd18   : > { %2172 = vrsqrt.f32 %v1541_v13  ;;  %v1540_v16 = vmul.f32 0.03125, %v1538_v14 }
 0xd1a   : > { %v1542_v17 = vadd.f32 1e-05, %v1540_v16 }
 0xd1c   : > { %2174 = vrsqrt.f32 %v1542_v17 }
 0xd25   : > { %v2173_v19 = vpop.eup %2172 }
 0xd26   : > { %v1545_v50 = vmul.f32 %v2173_v19, %v1529_v2 }
 0xd28   : > { %v1551_v25 = vmul.f32 %v1550_v20, %v1545_v50 }
 0xd29   : > { %v2175_v22 = vpop.eup %2174 }
 0xd2a   : > { %v1546_v27 = vmul.f32 %v2175_v22, %v1530_v5  ;;  %v1557_v28 = vadd.f32 %v1556_v23, %v1551_v25 }
 0xd2c   : > { %v1552_v40 = vmul.f32 %v1550_v20, %v1546_v27 }
 0xd2e   : > { %v1558_v29 = vadd.f32 %v1556_v23, %v1552_v40 }
 0xd30   : > { %v1559_v30 = vpack.c.bf16 %v1558_v29, %v1557_v28 }
 0xd32   : > { %2023 = vmatmul.mubr.msk.bf16.vlgmr.msra.gmra.mxu0 %vm451_vm0, %v1559_v30 }
 0xdf2   : > { %v1620_v35 = vpop.f32.mrf.mxu0 }
 0xdf3   : > { %v1621_v45 = vadd.f32 %v1872_v34, %v1620_v35 }
 0xdf4   : > { %v2024_v36 = vpop.f32.mrf.mxu0 }
 0xdf5   : > { %v1627_v37 = vmul.f32 %v1621_v45, %v1621_v45 }
 0xdf6   : > { %v1623_v46 = vpop.f32.mrf.mxu0 }
 0xdf7   : > { %v1629_v47 = vmul.f32 %v1627_v37, %v1621_v45  ;;  %v1624_v38 = vadd.f32 %v1872_v34, %v1623_v46 }
 0xdf8   : > { %v2025_v41 = vpop.f32.mrf.mxu0 }
 0xdf9   : > { %v1631_v42 = vmul.f32 0.044715, %v1629_v47  ;;  %v1628_v43 = vmul.f32 %v1624_v38, %v1624_v38 }
 0xdfb   : > { %v1633_v15 = vadd.f32 %v1631_v42, %v1621_v45  ;;  %v1630_v44 = vmul.f32 %v1628_v43, %v1624_v38 }
 0xdfd   : > { %v1635_v48 = vmul.f32 0.7978846, %v1633_v15  ;;  %v1632_v49 = vmul.f32 0.044715, %v1630_v44 }
 0xdff   : > { %2176 = vtanh.f32 %v1635_v48  ;;  %v1634_v51 = vadd.f32 %v1632_v49, %v1624_v38 }
 0xe01   : > { %v1636_v52 = vmul.f32 0.7978846, %v1634_v51 }
 0xe03   : > { %2178 = vtanh.f32 %v1636_v52 }
 0xe0c   : > { %v2177_v53 = vpop.eup %2176 }
 0xe0d   : > { %v1639_v56 = vadd.f32 1.0, %v2177_v53 }
 0xe0f   : > { %v1641_v26 = vmul.f32 0.5, %v1639_v56 }
 0xe10   : > { %v2179_v55 = vpop.eup %2178 }
 0xe11   : > { %v1640_v58 = vadd.f32 1.0, %v2179_v55  ;;  %v1643_v61 = vmul.f32 %v1641_v26, %v1621_v45 }
 0xe13   : > { %v1642_v59 = vmul.f32 0.5, %v1640_v58 }
 0xe15   : > { %v1644_v39 = vmul.f32 %v1642_v59, %v1624_v38 }
 0xe17   : > { %v1645_v0 = vpack.c.bf16 %v1644_v39, %v1643_v61 }
 0xe19   : > { %2035 = vmatmul.mubr.msk.bf16.vlgmr.msra.gmra.mxu1 %vm1678_vm3, %v1645_v0 }
 0xed9   : > { %v1716_v12 = vpop.f32.mrf.mxu1 }
 0xeda   : > { %v1723_v63 = vadd.f32 %v1716_v12, %v2685_v57 }
 0xedb   : > { %v2036_v2 = vpop.f32.mrf.mxu1 }
 0xedc   : > { %v1729_v54 = vadd.f32 %v1881_v62, %v1723_v63 }
 0xedd   : > { %v1719_v3 = vpop.f32.mrf.mxu1 }
 0xede   : > { %1731 = vst.msk [vmem:[%s423_s16] sm:$0xff] %vm451_vm0, %v1729_v54  ;;  %v1724_v4 = vadd.f32 %v1719_v3, %v2690_v1 }
 0xedf   : > { %v2037_v5 = vpop.f32.mrf.mxu1 }
 0xee0   : > { %v1730_v57 = vadd.f32 %v1881_v62, %v1724_v4 }
 0xee2   : > { %1732 = vst.msk [vmem:[%s423_s16 + $0x8] sm:$0xff] %vm451_vm0, %v1730_v57 }
 0xee3   : > { %2196 = shalt.err (!%p2193_p4)
}
 0xee4   : > { %s2197_s28 = scalar_lea.hbm %s2737_s15, 256  ;;  %s2201_s26 = scalar_lea.hbm %s2794_s12, 512 }
 0xee5   : > { %p2198_p7 = scmp.ne.s32.totalorder %s2737_s15, %s2197_s28  ;;  %p2202_p10 = scmp.lt.s32.totalorder %s2737_s15, %s2794_s12 }
 0xee6   : > { %p2203_p11 = scmp.lt.s32.totalorder %s2201_s26, %s2197_s28 }
 0xee7   : > { %p2199_p8 = pnand %p2198_p7, %p2355_p5 }
 0xee8   : > { %p2204_p12 = por %p2203_p11, %p2202_p10 }
 0xee9   : > { %p2200_p9 = pneg %p2199_p8 }
 0xeeb   : > { %p2205_p13 = pnand %p2204_p12, %p2200_p9 }
 0xeed   : > { %2208 = shalt.err (!%p2205_p13)
}
 0xeee   : > { %s2250_s0 = smov 128   ;;  %s2251_s29 = smov 8  }
 0xeef   : > { %2041 = dma.vmem_to_hbm [thread:$0]  (%p2355_p5), %s2739_s17, 256, %s2737_s15, %s2742_s25, %s2250_s0, %s2250_s0, %s2251_s29  }
 0xef0 PF: > { %p2047_p0 = scmp.ge.s32.totalorder %s2243_s24, 2  ;;  %s1762_s19 = sand.u32 1, %s2231_s21  }
 0xef1   : > { %s1763_s1 = scalar_lea.sflag [#allocation3], %s1762_s19 }
 0xef2   : > { %p2044_p1 = pnand %p2047_p0, %p2359_p6 }
 0xef4   : > { %p2045_p2 = pneg %p2044_p1 }
 0xef6   : > { %2226 = dma.done.wait (%p2045_p2), %s1763_s1, 256  }
 0xef7   : > { %2228 = vsyncadd (%p2045_p2), %s1763_s1, 4294967040  ;;  %p22_p3 = scmp.ge.s32.totalorder %s2342_s27, 4   ;;  %s2801_s21 = smov %s2235_s22 }
 0xef8   : > { %s2802_s22 = smov %s2239_s23  ;;  %s2803_s23 = smov %s2353_s30 }
 0xef9   : > { %s2804_s24 = smov %s2342_s27  ;;  %24 = sbr.rel (!%p22_p3) target bundleno = 6 (0x6), region = 108 }
 0xefe   :  { %1768 = vsyncpa [#allocation3], 1 }
 0xeff   :  { %1770 = vsyncpa [#allocation3 + $0x1], 1 }

// kernel: tpu_custom_call.1
= control target key start
LH: loop header
LB: loop body
LE: loop exit
PB: predicated region body
PF: predicated region fallthrough
CT: control target
= control target key end

     0   :  { %s2782_s0 = inlined_call_operand.vmem [shape: f32[32,32], index: 0, kind: input, shape index: {}]   ;;  %s2783_s1 = inlined_call_operand.vmem [shape: f32[64,32], index: 1, kind: input, shape index: {}]   ;;  %s2784_s2 = inlined_call_operand.vmem [shape: f32[64,16], index: 2, kind: input, shape index: {}]   ;;  %s2785_s3 = inlined_call_operand.vmem [shape: f32[64,32], index: 3, kind: input, shape index: {}]   ;;  %s2786_s4 = inlined_call_operand.vmem [shape: f32[4,1,32], index: 4, kind: input, shape index: {}]   ;;  %s2787_s5 = inlined_call_operand.vmem [shape: bf16[2,32,96], index: 5, kind: input, shape index: {}]   ;;  %s2788_s6 = inlined_call_operand.vmem [shape: f32[2,96], index: 6, kind: input, shape index: {}]   ;;  %s2789_s7 = inlined_call_operand.vmem [shape: bf16[2,32,32], index: 7, kind: input, shape index: {}]   ;;  %s2790_s8 = inlined_call_operand.vmem [shape: f32[9,32], index: 8, kind: input, shape index: {}]   ;;  %s2791_s9 = inlined_call_operand.vmem [shape: f32[1,64], index: 9, kind: input, shape index: {}]   ;;  %s2792_s10 = inlined_call_operand.vmem [shape: bf16[32,64], index: 10, kind: input, shape index: {}]   ;;  %s2793_s11 = inlined_call_operand.vmem [shape: bf16[64,32], index: 11, kind: input, shape index: {}]   ;;  %s2794_s12 = inlined_call_operand.hbm [shape: f32[32,32], index: 12, kind: output, shape index: {}]  }
   0x1   :  { %2795 = sst [smem:[#allocation5_spill]] %s2782_s0 }
   0x2   :  { %2796 = sst [smem:[#allocation6_spill]] %s2783_s1 }
   0x3   :  { %17 = vsyncpa [#allocation3], 0 }
   0x4   :  { %19 = vsyncpa [#allocation3 + $0x1], 0  ;;  %s2317_s21 = smov 0   ;;  %s2319_s22 = smov 0  }
   0x5   :  { %s2321_s23 = smov 0   ;;  %s2323_s24 = smov 0  }
   0x6 LB: > { %s2338_s25 = sadd.s32 4294967295, %s2243_s24   ;;  %s1821_s26 = sadd.s32 4294967294, %s2243_s24   ;;  %s2243_s24 = sphi %s2323_s24, %s2804_s24   ;;  %s2239_s23 = sphi %s2321_s23, %s2803_s23   ;;  %s2235_s22 = sphi %s2319_s22, %s2802_s22   ;;  %s2231_s21 = sphi %s2317_s21, %s2801_s21  }
   0x7   : > { %s2342_s27 = sadd.s32 1, %s2243_s24   ;;  %s294_s28 = sadd.s32 1, %s2239_s23 }
   0x8   : > { %s291_s29 = ssub.s32 %s2243_s24, %s2342_s27  ;;  %p304_p0 = scmp.ne.s32.totalorder %s2239_s23, %s2235_s22 }
   0x9   : > { %p292_p1 = scmp.eq.s32.totalorder %s291_s29, 0  ;;  %p305_p2 = scmp.eq.s32.totalorder %s2338_s25, 1 }
   0xa   : > { %p310_p3 = scmp.ne.s32.totalorder %s2235_s22, %s2231_s21  ;;  %p311_p4 = scmp.eq.s32.totalorder %s1821_s26, 1 }
   0xb   : > { %s2353_s30 = scalar_select %p292_p1, %s2239_s23, %s294_s28  }
   0xc   : > { %p2355_p5 = por %p305_p2, %p304_p0  ;;  %p2359_p6 = por %p311_p4, %p310_p3 }
   0xd   : > { %p1824_p7 = scmp.ge.s32.totalorder %s2243_s24, 1  ;;  %p377_p8 = scmp.lt.s32.totalorder %s2243_s24, 3 }
   0xf   : > { %p378_p9 = pnand %p1824_p7, %p377_p8 }
  0x10   : > { %s1826_s15 = sshll.u32 (!%p378_p9), %s2338_s25, 1  ;;  %s2799_s0 = sld [smem:[#allocation5_spill]] (!%p378_p9) }
  0x11   : > { %381 = sbr.rel (%p378_p9) target bundleno = 3824 (0xef0), region = 68  ;;  %p425_p10 = scmp.lt.s32.totalorder (!%p378_p9), %s1826_s15, 3 }
  0x12   : > { %s2247_s18 = smov (!%p378_p9), 96   ;;  %s1828_s20 = sshll.u32 (!%p378_p9), %s2338_s25, 2 }
  0x13   : > { %p431_p11 = scmp.lt.s32.totalorder (!%p378_p9), %s1828_s20, 7  ;;  %s2800_s1 = sld [smem:[#allocation6_spill]] (!%p378_p9) }
  0x14   : > { %s421_s28 = sand.u32 (!%p378_p9), 1, %s2235_s22  }
  0x15   : > { %s1825_s29 = sshll.u32 (!%p378_p9), %s421_s28, 4 }
  0x16   : > { %s2806_s15 = smov (!%p425_p10, %s1826_s15), 3  ;;  %vm451_vm0 = vcmask 261120   ;;  %v2086_v14 = vld [vmem:[%s2787_s5 + $0x8] sm:$0xff]   ;;  %v2245_v15 = vmov 0.0   ;;  %vm2246_vm1 = vmmov 0   ;;  %v2087_v16 = vld [vmem:[%s2787_s5] sm:$0xff]   ;;  %v479_v23 = vlaneseq }
  0x17   : > { %s1827_s16 = sshll.u32 %s2806_s15, 3  ;;  %1934 = vmatprep.subr.bf16.mxu0 %v2245_v15  ;;  %1938 = vmatprep.mubr.msk.bf16.mxu0 %vm2246_vm1, %v2245_v15  ;;  %v2397_v26 = vld [vmem:[%s2790_s8] sm:$0xff]  ;;  %vm704_vm2 = vcmask 130048   ;;  %s2808_s20 = smov (!%p431_p11, %s1828_s20), 7  ;;  %vm1678_vm3 = vcmask 523264  }
  0x18   : > { %s428_s19 = scalar_lea.vmem %s2799_s0, %s1827_s16  ;;  %1935 = vmatpush3.bf16.msra.mxu0 %v2086_v14  ;;  %v2391_v24 = vshrl.u32 %v479_v23, 7  ;;  %v2407_v40 = vld [vmem:[%s2788_s6] sm:$0x3]  ;;  %v2425_v47 = vld [vmem:[%s2786_s4 + $0x2] ss:$0 sm:$0xff]  ;;  %s1829_s26 = sshll.u32 %s2808_s20, 3 }
  0x19   : > { %v2369_v0 = vld [vmem:[%s428_s19] sm:$0xff]  ;;  %v2371_v1 = vld [vmem:[%s428_s19 + $0x8] sm:$0xff]  ;;  %1936 = vmatprep.subr.bf16.mxu0 %v2245_v15  ;;  %s2248_s19 = smov 64   ;;  %s434_s15 = scalar_lea.vmem %s2800_s1, %s1829_s26 }
  0x1a   : > { %v452_v2 = vsel %vm451_vm0, %v2369_v0, 0.0  ;;  %v455_v3 = vsel %vm451_vm0, %v2371_v1, 0.0  ;;  %v481_v25 = vsub.s32 2, %v2391_v24  ;;  %v487_v30 = vsub.s32 3, %v2391_v24  ;;  %v2415_v45 = vld [vmem:[%s2786_s4] ss:$0 sm:$0xff] }
  0x1b   : > { %453 = vadd.xlane.f32.xlu0 %v452_v2  ;;  %v510_v39 = vsub.s32 0, %v2391_v24  ;;  %v2420_v46 = vld [vmem:[%s2786_s4 + $0x1] ss:$0 sm:$0xff]  ;;  %v2430_v50 = vld [vmem:[%s2786_s4 + $0x3] ss:$0 sm:$0xff]  ;;  %s423_s16 = scalar_lea.vmem [#allocation2], %s1825_s29 }
  0x1c   : > { %1937 = vmatpush3.bf16.msra.mxu0 %v2087_v16  ;;  %v482_v29 = vrot.slane %v2397_v26, %v481_v25  ;;  %v488_v34 = vrot.slane %v2397_v26, %v487_v30  ;;  %s1747_s17 = sshll.u32 %s423_s16, 4  ;;  %s2739_s17 = int_to_ptr.vmem [resolvable:$true] %s1747_s17 }
  0x1d   : > { %v511_v41 = vrot.slane %v2407_v40, %v510_v39  ;;  %s2183_s29 = scalar_lea.vmem %s2739_s17, 256 }
  0x1e   : > { %p2184_p12 = scmp.ne.s32.totalorder %s2739_s17, %s2183_s29 }
  0x1f   : > { %456 = vadd.xlane.f32.xlu0 %v455_v3 }
  0x20   : > { %p2185_p13 = pnand %p2184_p12, %p2355_p5 }
  0x22   : > { %p2186_p0 = pneg %p2185_p13 }
  0xa4   : > { %v454_v4 = vpop.xlane.xlu0 %453 }
  0xa5   : > { %v459_v5 = vmul.f32 0.03125, %v454_v4 }
  0xa7   : > { %v461_v6 = vsub.f32 %v2369_v0, %v459_v5 }
  0xa8   : > { %v457_v7 = vpop.xlane.xlu0 %456 }
  0xa9   : > { %v460_v8 = vmul.f32 0.03125, %v457_v7  ;;  %v463_v9 = vmul.f32 %v461_v6, %v461_v6 }
  0xab   : > { %v462_v10 = vsub.f32 %v2371_v1, %v460_v8  ;;  %v465_v11 = vsel %vm451_vm0, %v463_v9, 0.0  ;;  %v499_v9 = vld [vmem:[%s2784_s2] sm:$0xff] }
  0xac   : > { %466 = vadd.xlane.f32.xlu1 %v465_v11 }
  0xad   : > { %v464_v12 = vmul.f32 %v462_v10, %v462_v10 }
  0xaf   : > { %v468_v13 = vsel %vm451_vm0, %v464_v12, 0.0 }
  0xb0   : > { %469 = vadd.xlane.f32.xlu1 %v468_v13 }
 0x135   : > { %v467_v17 = vpop.xlane.xlu1 %466 }
 0x136   : > { %v471_v18 = vmul.f32 0.03125, %v467_v17 }
 0x138   : > { %v473_v19 = vadd.f32 1e-05, %v471_v18  ;;  %v502_v18 = vld [vmem:[%s2784_s2 + $0x18] sm:$0xff] }
 0x139   : > { %v470_v20 = vpop.xlane.xlu1 %469 }
 0x13a   : > { %2100 = vrsqrt.f32 %v473_v19  ;;  %v472_v21 = vmul.f32 0.03125, %v470_v20  ;;  %v505_v20 = vld [vmem:[%s2784_s2 + $0x30] sm:$0xff] }
 0x13c   : > { %v474_v22 = vadd.f32 1e-05, %v472_v21 }
 0x13e   : > { %2102 = vrsqrt.f32 %v474_v22 }
 0x147   : > { %v2101_v27 = vpop.eup %2100 }
 0x148   : > { %v477_v28 = vmul.f32 %v2101_v27, %v461_v6  ;;  %v501_v6 = vld [vmem:[%s2784_s2 + $0x10] sm:$0xff] }
 0x14a   : > { %v483_v33 = vmul.f32 %v482_v29, %v477_v28  ;;  %v500_v28 = vld [vmem:[%s2784_s2 + $0x8] sm:$0xff] }
 0x14b   : > { %v2103_v31 = vpop.eup %2102 }
 0x14c   : > { %v478_v32 = vmul.f32 %v2103_v31, %v462_v10  ;;  %v489_v36 = vadd.f32 %v488_v34, %v483_v33 }
 0x14e   : > { %v484_v35 = vmul.f32 %v482_v29, %v478_v32 }
 0x150   : > { %v490_v37 = vadd.f32 %v488_v34, %v484_v35 }
 0x152   : > { %v507_v38 = vpack.c.bf16 %v490_v37, %v489_v36  ;;  %v503_v36 = vld [vmem:[%s2784_s2 + $0x20] sm:$0xff] }
 0x154   : > { %1939 = vmatmul.mubr.msk.bf16.vlgmr.msra.gmra.mxu0 %vm451_vm0, %v507_v38 }
 0x214   : > { %v561_v42 = vpop.f32.mrf.mxu0 }
 0x215   : > { %v562_v43 = vadd.f32 %v561_v42, %v511_v41  ;;  %v504_v42 = vld [vmem:[%s2784_s2 + $0x28] sm:$0xff] }
 0x216   : > { %v1940_v44 = vpop.f32.mrf.mxu0 }
 0x217   : > { %v592_v52 = vmul.f32 %v2415_v45, %v562_v43  ;;  %v594_v53 = vmul.f32 %v2420_v46, %v562_v43  ;;  %v596_v54 = vmul.f32 %v2425_v47, %v562_v43  ;;  %v598_v59 = vmul.f32 %v2430_v50, %v562_v43 }
 0x218   : > { %v564_v48 = vpop.f32.mrf.mxu0 }
 0x219   : > { %v565_v49 = vadd.f32 %v564_v48, %v511_v41 }
 0x21a   : > { %v1941_v51 = vpop.f32.mrf.mxu0 }
 0x21b   : > { %v2435_v55 = vpack.c.bf16 %v565_v49, %v562_v43  ;;  %v593_v56 = vmul.f32 %v2415_v45, %v565_v49  ;;  %v595_v57 = vmul.f32 %v2420_v46, %v565_v49  ;;  %v597_v58 = vmul.f32 %v2425_v47, %v565_v49 }
 0x21c   : > { %v599_v60 = vmul.f32 %v2430_v50, %v565_v49  ;;  %v506_v49 = vld [vmem:[%s2784_s2 + $0x38] sm:$0xff] }
 0x21d   : > { %606 = vrot.lane.b32.xlu0 %v2435_v55, %s2247_s18  ;;  %v600_v61 = vpack.c.bf16 %v593_v56, %v592_v52  ;;  %v601_v62 = vpack.c.bf16 %v595_v57, %v594_v53  ;;  %v602_v63 = vpack.c.bf16 %v597_v58, %v596_v54 }
 0x21e   : > { %v603_v2 = vpack.c.bf16 %v599_v60, %v598_v59 }
 0x21f   : > { %1944 = vmatprep.mubr.msk.bf16.mxu1 %vm451_vm0, %v600_v61 }
 0x28f   : > { %v607_v3 = vpop.permute.xlu0 %606 }
 0x290   : > { %2038 = vmatprep.subr.msk.bf16.mxu1 %vm451_vm0, %v607_v3  ;;  %v621_v4 = vsel %vm451_vm0, %v607_v3, 0 }
 0x291   : > { %1943 = vmatpush3.bf16.xpose.msra.mxu1 %v621_v4 }
 0x292   : > { %1962 = vmatprep.subr.bf16.mxu1 %v2245_v15 }
 0x298   : > { %1945 = vmatmul.mubr.msk.bf16.vlgmr.msra.gmra.mxu1 %vm451_vm0, %v601_v62 }
 0x299   : > { %1948 = vmatprep.mubr.msk.bf16.mxu1 %vm451_vm0, %v602_v63 }
 0x2a0   : > { %1949 = vmatmul.mubr.msk.bf16.gmra.mxu1 %vm451_vm0, %v603_v2 }
 0x2a1   : > { %1966 = vmatprep.mubr.msk.bf16.mxu1 %vm2246_vm1, %v2245_v15 }
 0x358   : > { %v1946_v5 = vpop.f32.mrf.mxu1 }
 0x359   : > { %v690_v7 = vmul.f32 0.35355338, %v1946_v5 }
 0x35a   : > { %v657_v8 = vpop.f32.mrf.mxu1 }
 0x35b   : > { %v688_v10 = vmul.f32 0.35355338, %v657_v8  ;;  %v698_v11 = vadd.f32 %v690_v7, %v501_v6 }
 0x35c   : > { %v1947_v12 = vpop.f32.mrf.mxu1 }
 0x35d   : > { %v691_v13 = vmul.f32 0.35355338, %v1947_v12  ;;  %v711_v14 = vsel %vm704_vm2, %v698_v11, -inf  ;;  %v696_v16 = vadd.f32 %v688_v10, %v499_v9 }
 0x35e   : > { %712 = vmax.xlane.f32.xlu1 %v711_v14  ;;  %v660_v17 = vpop.f32.mrf.mxu1 }
 0x35f   : > { %v689_v21 = vmul.f32 0.35355338, %v660_v17  ;;  %v705_v23 = vsel %vm704_vm2, %v696_v16, -inf  ;;  %v699_v25 = vadd.f32 %v691_v13, %v502_v18 }
 0x360   : > { %v1950_v19 = vpop.f32.mrf.mxu1 }
 0x361   : > { %v694_v22 = vmul.f32 0.35355338, %v1950_v19  ;;  %v714_v32 = vsel %vm704_vm2, %v699_v25, -inf  ;;  %v697_v34 = vadd.f32 %v689_v21, %v500_v28 }
 0x362   : > { %706 = vmax.xlane.f32.xlu1 %v705_v23  ;;  %v673_v27 = vpop.f32.mrf.mxu1 }
 0x363   : > { %v702_v29 = vadd.f32 %v694_v22, %v505_v20  ;;  %v692_v31 = vmul.f32 0.35355338, %v673_v27  ;;  %v708_v38 = vsel %vm704_vm2, %v697_v34, -inf }
 0x364   : > { %v1951_v30 = vpop.f32.mrf.mxu1 }
 0x365   : > { %v723_v33 = vsel %vm704_vm2, %v702_v29, -inf  ;;  %v700_v41 = vadd.f32 %v692_v31, %v503_v36  ;;  %v695_v43 = vmul.f32 0.35355338, %v1951_v30 }
 0x366   : > { %715 = vmax.xlane.f32.xlu1 %v714_v32  ;;  %724 = vmax.xlane.f32.xlu0 %v723_v33  ;;  %v676_v35 = vpop.f32.mrf.mxu1 }
 0x367   : > { %v693_v37 = vmul.f32 0.35355338, %v676_v35  ;;  %v717_v44 = vsel %vm704_vm2, %v700_v41, -inf  ;;  %v703_v52 = vadd.f32 %v695_v43, %v506_v49 }
 0x369   : > { %v701_v48 = vadd.f32 %v693_v37, %v504_v42  ;;  %v726_v53 = vsel %vm704_vm2, %v703_v52, -inf }
 0x36a   : > { %709 = vmax.xlane.f32.xlu1 %v708_v38 }
 0x36b   : > { %v720_v51 = vsel %vm704_vm2, %v701_v48, -inf }
 0x36e   : > { %718 = vmax.xlane.f32.xlu1 %v717_v44 }
 0x372   : > { %721 = vmax.xlane.f32.xlu1 %v720_v51 }
 0x376   : > { %727 = vmax.xlane.f32.xlu1 %v726_v53 }
 0x3e7   : > { %v713_v54 = vpop.xlane.xlu1 %712 }
 0x3e8   : > { %v731_v56 = vsub.f32 %v698_v11, %v713_v54 }
 0x3ea   : > { %v741_v57 = vmul.f32 1.442695, %v731_v56 }
 0x3eb   : > { %v707_v58 = vpop.xlane.xlu1 %706 }
 0x3ec   : > { %2104 = vpow2.f32 %v741_v57  ;;  %v729_v59 = vsub.f32 %v696_v16, %v707_v58 }
 0x3ee   : > { %v737_v60 = vmul.f32 1.442695, %v729_v59 }
 0x3ef   : > { %v716_v61 = vpop.xlane.xlu1 %715  ;;  %v725_v62 = vpop.xlane.xlu0 %724 }
 0x3f0   : > { %2106 = vpow2.f32 %v737_v60  ;;  %v732_v63 = vsub.f32 %v699_v25, %v716_v61  ;;  %v735_v3 = vsub.f32 %v702_v29, %v725_v62 }
 0x3f2   : > { %v743_v2 = vmul.f32 1.442695, %v732_v63  ;;  %v749_v6 = vmul.f32 1.442695, %v735_v3 }
 0x3f3   : > { %v710_v4 = vpop.xlane.xlu1 %709 }
 0x3f4   : > { %2108 = vpow2.f32 %v743_v2  ;;  %v730_v5 = vsub.f32 %v697_v34, %v710_v4 }
 0x3f6   : > { %v739_v7 = vmul.f32 1.442695, %v730_v5 }
 0x3f7   : > { %v719_v8 = vpop.xlane.xlu1 %718 }
 0x3f8   : > { %2110 = vpow2.f32 %v739_v7  ;;  %v733_v9 = vsub.f32 %v700_v41, %v719_v8 }
 0x3f9   : > { %v2485_v10 = vpop.eup %2104  ;;  %2112 = vpow2.f32 %v749_v6 }
 0x3fa   : > { %v745_v11 = vmul.f32 1.442695, %v733_v9  ;;  %v759_v12 = vsel %vm704_vm2, %v2485_v10, 0.0  ;;  %v2088_v9 = vld [vmem:[%s2789_s7 + $0x8] sm:$0xff]  }
 0x3fb   : > { %760 = vadd.xlane.f32.xlu1 %v759_v12  ;;  %v722_v13 = vpop.xlane.xlu1 %721  ;;  %1963 = vmatpush3.bf16.msra.mxu1 %v2088_v9  ;;  %v440_v9 = vld [vmem:[%s434_s15] sm:$0xff] }
 0x3fc   : > { %v734_v14 = vsub.f32 %v701_v48, %v722_v13  ;;  %2114 = vpow2.f32 %v745_v11  ;;  %1964 = vmatprep.subr.bf16.mxu1 %v2245_v15 }
 0x3fd   : > { %v2107_v16 = vpop.eup %2106 }
 0x3fe   : > { %v747_v17 = vmul.f32 1.442695, %v734_v14  ;;  %v753_v18 = vsel %vm704_vm2, %v2107_v16, 0.0 }
 0x3ff   : > { %754 = vadd.xlane.f32.xlu1 %v753_v18  ;;  %v728_v19 = vpop.xlane.xlu1 %727 }
 0x400   : > { %v736_v20 = vsub.f32 %v703_v52, %v728_v19  ;;  %2116 = vpow2.f32 %v747_v17 }
 0x401   : > { %v2109_v21 = vpop.eup %2108 }
 0x402   : > { %v751_v22 = vmul.f32 1.442695, %v736_v20  ;;  %v762_v23 = vsel %vm704_vm2, %v2109_v21, 0.0 }
 0x403   : > { %763 = vadd.xlane.f32.xlu1 %v762_v23 }
 0x404   : > { %2118 = vpow2.f32 %v751_v22 }
 0x405   : > { %v2111_v25 = vpop.eup %2110 }
 0x406   : > { %v756_v27 = vsel %vm704_vm2, %v2111_v25, 0.0  ;;  %v2113_v28 = vpop.eup %2112 }
 0x407   : > { %757 = vadd.xlane.f32.xlu1 %v756_v27  ;;  %v771_v29 = vsel %vm704_vm2, %v2113_v28, 0.0 }
 0x409   : > { %v2115_v30 = vpop.eup %2114 }
 0x40a   : > { %v765_v31 = vsel %vm704_vm2, %v2115_v30, 0.0 }
 0x40b   : > { %772 = vadd.xlane.f32.xlu1 %v771_v29 }
 0x40d   : > { %v2117_v32 = vpop.eup %2116 }
 0x40e   : > { %v768_v34 = vsel %vm704_vm2, %v2117_v32, 0.0 }
 0x40f   : > { %766 = vadd.xlane.f32.xlu1 %v765_v31 }
 0x411   : > { %v2119_v33 = vpop.eup %2118 }
 0x412   : > { %v774_v35 = vsel %vm704_vm2, %v2119_v33, 0.0 }
 0x413   : > { %769 = vadd.xlane.f32.xlu1 %v768_v34  ;;  %775 = vadd.xlane.f32.xlu0 %v774_v35 }
 0x424   : > { %797 = vrot.lane.b32.xlu1 %v2435_v55, %s2248_s19  ;;  %s1887_s19 = sshll.u32 %s2338_s25, 8  ;;  %s2742_s25 = scalar_lea.sflag [#allocation3], %s421_s28 }
 0x484   : > { %v761_v36 = vpop.xlane.xlu1 %760 }
 0x488   : > { %v755_v37 = vpop.xlane.xlu1 %754 }
 0x489   : > { %2120 = vrcp.f32 %v755_v37 }
 0x48c   : > { %v764_v38 = vpop.xlane.xlu1 %763 }
 0x48d   : > { %2122 = vrcp.f32 %v764_v38 }
 0x48e   : > { %2124 = vrcp.f32 %v761_v36 }
 0x490   : > { %v758_v41 = vpop.xlane.xlu1 %757 }
 0x491   : > { %2126 = vrcp.f32 %v758_v41 }
 0x494   : > { %v773_v42 = vpop.xlane.xlu1 %772 }
 0x495   : > { %2128 = vrcp.f32 %v773_v42 }
 0x496   : > { %v2121_v44 = vpop.eup %2120 }
 0x497   : > { %v785_v55 = vmul.f32 %v2121_v44, %v2107_v16 }
 0x498   : > { %v767_v43 = vpop.xlane.xlu1 %766 }
 0x499   : > { %2130 = vrcp.f32 %v767_v43 }
 0x49a   : > { %v2123_v48 = vpop.eup %2122 }
 0x49b   : > { %v2125_v52 = vpop.eup %2124  ;;  %v788_v56 = vmul.f32 %v2123_v48, %v2109_v21 }
 0x49c   : > { %v776_v49 = vpop.xlane.xlu0 %775  ;;  %v770_v51 = vpop.xlane.xlu1 %769  ;;  %v787_v59 = vmul.f32 %v2125_v52, %v2485_v10  ;;  %v2089_v10 = vld [vmem:[%s2789_s7] sm:$0xff]  }
 0x49d   : > { %2132 = vrcp.f32 %v776_v49  ;;  %1965 = vmatpush3.bf16.msra.mxu1 %v2089_v10  ;;  %v441_v10 = vld [vmem:[%s434_s15 + $0x8] sm:$0xff] }
 0x49e   : > { %v2127_v53 = vpop.eup %2126  ;;  %2134 = vrcp.f32 %v770_v51  ;;  %v794_v60 = vpack.c.bf16 %v788_v56, %v787_v59  ;;  %v903_v51 = vrot.slane %v2397_v26, %v510_v39  ;;  %v2090_v39 = vld [vmem:[%s2787_s5 + $0x18] sm:$0xff]  }
 0x49f   : > { %v786_v54 = vmul.f32 %v2127_v53, %v2111_v25 }
 0x4a0   : > { %v798_v57 = vpop.permute.xlu1 %797 }
 0x4a1   : > { %1952 = vmatprep.subr.bf16.mxu0 %v798_v57  ;;  %v793_v58 = vpack.c.bf16 %v786_v54, %v785_v55 }
 0x4a2   : > { %1953 = vmatpush3.bf16.msra.mxu0 %v798_v57  ;;  %v2129_v61 = vpop.eup %2128 }
 0x4a3   : > { %1954 = vmatprep.mubr.msk.bf16.mxu0 %vm704_vm2, %v793_v58  ;;  %1970 = vmatprep.subr.bf16.mxu0 %v2245_v15  ;;  %v791_v3 = vmul.f32 %v2129_v61, %v2113_v28 }
 0x4a5   : > { %1955 = vmatmul.mubr.msk.bf16.vlgmr.msra.gmra.mxu0 %vm704_vm2, %v794_v60 }
 0x4a6   : > { %v2131_v62 = vpop.eup %2130  ;;  %1971 = vmatpush3.bf16.msra.mxu0 %v2090_v39 }
 0x4a7   : > { %v789_v5 = vmul.f32 %v2131_v62, %v2115_v30  ;;  %1972 = vmatprep.subr.bf16.mxu0 %v2245_v15 }
 0x4aa   : > { %v2133_v63 = vpop.eup %2132 }
 0x4ab   : > { %v2135_v2 = vpop.eup %2134  ;;  %v792_v4 = vmul.f32 %v2133_v63, %v2119_v33 }
 0x4ac   : > { %v790_v6 = vmul.f32 %v2135_v2, %v2117_v32 }
 0x4ad   : > { %v796_v7 = vpack.c.bf16 %v792_v4, %v791_v3 }
 0x4ae   : > { %v795_v8 = vpack.c.bf16 %v790_v6, %v789_v5 }
 0x4b0   : > { %1958 = vmatprep.mubr.msk.bf16.mxu0 %vm704_vm2, %v795_v8 }
 0x4b1   : > { %1959 = vmatmul.mubr.msk.bf16.gmra.mxu0 %vm704_vm2, %v796_v7 }
 0x4b2   : > { %1974 = vmatprep.mubr.msk.bf16.mxu0 %vm2246_vm1, %v2245_v15 }
 0x565   : > { %v1956_v11 = vpop.f32.mrf.mxu0 }
 0x566   : > { %v879_v18 = vmul.f32 %v1956_v11, %v2420_v46  ;;  %v1079_v11 = vpack.c.bf16 %v441_v10, %v440_v9 }
 0x567   : > { %v846_v12 = vpop.f32.mrf.mxu0 }
 0x568   : > { %v877_v16 = vmul.f32 %v2415_v45, %v846_v12  ;;  %v886_v27 = vsel %vm451_vm0, %v879_v18, 0.0  ;;  %v1021_v12 = vsub.s32 1, %v2391_v24 }
 0x569   : > { %v1957_v13 = vpop.f32.mrf.mxu0 }
 0x56a   : > { %v885_v21 = vsel %vm451_vm0, %v877_v16, 0.0  ;;  %v880_v22 = vmul.f32 %v1957_v13, %v2420_v46  ;;  %v1022_v13 = vrot.slane %v2407_v40, %v1021_v12  ;;  %v990_v40 = vsub.s32 4, %v2391_v24 }
 0x56b   : > { %v849_v14 = vpop.f32.mrf.mxu0  ;;  %v887_v30 = vadd.f32 %v886_v27, %v885_v21 }
 0x56c   : > { %v878_v19 = vmul.f32 %v2415_v45, %v849_v14  ;;  %v893_v32 = vsel %vm451_vm0, %v880_v22, 0.0 }
 0x56e   : > { %v892_v28 = vsel %vm451_vm0, %v878_v19, 0.0 }
 0x56f   : > { %v894_v36 = vadd.f32 %v893_v32, %v892_v28 }
 0x571   : > { %v1960_v17 = vpop.f32.mrf.mxu0 }
 0x572   : > { %v883_v33 = vmul.f32 %v1960_v17, %v2430_v50 }
 0x573   : > { %v862_v20 = vpop.f32.mrf.mxu0 }
 0x574   : > { %v881_v23 = vmul.f32 %v2425_v47, %v862_v20  ;;  %v890_v42 = vsel %vm451_vm0, %v883_v33, 0.0 }
 0x575   : > { %v1961_v25 = vpop.f32.mrf.mxu0 }
 0x576   : > { %v888_v29 = vsel %vm451_vm0, %v881_v23, 0.0  ;;  %v884_v34 = vmul.f32 %v1961_v25, %v2430_v50  ;;  %v442_v23 = vld [vmem:[%s434_s15 + $0x10] sm:$0xff]  ;;  %v443_v25 = vld [vmem:[%s434_s15 + $0x18] sm:$0xff]  ;;  %s2737_s15 = scalar_lea.hbm %s2794_s12, %s1887_s19 }
 0x577   : > { %v865_v31 = vpop.f32.mrf.mxu0  ;;  %v889_v37 = vadd.f32 %v888_v29, %v887_v30  ;;  %v1080_v27 = vpack.c.bf16 %v443_v25, %v442_v23  ;;  %v991_v29 = vrot.slane %v2397_v26, %v990_v40  ;;  %v1011_v23 = vld [vmem:[%s2785_s3 + $0x8] sm:$0xff] }
 0x578   : > { %v882_v35 = vmul.f32 %v2425_v47, %v865_v31  ;;  %v897_v43 = vsel %vm451_vm0, %v884_v34, 0.0  ;;  %v996_v31 = vsub.s32 5, %v2391_v24 }
 0x579   : > { %v891_v44 = vadd.f32 %v890_v42, %v889_v37 }
 0x57a   : > { %v895_v38 = vsel %vm451_vm0, %v882_v35, 0.0  ;;  %v997_v35 = vrot.slane %v2397_v26, %v996_v31 }
 0x57b   : > { %v896_v41 = vadd.f32 %v895_v38, %v894_v36 }
 0x57d   : > { %v898_v48 = vadd.f32 %v897_v43, %v896_v41 }
 0x57f   : > { %v899_v49 = vpack.c.bf16 %v898_v48, %v891_v44 }
 0x581   : > { %1967 = vmatmul.mubr.msk.bf16.vlgmr.msra.gmra.mxu1 %vm451_vm0, %v899_v49 }
 0x582   : > { %1982 = vmatprep.mubr.msk.bf16.mxu1 %vm451_vm0, %v1079_v11 }
 0x641   : > { %v953_v52 = vpop.f32.mrf.mxu1 }
 0x642   : > { %v954_v53 = vadd.f32 %v953_v52, %v903_v51 }
 0x643   : > { %v1968_v55 = vpop.f32.mrf.mxu1 }
 0x644   : > { %v2533_v54 = vadd.f32 %v954_v53, %v2369_v0  ;;  %v2091_v0 = vld [vmem:[%s2787_s5 + $0x10] sm:$0xff]  }
 0x645   : > { %v956_v56 = vpop.f32.mrf.mxu1  ;;  %1081 = vrot.lane.b32.xlu1 %v2091_v0, %s2247_s18  ;;  %1973 = vmatpush3.bf16.msra.mxu0 %v2091_v0 }
 0x646   : > { %v957_v57 = vadd.f32 %v956_v56, %v903_v51  ;;  %v962_v58 = vsel %vm451_vm0, %v2533_v54, 0.0 }
 0x647   : > { %963 = vadd.xlane.f32.xlu0 %v962_v58  ;;  %v1969_v59 = vpop.f32.mrf.mxu1 }
 0x648   : > { %v2538_v60 = vadd.f32 %v957_v57, %v2371_v1 }
 0x649   : > { %1088 = vrot.lane.b32.xlu1 %v1022_v13, %s2247_s18 }
 0x64a   : > { %v965_v61 = vsel %vm451_vm0, %v2538_v60, 0.0 }
 0x64b   : > { %966 = vadd.xlane.f32.xlu0 %v965_v61 }
 0x6b7   : > { %v1082_v22 = vpop.permute.xlu1 %1081 }
 0x6bb   : > { %v1089_v43 = vpop.permute.xlu1 %1088 }
 0x6d0   : > { %v964_v1 = vpop.xlane.xlu0 %963 }
 0x6d1   : > { %v968_v62 = vmul.f32 0.03125, %v964_v1 }
 0x6d3   : > { %v970_v63 = vsub.f32 %v2533_v54, %v968_v62 }
 0x6d4   : > { %v967_v2 = vpop.xlane.xlu0 %966 }
 0x6d5   : > { %v969_v3 = vmul.f32 0.03125, %v967_v2  ;;  %v972_v4 = vmul.f32 %v970_v63, %v970_v63 }
 0x6d7   : > { %v971_v5 = vsub.f32 %v2538_v60, %v969_v3  ;;  %v974_v6 = vsel %vm451_vm0, %v972_v4, 0.0 }
 0x6d8   : > { %975 = vadd.xlane.f32.xlu0 %v974_v6 }
 0x6d9   : > { %v973_v7 = vmul.f32 %v971_v5, %v971_v5 }
 0x6db   : > { %v977_v8 = vsel %vm451_vm0, %v973_v7, 0.0 }
 0x6dc   : > { %978 = vadd.xlane.f32.xlu0 %v977_v8 }
 0x6f2   : > { %1083 = vrot.lane.b32.xlu0 %v2090_v39, %s2247_s18 }
 0x761   : > { %v976_v14 = vpop.xlane.xlu0 %975 }
 0x762   : > { %v980_v16 = vmul.f32 0.03125, %v976_v14 }
 0x764   : > { %v982_v17 = vadd.f32 1e-05, %v980_v16 }
 0x765   : > { %v979_v18 = vpop.xlane.xlu0 %978 }
 0x766   : > { %2136 = vrsqrt.f32 %v982_v17  ;;  %v981_v19 = vmul.f32 0.03125, %v979_v18  ;;  %v1010_v17 = vld [vmem:[%s2785_s3] sm:$0xff] }
 0x768   : > { %v983_v20 = vadd.f32 1e-05, %v981_v19 }
 0x769   : > { %v1084_v21 = vpop.permute.xlu0 %1083 }
 0x76a   : > { %2138 = vrsqrt.f32 %v983_v20  ;;  %1978 = vmatprep.subr.bf16.mxu1 %v1084_v21 }
 0x76b   : > { %1979 = vmatpush3.bf16.msra.mxu1 %v1084_v21  ;;  %v1012_v21 = vld [vmem:[%s2785_s3 + $0x10] sm:$0xff] }
 0x76c   : > { %1980 = vmatprep.subr.bf16.mxu1 %v1082_v22 }
 0x76f   : > { %1981 = vmatpush3.bf16.msra.mxu1 %v1082_v22 }
 0x772   : > { %1983 = vmatmul.mubr.msk.bf16.vlgmr.msra.gmra.mxu1 %vm451_vm0, %v1080_v27 }
 0x773   : > { %v2137_v28 = vpop.eup %2136 }
 0x774   : > { %v986_v30 = vmul.f32 %v2137_v28, %v970_v63 }
 0x776   : > { %v992_v33 = vmul.f32 %v991_v29, %v986_v30  ;;  %v1013_v30 = vld [vmem:[%s2785_s3 + $0x18] sm:$0xff] }
 0x777   : > { %v2139_v32 = vpop.eup %2138 }
 0x778   : > { %v987_v34 = vmul.f32 %v2139_v32, %v971_v5  ;;  %v998_v37 = vadd.f32 %v997_v35, %v992_v33 }
 0x77a   : > { %v993_v36 = vmul.f32 %v991_v29, %v987_v34 }
 0x77c   : > { %v999_v38 = vadd.f32 %v997_v35, %v993_v36 }
 0x77e   : > { %v1018_v41 = vpack.c.bf16 %v999_v38, %v998_v37  ;;  %v1014_v38 = vld [vmem:[%s2785_s3 + $0x20] sm:$0xff] }
 0x780   : > { %1975 = vmatmul.mubr.msk.bf16.vlgmr.msra.gmra.mxu0 %vm451_vm0, %v1018_v41 }
 0x832   : > { %v1984_v42 = vpop.f32.mrf.mxu1 }
 0x833   : > { %v1140_v49 = vadd.f32 %v1984_v42, %v1089_v43 }
 0x834   : > { %v1131_v44 = vpop.f32.mrf.mxu1 }
 0x835   : > { %v1132_v53 = vadd.f32 %v1131_v44, %v1089_v43 }
 0x836   : > { %v1985_v48 = vpop.f32.mrf.mxu1 }
 0x837   : > { %v1143_v51 = vadd.f32 %v1985_v48, %v1089_v43 }
 0x838   : > { %v1134_v52 = vpop.f32.mrf.mxu1 }
 0x839   : > { %v2571_v55 = vpack.c.bf16 %v1143_v51, %v1140_v49  ;;  %v1135_v56 = vadd.f32 %v1134_v52, %v1089_v43  ;;  %v1015_v43 = vld [vmem:[%s2785_s3 + $0x28] sm:$0xff]  ;;  %v1016_v52 = vld [vmem:[%s2785_s3 + $0x30] sm:$0xff] }
 0x83b   : > { %v2573_v57 = vpack.c.bf16 %v1135_v56, %v1132_v53  ;;  %2039 = vmatprep.subr.msk.bf16.mxu0 %vm451_vm0, %v2571_v55  ;;  %v1176_v26 = vsel %vm451_vm0, %v2571_v55, 0  ;;  %v1017_v53 = vld [vmem:[%s2785_s3 + $0x38] sm:$0xff] }
 0x83c   : > { %1987 = vmatpush3.bf16.xpose.msra.mxu0 %v1176_v26 }
 0x83d   : > { %2040 = vmatprep.subr.msk.bf16.mxu0 %vm451_vm0, %v2573_v57  ;;  %v1173_v39 = vsel %vm451_vm0, %v2573_v57, 0 }
 0x840   : > { %v1072_v58 = vpop.f32.mrf.mxu0 }
 0x841   : > { %v1073_v59 = vadd.f32 %v1072_v58, %v1022_v13 }
 0x842   : > { %v1976_v61 = vpop.f32.mrf.mxu0 }
 0x843   : > { %v1146_v62 = vmul.f32 %v2415_v45, %v1073_v59  ;;  %v1148_v2 = vmul.f32 %v2420_v46, %v1073_v59  ;;  %v1150_v6 = vmul.f32 %v2425_v47, %v1073_v59  ;;  %v1152_v11 = vmul.f32 %v2430_v50, %v1073_v59 }
 0x844   : > { %v1075_v0 = vpop.f32.mrf.mxu0  ;;  %1989 = vmatpush3.bf16.xpose.msra.mxu0 %v1173_v39 }
 0x845   : > { %v1076_v1 = vadd.f32 %v1075_v0, %v1022_v13  ;;  %2018 = vmatprep.subr.bf16.mxu0 %v2245_v15 }
 0x846   : > { %v1977_v63 = vpop.f32.mrf.mxu0 }
 0x847   : > { %v1147_v3 = vmul.f32 %v2415_v45, %v1076_v1  ;;  %v1149_v4 = vmul.f32 %v2420_v46, %v1076_v1  ;;  %v1151_v5 = vmul.f32 %v2425_v47, %v1076_v1  ;;  %v1153_v10 = vmul.f32 %v2430_v50, %v1076_v1 }
 0x849   : > { %v1155_v7 = vpack.c.bf16 %v1149_v4, %v1148_v2  ;;  %v1154_v8 = vpack.c.bf16 %v1147_v3, %v1146_v62  ;;  %v1156_v9 = vpack.c.bf16 %v1151_v5, %v1150_v6  ;;  %v1157_v13 = vpack.c.bf16 %v1153_v10, %v1152_v11 }
 0x84b   : > { %1990 = vmatprep.mubr.msk.bf16.mxu0 %vm451_vm0, %v1154_v8 }
 0x84c   : > { %1991 = vmatmul.mubr.msk.bf16.vlgmr.msra.gmra.mxu0 %vm451_vm0, %v1155_v7 }
 0x84d   : > { %1994 = vmatprep.mubr.msk.bf16.mxu0 %vm451_vm0, %v1156_v9 }
 0x854   : > { %1995 = vmatmul.mubr.msk.bf16.gmra.mxu0 %vm451_vm0, %v1157_v13 }
 0x855   : > { %2022 = vmatprep.mubr.msk.bf16.mxu0 %vm2246_vm1, %v2245_v15 }
 0x90c   : > { %v1992_v14 = vpop.f32.mrf.mxu0 }
 0x90d   : > { %v1245_v18 = vmul.f32 0.35355338, %v1992_v14 }
 0x90e   : > { %v1212_v16 = vpop.f32.mrf.mxu0 }
 0x90f   : > { %v1243_v19 = vmul.f32 0.35355338, %v1212_v16  ;;  %v1253_v28 = vadd.f32 %v1245_v18, %v1012_v21 }
 0x910   : > { %v1993_v20 = vpop.f32.mrf.mxu0 }
 0x911   : > { %v1251_v50 = vadd.f32 %v1243_v19, %v1010_v17  ;;  %v1246_v25 = vmul.f32 0.35355338, %v1993_v20  ;;  %v1265_v34 = vsel %vm451_vm0, %v1253_v28, -inf }
 0x912   : > { %v1215_v22 = vpop.f32.mrf.mxu0 }
 0x913   : > { %v1244_v27 = vmul.f32 0.35355338, %v1215_v22  ;;  %v1259_v40 = vsel %vm451_vm0, %v1251_v50, -inf  ;;  %v1254_v36 = vadd.f32 %v1246_v25, %v1013_v30 }
 0x914   : > { %1260 = vmax.xlane.f32.xlu1 %v1259_v40  ;;  %v1996_v29 = vpop.f32.mrf.mxu0 }
 0x915   : > { %v1252_v31 = vadd.f32 %v1244_v27, %v1011_v23  ;;  %v1249_v41 = vmul.f32 0.35355338, %v1996_v29  ;;  %v1268_v49 = vsel %vm451_vm0, %v1254_v36, -inf }
 0x916   : > { %v1228_v32 = vpop.f32.mrf.mxu0 }
 0x917   : > { %v1247_v33 = vmul.f32 0.35355338, %v1228_v32  ;;  %v1262_v35 = vsel %vm451_vm0, %v1252_v31, -inf  ;;  %v1257_v59 = vadd.f32 %v1249_v41, %v1016_v52 }
 0x918   : > { %1266 = vmax.xlane.f32.xlu1 %v1265_v34  ;;  %1263 = vmax.xlane.f32.xlu0 %v1262_v35  ;;  %v1997_v37 = vpop.f32.mrf.mxu0 }
 0x919   : > { %v1250_v44 = vmul.f32 0.35355338, %v1997_v37  ;;  %v1255_v51 = vadd.f32 %v1247_v33, %v1014_v38  ;;  %v1277_v39 = vsel %vm451_vm0, %v1257_v59, -inf }
 0x91a   : > { %v1231_v42 = vpop.f32.mrf.mxu0 }
 0x91b   : > { %v1248_v48 = vmul.f32 0.35355338, %v1231_v42  ;;  %v1271_v26 = vsel %vm451_vm0, %v1255_v51, -inf  ;;  %v1258_v61 = vadd.f32 %v1250_v44, %v1017_v53 }
 0x91c   : > { %1269 = vmax.xlane.f32.xlu1 %v1268_v49 }
 0x91d   : > { %v1256_v56 = vadd.f32 %v1248_v48, %v1015_v43  ;;  %v1280_v0 = vsel %vm451_vm0, %v1258_v61, -inf }
 0x91f   : > { %v1274_v58 = vsel %vm451_vm0, %v1256_v56, -inf }
 0x920   : > { %1272 = vmax.xlane.f32.xlu1 %v1271_v26  ;;  %1275 = vmax.xlane.f32.xlu0 %v1274_v58 }
 0x924   : > { %1278 = vmax.xlane.f32.xlu1 %v1277_v39  ;;  %1281 = vmax.xlane.f32.xlu0 %v1280_v0 }
 0x99d   : > { %v1261_v1 = vpop.xlane.xlu1 %1260 }
 0x99e   : > { %v1283_v62 = vsub.f32 %v1251_v50, %v1261_v1 }
 0x9a0   : > { %v1291_v4 = vmul.f32 1.442695, %v1283_v62 }
 0x9a1   : > { %v1267_v63 = vpop.xlane.xlu1 %1266  ;;  %v1264_v2 = vpop.xlane.xlu0 %1263 }
 0x9a2   : > { %v1285_v3 = vsub.f32 %v1253_v28, %v1267_v63  ;;  %v1284_v6 = vsub.f32 %v1252_v31, %v1264_v2 }
 0x9a4   : > { %v1295_v5 = vmul.f32 1.442695, %v1285_v3  ;;  %v1293_v9 = vmul.f32 1.442695, %v1284_v6 }
 0x9a5   : > { %v1270_v7 = vpop.xlane.xlu1 %1269 }
 0x9a6   : > { %2140 = vpow2.f32 %v1295_v5  ;;  %v1286_v8 = vsub.f32 %v1254_v36, %v1270_v7 }
 0x9a7   : > { %2142 = vpow2.f32 %v1291_v4 }
 0x9a8   : > { %v1297_v10 = vmul.f32 1.442695, %v1286_v8 }
 0x9a9   : > { %v1273_v11 = vpop.xlane.xlu1 %1272  ;;  %v1276_v13 = vpop.xlane.xlu0 %1275 }
 0x9aa   : > { %2144 = vpow2.f32 %v1297_v10  ;;  %v1287_v14 = vsub.f32 %v1255_v51, %v1273_v11  ;;  %v1288_v16 = vsub.f32 %v1256_v56, %v1276_v13 }
 0x9ab   : > { %2146 = vpow2.f32 %v1293_v9 }
 0x9ac   : > { %v1299_v21 = vmul.f32 1.442695, %v1287_v14  ;;  %v1301_v23 = vmul.f32 1.442695, %v1288_v16  ;;  %v2092_v14 = vld [vmem:[%s2789_s7 + $0x18] sm:$0xff]   ;;  %v2093_v16 = vld [vmem:[%s2789_s7 + $0x10] sm:$0xff]  }
 0x9ad   : > { %v1279_v17 = vpop.xlane.xlu1 %1278  ;;  %v1282_v18 = vpop.xlane.xlu0 %1281 }
 0x9ae   : > { %v1289_v19 = vsub.f32 %v1257_v59, %v1279_v17  ;;  %v1290_v20 = vsub.f32 %v1258_v61, %v1282_v18 }
 0x9b0   : > { %v1303_v50 = vmul.f32 1.442695, %v1289_v19  ;;  %v1305_v22 = vmul.f32 1.442695, %v1290_v20 }
 0x9b2   : > { %2148 = vpow2.f32 %v1303_v50 }
 0x9b3   : > { %v2141_v25 = vpop.eup %2140  ;;  %2150 = vpow2.f32 %v1305_v22 }
 0x9b4   : > { %2152 = vpow2.f32 %v1299_v21  ;;  %v1313_v27 = vsel %vm451_vm0, %v2141_v25, 0.0  ;;  %v2143_v40 = vpop.eup %2142 }
 0x9b5   : > { %2154 = vpow2.f32 %v1301_v23  ;;  %1314 = vadd.xlane.f32.xlu1 %v1313_v27  ;;  %v1307_v29 = vsel %vm451_vm0, %v2143_v40, 0.0 }
 0x9b7   : > { %v2145_v28 = vpop.eup %2144 }
 0x9b8   : > { %v1316_v30 = vsel %vm451_vm0, %v2145_v28, 0.0  ;;  %v2147_v31 = vpop.eup %2146 }
 0x9b9   : > { %1308 = vadd.xlane.f32.xlu1 %v1307_v29  ;;  %1317 = vadd.xlane.f32.xlu0 %v1316_v30  ;;  %v1310_v32 = vsel %vm451_vm0, %v2147_v31, 0.0 }
 0x9bd   : > { %1311 = vadd.xlane.f32.xlu0 %v1310_v32 }
 0x9bf   : > { %v2149_v33 = vpop.eup %2148 }
 0x9c0   : > { %v2151_v34 = vpop.eup %2150  ;;  %v1325_v35 = vsel %vm451_vm0, %v2149_v33, 0.0 }
 0x9c1   : > { %v2153_v36 = vpop.eup %2152  ;;  %1326 = vadd.xlane.f32.xlu1 %v1325_v35  ;;  %v1328_v37 = vsel %vm451_vm0, %v2151_v34, 0.0 }
 0x9c2   : > { %v2155_v38 = vpop.eup %2154  ;;  %1329 = vadd.xlane.f32.xlu0 %v1328_v37  ;;  %v1319_v41 = vsel %vm451_vm0, %v2153_v36, 0.0 }
 0x9c3   : > { %v1322_v42 = vsel %vm451_vm0, %v2155_v38, 0.0 }
 0x9c5   : > { %1320 = vadd.xlane.f32.xlu1 %v1319_v41 }
 0x9c6   : > { %1323 = vadd.xlane.f32.xlu0 %v1322_v42 }
 0x9d6   : > { %1355 = vrot.lane.b32.xlu1 %v2571_v55, %s2247_s18 }
 0x9dc   : > { %1353 = vrot.lane.b32.xlu0 %v2573_v57, %s2247_s18  ;;  %s2249_s18 = smov [#allocation2]  }
 0x9dd   : > { %s2187_s0 = sshll.u32 %s2249_s18, 4  ;;  %s2188_s0 = int_to_ptr.vmem [resolvable:$false] %s2187_s0 }
 0x9de   : > { %s2189_s19 = scalar_lea.vmem %s2188_s0, 512  ;;  %p2190_p1 = scmp.lt.s32.totalorder %s2739_s17, %s2188_s0 }
 0x9df   : > { %p2191_p2 = scmp.lt.s32.totalorder %s2189_s19, %s2183_s29 }
 0x9e1   : > { %p2192_p3 = por %p2191_p2, %p2190_p1 }
 0x9e3   : > { %p2193_p4 = pnand %p2192_p3, %p2186_p0 }
 0xa3e   : > { %v1315_v43 = vpop.xlane.xlu1 %1314 }
 0xa42   : > { %v1309_v44 = vpop.xlane.xlu1 %1308  ;;  %v1318_v48 = vpop.xlane.xlu0 %1317 }
 0xa43   : > { %2156 = vrcp.f32 %v1309_v44 }
 0xa44   : > { %2158 = vrcp.f32 %v1318_v48 }
 0xa45   : > { %2160 = vrcp.f32 %v1315_v43 }
 0xa46   : > { %v1312_v49 = vpop.xlane.xlu0 %1311 }
 0xa47   : > { %2162 = vrcp.f32 %v1312_v49 }
 0xa4a   : > { %v1327_v51 = vpop.xlane.xlu1 %1326 }
 0xa4b   : > { %v1330_v52 = vpop.xlane.xlu0 %1329  ;;  %2164 = vrcp.f32 %v1327_v51 }
 0xa4c   : > { %2166 = vrcp.f32 %v1330_v52 }
 0xa4e   : > { %v1321_v53 = vpop.xlane.xlu1 %1320 }
 0xa4f   : > { %2168 = vrcp.f32 %v1321_v53  ;;  %v1324_v56 = vpop.xlane.xlu0 %1323  ;;  %v2182_v53 = vld [vmem:[%s2790_s8] sm:$0xff] }
 0xa50   : > { %2170 = vrcp.f32 %v1324_v56  ;;  %v2157_v55 = vpop.eup %2156  ;;  %v1462_v56 = vrot.slane %v2182_v53, %v1021_v12 }
 0xa51   : > { %v2159_v26 = vpop.eup %2158  ;;  %v1339_v39 = vmul.f32 %v2157_v55, %v2143_v40 }
 0xa52   : > { %v1356_v58 = vpop.permute.xlu1 %1355  ;;  %v2161_v57 = vpop.eup %2160  ;;  %v1342_v1 = vmul.f32 %v2159_v26, %v2145_v28 }
 0xa53   : > { %1998 = vmatprep.subr.bf16.mxu1 %v1356_v58  ;;  %v1354_v61 = vpop.permute.xlu0 %1353  ;;  %v1341_v63 = vmul.f32 %v2161_v57, %v2141_v25 }
 0xa54   : > { %v2163_v59 = vpop.eup %2162  ;;  %1999 = vmatpush3.bf16.msra.mxu1 %v1356_v58 }
 0xa55   : > { %2000 = vmatprep.subr.bf16.mxu1 %v1354_v61  ;;  %v1340_v0 = vmul.f32 %v2163_v59, %v2147_v31  ;;  %v1348_v3 = vpack.c.bf16 %v1342_v1, %v1341_v63 }
 0xa57   : > { %v1347_v62 = vpack.c.bf16 %v1340_v0, %v1339_v39 }
 0xa58   : > { %2001 = vmatpush3.bf16.msra.mxu1 %v1354_v61  ;;  %v2165_v2 = vpop.eup %2164 }
 0xa59   : > { %2002 = vmatprep.mubr.msk.bf16.mxu1 %vm451_vm0, %v1347_v62  ;;  %2010 = vmatprep.subr.bf16.mxu1 %v2245_v15  ;;  %v2167_v4 = vpop.eup %2166  ;;  %v1345_v8 = vmul.f32 %v2165_v2, %v2149_v33 }
 0xa5a   : > { %v1346_v9 = vmul.f32 %v2167_v4, %v2151_v34 }
 0xa5b   : > { %2003 = vmatmul.mubr.msk.bf16.vlgmr.msra.gmra.mxu1 %vm451_vm0, %v1348_v3 }
 0xa5c   : > { %v2169_v5 = vpop.eup %2168  ;;  %v1350_v13 = vpack.c.bf16 %v1346_v9, %v1345_v8  ;;  %2011 = vmatpush3.bf16.msra.mxu1 %v2092_v14  ;;  %v2094_v8 = vld [vmem:[%s2792_s10 + $0x8] sm:$0xff]   ;;  %v2095_v9 = vld [vmem:[%s2792_s10] sm:$0xff]  }
 0xa5d   : > { %v2171_v6 = vpop.eup %2170  ;;  %v1343_v7 = vmul.f32 %v2169_v5, %v2153_v36  ;;  %2012 = vmatprep.subr.bf16.mxu1 %v2245_v15  ;;  %2019 = vmatpush3.bf16.msra.mxu0 %v2094_v8 }
 0xa5e   : > { %v1344_v10 = vmul.f32 %v2171_v6, %v2155_v38  ;;  %2020 = vmatprep.subr.bf16.mxu0 %v2245_v15 }
 0xa60   : > { %v1349_v11 = vpack.c.bf16 %v1344_v10, %v1343_v7  ;;  %2013 = vmatpush3.bf16.msra.mxu1 %v2093_v16 }
 0xa61   : > { %2026 = vmatprep.subr.bf16.mxu1 %v2245_v15  ;;  %2021 = vmatpush3.bf16.msra.mxu0 %v2095_v9 }
 0xa62   : > { %2006 = vmatprep.mubr.msk.bf16.mxu1 %vm451_vm0, %v1349_v11 }
 0xa63   : > { %2007 = vmatmul.mubr.msk.bf16.gmra.mxu1 %vm451_vm0, %v1350_v13 }
 0xa64   : > { %2014 = vmatprep.mubr.msk.bf16.mxu1 %vm2246_vm1, %v2245_v15 }
 0xb1b   : > { %v2004_v17 = vpop.f32.mrf.mxu1 }
 0xb1c   : > { %v1438_v22 = vmul.f32 %v2004_v17, %v2420_v46 }
 0xb1d   : > { %v1405_v18 = vpop.f32.mrf.mxu1 }
 0xb1e   : > { %v1436_v21 = vmul.f32 %v2415_v45, %v1405_v18  ;;  %v1445_v30 = vsel %vm451_vm0, %v1438_v22, 0.0  ;;  %v1549_v18 = vsub.s32 6, %v2391_v24 }
 0xb1f   : > { %v2005_v19 = vpop.f32.mrf.mxu1 }
 0xb20   : > { %v1444_v27 = vsel %vm451_vm0, %v1436_v21, 0.0  ;;  %v1439_v40 = vmul.f32 %v2005_v19, %v2420_v46  ;;  %v2181_v46 = vld [vmem:[%s2786_s4 + $0x2] ss:$0 sm:$0xff]  ;;  %v1555_v21 = vsub.s32 7, %v2391_v24  ;;  %v2097_v24 = vld [vmem:[%s2793_s11 + $0x10] sm:$0xff]  }
 0xb21   : > { %v1408_v20 = vpop.f32.mrf.mxu1  ;;  %v1446_v33 = vadd.f32 %v1445_v30, %v1444_v27 }
 0xb22   : > { %v1437_v23 = vmul.f32 %v2415_v45, %v1408_v20  ;;  %v1452_v35 = vsel %vm451_vm0, %v1439_v40, 0.0  ;;  %v2180_v45 = vld [vmem:[%s2786_s4 + $0x3] ss:$0 sm:$0xff]  ;;  %v1550_v20 = vrot.slane %v2182_v53, %v1549_v18 }
 0xb23   : > { %v2008_v50 = vpop.f32.mrf.mxu1 }
 0xb24   : > { %v1451_v31 = vsel %vm451_vm0, %v1437_v23, 0.0  ;;  %v1442_v36 = vmul.f32 %v2180_v45, %v2008_v50  ;;  %v1556_v23 = vrot.slane %v2182_v53, %v1555_v21 }
 0xb25   : > { %v1421_v25 = vpop.f32.mrf.mxu1  ;;  %v1453_v38 = vadd.f32 %v1452_v35, %v1451_v31  ;;  %v2096_v31 = vld [vmem:[%s2793_s11 + $0x18] sm:$0xff]  }
 0xb26   : > { %v1440_v28 = vmul.f32 %v2425_v47, %v1421_v25  ;;  %v1449_v44 = vsel %vm451_vm0, %v1442_v36, 0.0 }
 0xb27   : > { %v2009_v29 = vpop.f32.mrf.mxu1 }
 0xb28   : > { %v1447_v32 = vsel %vm451_vm0, %v1440_v28, 0.0  ;;  %v1443_v37 = vmul.f32 %v2180_v45, %v2009_v29 }
 0xb29   : > { %v1424_v34 = vpop.f32.mrf.mxu1  ;;  %v1448_v41 = vadd.f32 %v1447_v32, %v1446_v33  ;;  %v2098_v32 = vld [vmem:[%s2793_s11 + $0x8] sm:$0xff]   ;;  %v2099_v33 = vld [vmem:[%s2793_s11] sm:$0xff]  }
 0xb2a   : > { %v1441_v47 = vmul.f32 %v2181_v46, %v1424_v34  ;;  %v1456_v48 = vsel %vm451_vm0, %v1443_v37, 0.0  ;;  %v1872_v34 = vld [vmem:[%s2791_s9] ss:$0 sm:$0xff] }
 0xb2b   : > { %v1450_v49 = vadd.f32 %v1449_v44, %v1448_v41 }
 0xb2c   : > { %v1454_v42 = vsel %vm451_vm0, %v1441_v47, 0.0 }
 0xb2d   : > { %v1455_v43 = vadd.f32 %v1454_v42, %v1453_v38 }
 0xb2f   : > { %v1457_v51 = vadd.f32 %v1456_v48, %v1455_v43 }
 0xb31   : > { %v1458_v52 = vpack.c.bf16 %v1457_v51, %v1450_v49 }
 0xb33   : > { %2015 = vmatmul.mubr.msk.bf16.vlgmr.msra.gmra.mxu1 %vm451_vm0, %v1458_v52 }
 0xb34   : > { %2034 = vmatprep.mubr.msk.bf16.mxu1 %vm2246_vm1, %v2245_v15  ;;  %2027 = vmatpush3.bf16.msra.mxu1 %v2096_v31 }
 0xb35   : > { %2028 = vmatprep.subr.bf16.mxu1 %v2245_v15 }
 0xb38   : > { %2029 = vmatpush3.bf16.msra.mxu1 %v2097_v24 }
 0xb39   : > { %2030 = vmatprep.subr.bf16.mxu1 %v2245_v15 }
 0xb3c   : > { %2031 = vmatpush3.bf16.msra.mxu1 %v2098_v32 }
 0xb3d   : > { %2032 = vmatprep.subr.bf16.mxu1 %v2245_v15 }
 0xb40   : > { %2033 = vmatpush3.bf16.msra.mxu1 %v2099_v33 }
 0xbf3   : > { %v1512_v55 = vpop.f32.mrf.mxu1 }
 0xbf4   : > { %v1513_v26 = vadd.f32 %v1512_v55, %v1462_v56 }
 0xbf5   : > { %v2016_v58 = vpop.f32.mrf.mxu1 }
 0xbf6   : > { %v2685_v57 = vadd.f32 %v1513_v26, %v2533_v54 }
 0xbf7   : > { %v1515_v59 = vpop.f32.mrf.mxu1 }
 0xbf8   : > { %v1516_v61 = vadd.f32 %v1515_v59, %v1462_v56  ;;  %v1521_v39 = vsel %vm451_vm0, %v2685_v57, 0.0 }
 0xbf9   : > { %1522 = vadd.xlane.f32.xlu1 %v1521_v39  ;;  %v2017_v0 = vpop.f32.mrf.mxu1 }
 0xbfa   : > { %v2690_v1 = vadd.f32 %v1516_v61, %v2538_v60 }
 0xbfc   : > { %v1524_v62 = vsel %vm451_vm0, %v2690_v1, 0.0 }
 0xbfd   : > { %1525 = vadd.xlane.f32.xlu0 %v1524_v62  ;;  %v1881_v62 = vld [vmem:[%s2790_s8 + $0x8] ss:$0 sm:$0xff] }
 0xc82   : > { %v1523_v12 = vpop.xlane.xlu1 %1522 }
 0xc83   : > { %v1527_v63 = vmul.f32 0.03125, %v1523_v12 }
 0xc85   : > { %v1529_v2 = vsub.f32 %v2685_v57, %v1527_v63 }
 0xc86   : > { %v1526_v54 = vpop.xlane.xlu0 %1525 }
 0xc87   : > { %v1528_v3 = vmul.f32 0.03125, %v1526_v54  ;;  %v1531_v4 = vmul.f32 %v1529_v2, %v1529_v2 }
 0xc89   : > { %v1530_v5 = vsub.f32 %v2690_v1, %v1528_v3  ;;  %v1533_v6 = vsel %vm451_vm0, %v1531_v4, 0.0 }
 0xc8a   : > { %1534 = vadd.xlane.f32.xlu1 %v1533_v6 }
 0xc8b   : > { %v1532_v7 = vmul.f32 %v1530_v5, %v1530_v5 }
 0xc8d   : > { %v1536_v60 = vsel %vm451_vm0, %v1532_v7, 0.0 }
 0xc8e   : > { %1537 = vadd.xlane.f32.xlu0 %v1536_v60 }
 0xd13   : > { %v1535_v10 = vpop.xlane.xlu1 %1534 }
 0xd14   : > { %v1539_v11 = vmul.f32 0.03125, %v1535_v10 }
 0xd16   : > { %v1541_v13 = vadd.f32 1e-05, %v1539_v11 }
 0xd17   : > { %v1538_v14 = vpop.xlane.xlu0 %1537 }
 0xd18   : > { %2172 = vrsqrt.f32 %v1541_v13  ;;  %v1540_v16 = vmul.f32 0.03125, %v1538_v14 }
 0xd1a   : > { %v1542_v17 = vadd.f32 1e-05, %v1540_v16 }
 0xd1c   : > { %2174 = vrsqrt.f32 %v1542_v17 }
 0xd25   : > { %v2173_v19 = vpop.eup %2172 }
 0xd26   : > { %v1545_v50 = vmul.f32 %v2173_v19, %v1529_v2 }
 0xd28   : > { %v1551_v25 = vmul.f32 %v1550_v20, %v1545_v50 }
 0xd29   : > { %v2175_v22 = vpop.eup %2174 }
 0xd2a   : > { %v1546_v27 = vmul.f32 %v2175_v22, %v1530_v5  ;;  %v1557_v28 = vadd.f32 %v1556_v23, %v1551_v25 }
 0xd2c   : > { %v1552_v40 = vmul.f32 %v1550_v20, %v1546_v27 }
 0xd2e   : > { %v1558_v29 = vadd.f32 %v1556_v23, %v1552_v40 }
 0xd30   : > { %v1559_v30 = vpack.c.bf16 %v1558_v29, %v1557_v28 }
 0xd32   : > { %2023 = vmatmul.mubr.msk.bf16.vlgmr.msra.gmra.mxu0 %vm451_vm0, %v1559_v30 }
 0xdf2   : > { %v1620_v35 = vpop.f32.mrf.mxu0 }
 0xdf3   : > { %v1621_v45 = vadd.f32 %v1872_v34, %v1620_v35 }
 0xdf4   : > { %v2024_v36 = vpop.f32.mrf.mxu0 }
 0xdf5   : > { %v1627_v37 = vmul.f32 %v1621_v45, %v1621_v45 }
 0xdf6   : > { %v1623_v46 = vpop.f32.mrf.mxu0 }
 0xdf7   : > { %v1629_v47 = vmul.f32 %v1627_v37, %v1621_v45  ;;  %v1624_v38 = vadd.f32 %v1872_v34, %v1623_v46 }
 0xdf8   : > { %v2025_v41 = vpop.f32.mrf.mxu0 }
 0xdf9   : > { %v1631_v42 = vmul.f32 0.044715, %v1629_v47  ;;  %v1628_v43 = vmul.f32 %v1624_v38, %v1624_v38 }
 0xdfb   : > { %v1633_v15 = vadd.f32 %v1631_v42, %v1621_v45  ;;  %v1630_v44 = vmul.f32 %v1628_v43, %v1624_v38 }
 0xdfd   : > { %v1635_v48 = vmul.f32 0.7978846, %v1633_v15  ;;  %v1632_v49 = vmul.f32 0.044715, %v1630_v44 }
 0xdff   : > { %2176 = vtanh.f32 %v1635_v48  ;;  %v1634_v51 = vadd.f32 %v1632_v49, %v1624_v38 }
 0xe01   : > { %v1636_v52 = vmul.f32 0.7978846, %v1634_v51 }
 0xe03   : > { %2178 = vtanh.f32 %v1636_v52 }
 0xe0c   : > { %v2177_v53 = vpop.eup %2176 }
 0xe0d   : > { %v1639_v56 = vadd.f32 1.0, %v2177_v53 }
 0xe0f   : > { %v1641_v26 = vmul.f32 0.5, %v1639_v56 }
 0xe10   : > { %v2179_v55 = vpop.eup %2178 }
 0xe11   : > { %v1640_v58 = vadd.f32 1.0, %v2179_v55  ;;  %v1643_v61 = vmul.f32 %v1641_v26, %v1621_v45 }
 0xe13   : > { %v1642_v59 = vmul.f32 0.5, %v1640_v58 }
 0xe15   : > { %v1644_v39 = vmul.f32 %v1642_v59, %v1624_v38 }
 0xe17   : > { %v1645_v0 = vpack.c.bf16 %v1644_v39, %v1643_v61 }
 0xe19   : > { %2035 = vmatmul.mubr.msk.bf16.vlgmr.msra.gmra.mxu1 %vm1678_vm3, %v1645_v0 }
 0xed9   : > { %v1716_v12 = vpop.f32.mrf.mxu1 }
 0xeda   : > { %v1723_v63 = vadd.f32 %v1716_v12, %v2685_v57 }
 0xedb   : > { %v2036_v2 = vpop.f32.mrf.mxu1 }
 0xedc   : > { %v1729_v54 = vadd.f32 %v1881_v62, %v1723_v63 }
 0xedd   : > { %v1719_v3 = vpop.f32.mrf.mxu1 }
 0xede   : > { %1731 = vst.msk [vmem:[%s423_s16] sm:$0xff] %vm451_vm0, %v1729_v54  ;;  %v1724_v4 = vadd.f32 %v1719_v3, %v2690_v1 }
 0xedf   : > { %v2037_v5 = vpop.f32.mrf.mxu1 }
 0xee0   : > { %v1730_v57 = vadd.f32 %v1881_v62, %v1724_v4 }
 0xee2   : > { %1732 = vst.msk [vmem:[%s423_s16 + $0x8] sm:$0xff] %vm451_vm0, %v1730_v57 }
 0xee3   : > { %2196 = shalt.err (!%p2193_p4)
}
 0xee4   : > { %s2197_s28 = scalar_lea.hbm %s2737_s15, 256  ;;  %s2201_s26 = scalar_lea.hbm %s2794_s12, 512 }
 0xee5   : > { %p2198_p7 = scmp.ne.s32.totalorder %s2737_s15, %s2197_s28  ;;  %p2202_p10 = scmp.lt.s32.totalorder %s2737_s15, %s2794_s12 }
 0xee6   : > { %p2203_p11 = scmp.lt.s32.totalorder %s2201_s26, %s2197_s28 }
 0xee7   : > { %p2199_p8 = pnand %p2198_p7, %p2355_p5 }
 0xee8   : > { %p2204_p12 = por %p2203_p11, %p2202_p10 }
 0xee9   : > { %p2200_p9 = pneg %p2199_p8 }
 0xeeb   : > { %p2205_p13 = pnand %p2204_p12, %p2200_p9 }
 0xeed   : > { %2208 = shalt.err (!%p2205_p13)
}
 0xeee   : > { %s2250_s0 = smov 128   ;;  %s2251_s29 = smov 8  }
 0xeef   : > { %2041 = dma.vmem_to_hbm [thread:$0]  (%p2355_p5), %s2739_s17, 256, %s2737_s15, %s2742_s25, %s2250_s0, %s2250_s0, %s2251_s29  }
 0xef0 PF: > { %p2047_p0 = scmp.ge.s32.totalorder %s2243_s24, 2  ;;  %s1762_s19 = sand.u32 1, %s2231_s21  }
 0xef1   : > { %s1763_s1 = scalar_lea.sflag [#allocation3], %s1762_s19 }
 0xef2   : > { %p2044_p1 = pnand %p2047_p0, %p2359_p6 }
 0xef4   : > { %p2045_p2 = pneg %p2044_p1 }
 0xef6   : > { %2226 = dma.done.wait (%p2045_p2), %s1763_s1, 256  }
 0xef7   : > { %2228 = vsyncadd (%p2045_p2), %s1763_s1, 4294967040  ;;  %p22_p3 = scmp.ge.s32.totalorder %s2342_s27, 4   ;;  %s2801_s21 = smov %s2235_s22 }
 0xef8   : > { %s2802_s22 = smov %s2239_s23  ;;  %s2803_s23 = smov %s2353_s30 }
 0xef9   : > { %s2804_s24 = smov %s2342_s27  ;;  %24 = sbr.rel (!%p22_p3) target bundleno = 6 (0x6), region = 108 }
 0xefe   :  { %1768 = vsyncpa [#allocation3], 1 }
 0xeff   :  { %1770 = vsyncpa [#allocation3 + $0x1], 1 }

</bundles_post_ra>
